<compile_context>
chip_gen: v7x
topology: tpu7x:2x2x1
jax: 0.10.0
libtpu: 0.0.40
codegen_flags: <defaults>
</compile_context>

<pallas_src>
import functools

import jax
import jax.numpy as jnp
from jax import lax
from jax.experimental import pallas as pl
from jax.experimental.pallas import tpu as pltpu


def _double_conv_kernel(x_ref, w1_ref, b1_ref, w2_ref, b2_ref, o_ref,
                        xcol_ref, mcol_ref, *, H, W, Cin_p, Cout_p):
    # x_ref   : (1, H, W, Cin_p)        bf16 input tile (unpadded spatially)
    # w1_ref  : (3, 3*Cin_p, Cout_p)    bf16, row index = dx*Cin_p + c, leading index = dy
    # b1_ref  : (1, Cout_p)             f32
    # w2_ref  : (3, 3*Cout_p, Cout_p)   bf16
    # b2_ref  : (1, Cout_p)             f32
    # o_ref   : (1, H, W, Cout_p)       f32
    # xcol_ref: (H+2, W, 3*Cin_p)       bf16 VMEM scratch (im2col slab, zero halo)
    # mcol_ref: (H+2, W, 3*Cout_p)      bf16 VMEM scratch
    cdt = x_ref.dtype

    def fill_cols(col_ref, a, C):
        # a: (H, W, C).  col_ref[r, w, dx*C + c] == zero-padded activation[r, w + dx, c]
        zrow = jnp.zeros((W, 3 * C), a.dtype)
        zcol = jnp.zeros((H, 1, C), a.dtype)
        col_ref[0] = zrow                 # top halo row
        col_ref[H + 1] = zrow             # bottom halo row
        # dx = 1 band: aligned full-width copy
        col_ref[1:H + 1, :, C:2 * C] = a
        # dx = 0 band: zero left column, then right-shifted copy
        col_ref[1:H + 1, 0:1, 0:C] = zcol
        col_ref[1:H + 1, 1:W, 0:C] = a[:, 0:W - 1, :]
        # dx = 2 band: left-shifted copy, then zero right column
        col_ref[1:H + 1, 0:W - 1, 2 * C:3 * C] = a[:, 1:W, :]
        col_ref[1:H + 1, W - 1:W, 2 * C:3 * C] = zcol

    def conv3x3_relu(col_ref, w_ref, b_ref, K):
        # 3 MXU matmuls (one per dy), K = 3*C, f32 accumulation, bias added once.
        acc = jnp.dot(col_ref[0:H].reshape(H * W, K), w_ref[0],
                      preferred_element_type=jnp.float32)
        for dy in (1, 2):
            acc = acc + jnp.dot(col_ref[dy:dy + H].reshape(H * W, K), w_ref[dy],
                                preferred_element_type=jnp.float32)
        return jnp.maximum(acc + b_ref[...], 0.0)          # (H*W, Cout_p) f32

    # ---- conv1 + ReLU ----
    fill_cols(xcol_ref, x_ref[0], Cin_p)
    y1 = conv3x3_relu(xcol_ref, w1_ref, b1_ref, 3 * Cin_p)

    # ---- conv2 + ReLU ----
    fill_cols(mcol_ref, y1.astype(cdt).reshape(H, W, Cout_p), Cout_p)
    y2 = conv3x3_relu(mcol_ref, w2_ref, b2_ref, 3 * Cout_p)

    o_ref[0] = y2.reshape(H, W, Cout_p).astype(o_ref.dtype)


def double_conv(x_nchw, w1_oihw, b1, w2_oihw, b2, *, compute_dtype=jnp.bfloat16):
    """Pallas implementation of DoubleConv.forward (PyTorch NCHW / OIHW conventions)."""
    B, Cin, H, W = x_nchw.shape
    Cout = w1_oihw.shape[0]
    LANE = 128
    Cin_p = ((Cin + LANE - 1) // LANE) * LANE
    Cout_p = ((Cout + LANE - 1) // LANE) * LANE

    # NCHW -> NHWC (channels on the 128-lane axis), pad channels to 128-multiple, bf16 compute.
    x_nhwc = jnp.transpose(x_nchw, (0, 2, 3, 1)).astype(compute_dtype)
    x_p = jnp.pad(x_nhwc, ((0, 0), (0, 0), (0, 0), (0, Cin_p - Cin)))

    def prep_w(w_oihw, ci, ci_p):
        # OIHW -> (ky, kx, ci, co) -> zero-pad channels -> (ky, kx*ci_p, co)
        w = jnp.transpose(w_oihw, (2, 3, 1, 0))
        w = jnp.pad(w, ((0, 0), (0, 0), (0, ci_p - ci), (0, Cout_p - Cout)))
        return w.reshape(3, 3 * ci_p, Cout_p).astype(compute_dtype)

    w1_k = prep_w(w1_oihw, Cin, Cin_p)
    w2_k = prep_w(w2_oihw, Cout, Cout_p)
    b1_r = jnp.pad(b1, (0, Cout_p - Cout)).reshape(1, Cout_p).astype(jnp.float32)
    b2_r = jnp.pad(b2, (0, Cout_p - Cout)).reshape(1, Cout_p).astype(jnp.float32)

    kernel = functools.partial(_double_conv_kernel, H=H, W=W, Cin_p=Cin_p, Cout_p=Cout_p)

    out_nhwc = pl.pallas_call(
        kernel,
        out_shape=jax.ShapeDtypeStruct((B, H, W, Cout_p), jnp.float32),
        grid_spec=pltpu.PrefetchScalarGridSpec(
            num_scalar_prefetch=0,
            grid=(B,),
            in_specs=[
                pl.BlockSpec((1, H, W, Cin_p), lambda b: (b, 0, 0, 0)),
                pl.BlockSpec((3, 3 * Cin_p, Cout_p), lambda b: (0, 0, 0)),
                pl.BlockSpec((1, Cout_p), lambda b: (0, 0)),
                pl.BlockSpec((3, 3 * Cout_p, Cout_p), lambda b: (0, 0, 0)),
                pl.BlockSpec((1, Cout_p), lambda b: (0, 0)),
            ],
            out_specs=pl.BlockSpec((1, H, W, Cout_p), lambda b: (b, 0, 0, 0)),
            scratch_shapes=[
                pltpu.VMEM((H + 2, W, 3 * Cin_p), compute_dtype),
                pltpu.VMEM((H + 2, W, 3 * Cout_p), compute_dtype),
            ],
        ),
        compiler_params=pltpu.CompilerParams(
            dimension_semantics=("parallel",),
            vmem_limit_bytes=48 * 1024 * 1024,
        ),
    )(x_p, w1_k, b1_r, w2_k, b2_r)

    # Drop channel padding, NHWC -> NCHW to match the PyTorch output convention.
    return jnp.transpose(out_nhwc[..., :Cout], (0, 3, 1, 2)).astype(jnp.float32)


def _reference_double_conv(x_nchw, w1_oihw, b1, w2_oihw, b2):
    dn = ("NCHW", "OIHW", "NCHW")
    y = lax.conv_general_dilated(x_nchw, w1_oihw, window_strides=(1, 1),
                                 padding="SAME", dimension_numbers=dn)
    y = jnp.maximum(y + b1.reshape(1, -1, 1, 1), 0.0)
    y = lax.conv_general_dilated(y, w2_oihw, window_strides=(1, 1),
                                 padding="SAME", dimension_numbers=dn)
    y = jnp.maximum(y + b2.reshape(1, -1, 1, 1), 0.0)
    return y


if __name__ == "__main__":
    B, Cin, Cout, H, W = 2, 4, 8, 16, 16

    key = jax.random.PRNGKey(0)
    kx, k1, kb1, k2, kb2 = jax.random.split(key, 5)

    x = jax.random.normal(kx, (B, Cin, H, W), dtype=jnp.float32)
    # Deterministic parameter init (shapes from nn.Conv2d(in, out, 3, padding=1))
    w1 = jax.random.normal(k1, (Cout, Cin, 3, 3), dtype=jnp.float32) * 0.1
    b1 = jax.random.normal(kb1, (Cout,), dtype=jnp.float32) * 0.1
    w2 = jax.random.normal(k2, (Cout, Cout, 3, 3), dtype=jnp.float32) * 0.1
    b2 = jax.random.normal(kb2, (Cout,), dtype=jnp.float32) * 0.1

    out = jax.block_until_ready(double_conv(x, w1, b1, w2, b2))
    ref = jax.block_until_ready(_reference_double_conv(x, w1, b1, w2, b2))

    assert out.shape == (B, Cout, H, W)
    # bf16 activations/weights with f32 accumulation -> loosened tolerance vs f32 reference.
    assert jnp.allclose(out, ref, rtol=2e-2, atol=2e-2), float(jnp.max(jnp.abs(out - ref)))

    print("KERNEL_OK")
</pallas_src>

<mosaic_0001>
module attributes {stable_mosaic.version = 11 : i64} {
  func.func @_double_conv_kernel(%arg0: i32, %arg1: memref<1x16x16x128xbf16, #tpu.memory_space<vmem>>, %arg2: memref<3x384x128xbf16, #tpu.memory_space<vmem>>, %arg3: memref<1x128xf32, #tpu.memory_space<vmem>>, %arg4: memref<3x384x128xbf16, #tpu.memory_space<vmem>>, %arg5: memref<1x128xf32, #tpu.memory_space<vmem>>, %arg6: memref<1x16x16x128xf32, #tpu.memory_space<vmem>>, %arg7: memref<18x16x384xbf16, #tpu.memory_space<vmem>>, %arg8: memref<18x16x384xbf16, #tpu.memory_space<vmem>>) attributes {dimension_semantics = [#tpu.dimension_semantics<parallel>], iteration_bounds = array<i64: 2>, scalar_prefetch = 0 : i64, scratch_operands = 2 : i64, tpu.core_type = #tpu.core_type<tc>, window_params = [{transform_indices = @transform_0, window_bounds = array<i64: 1, 16, 16, 128>}, {pipeline_mode = #tpu.pipeline_mode<synchronous>, transform_indices = @transform_1, window_bounds = array<i64: 3, 384, 128>}, {pipeline_mode = #tpu.pipeline_mode<synchronous>, transform_indices = @transform_2, window_bounds = array<i64: 1, 128>}, {pipeline_mode = #tpu.pipeline_mode<synchronous>, transform_indices = @transform_3, window_bounds = array<i64: 3, 384, 128>}, {pipeline_mode = #tpu.pipeline_mode<synchronous>, transform_indices = @transform_4, window_bounds = array<i64: 1, 128>}, {transform_indices = @transform_5, window_bounds = array<i64: 1, 16, 16, 128>}]} {
    %c0 = arith.constant 0 : index
    %c0_0 = arith.constant 0 : index
    %c0_1 = arith.constant 0 : index
    %c0_2 = arith.constant 0 : index
    %0 = vector.load %arg1[%c0, %c0_0, %c0_1, %c0_2] : memref<1x16x16x128xbf16, #tpu.memory_space<vmem>>, vector<1x16x16x128xbf16>
    %1 = vector.shape_cast %0 : vector<1x16x16x128xbf16> to vector<16x16x128xbf16>
    %cst = arith.constant 0.000000e+00 : bf16
    %2 = vector.broadcast %cst : bf16 to vector<16x384xbf16>
    %cst_3 = arith.constant 0.000000e+00 : bf16
    %3 = vector.broadcast %cst_3 : bf16 to vector<16x1x128xbf16>
    %c0_4 = arith.constant 0 : index
    %c0_5 = arith.constant 0 : index
    %c0_6 = arith.constant 0 : index
    %4 = vector.load %arg7[%c0_4, %c0_5, %c0_6] : memref<18x16x384xbf16, #tpu.memory_space<vmem>>, vector<1x16x384xbf16>
    %5 = vector.shape_cast %4 : vector<1x16x384xbf16> to vector<16x384xbf16>
    %6 = vector.shape_cast %2 : vector<16x384xbf16> to vector<1x16x384xbf16>
    tpu.vector_store %arg7[%c0_4, %c0_5, %c0_6], %6 {strides = array<i32>} : memref<18x16x384xbf16, #tpu.memory_space<vmem>>, vector<1x16x384xbf16>,
    %c17 = arith.constant 17 : index
    %c0_7 = arith.constant 0 : index
    %c0_8 = arith.constant 0 : index
    %7 = vector.load %arg7[%c17, %c0_7, %c0_8] : memref<18x16x384xbf16, #tpu.memory_space<vmem>>, vector<1x16x384xbf16>
    %8 = vector.shape_cast %7 : vector<1x16x384xbf16> to vector<16x384xbf16>
    %9 = vector.shape_cast %2 : vector<16x384xbf16> to vector<1x16x384xbf16>
    tpu.vector_store %arg7[%c17, %c0_7, %c0_8], %9 {strides = array<i32>} : memref<18x16x384xbf16, #tpu.memory_space<vmem>>, vector<1x16x384xbf16>,
    %c1 = arith.constant 1 : index
    %c0_9 = arith.constant 0 : index
    %c128 = arith.constant 128 : index
    %10 = vector.load %arg7[%c1, %c0_9, %c128] : memref<18x16x384xbf16, #tpu.memory_space<vmem>>, vector<16x16x128xbf16>
    tpu.vector_store %arg7[%c1, %c0_9, %c128], %1 {strides = array<i32>} : memref<18x16x384xbf16, #tpu.memory_space<vmem>>, vector<16x16x128xbf16>,
    %c1_10 = arith.constant 1 : index
    %c0_11 = arith.constant 0 : index
    %c0_12 = arith.constant 0 : index
    %11 = vector.load %arg7[%c1_10, %c0_11, %c0_12] : memref<18x16x384xbf16, #tpu.memory_space<vmem>>, vector<16x1x128xbf16>
    tpu.vector_store %arg7[%c1_10, %c0_11, %c0_12], %3 {strides = array<i32>} : memref<18x16x384xbf16, #tpu.memory_space<vmem>>, vector<16x1x128xbf16>,
    %12 = vector.extract_strided_slice %1 {offsets = [0, 0, 0], sizes = [16, 15, 128], strides = [1, 1, 1]} : vector<16x16x128xbf16> to vector<16x15x128xbf16>
    %c1_13 = arith.constant 1 : index
    %c1_14 = arith.constant 1 : index
    %c0_15 = arith.constant 0 : index
    %13 = vector.load %arg7[%c1_13, %c1_14, %c0_15] : memref<18x16x384xbf16, #tpu.memory_space<vmem>>, vector<16x15x128xbf16>
    tpu.vector_store %arg7[%c1_13, %c1_14, %c0_15], %12 {strides = array<i32>} : memref<18x16x384xbf16, #tpu.memory_space<vmem>>, vector<16x15x128xbf16>,
    %14 = vector.extract_strided_slice %1 {offsets = [0, 1, 0], sizes = [16, 15, 128], strides = [1, 1, 1]} : vector<16x16x128xbf16> to vector<16x15x128xbf16>
    %c1_16 = arith.constant 1 : index
    %c0_17 = arith.constant 0 : index
    %c256 = arith.constant 256 : index
    %15 = vector.load %arg7[%c1_16, %c0_17, %c256] : memref<18x16x384xbf16, #tpu.memory_space<vmem>>, vector<16x15x128xbf16>
    tpu.vector_store %arg7[%c1_16, %c0_17, %c256], %14 {strides = array<i32>} : memref<18x16x384xbf16, #tpu.memory_space<vmem>>, vector<16x15x128xbf16>,
    %c1_18 = arith.constant 1 : index
    %c15 = arith.constant 15 : index
    %c256_19 = arith.constant 256 : index
    %16 = vector.load %arg7[%c1_18, %c15, %c256_19] : memref<18x16x384xbf16, #tpu.memory_space<vmem>>, vector<16x1x128xbf16>
    tpu.vector_store %arg7[%c1_18, %c15, %c256_19], %3 {strides = array<i32>} : memref<18x16x384xbf16, #tpu.memory_space<vmem>>, vector<16x1x128xbf16>,
    %c0_20 = arith.constant 0 : index
    %c0_21 = arith.constant 0 : index
    %c0_22 = arith.constant 0 : index
    %17 = vector.load %arg7[%c0_20, %c0_21, %c0_22] : memref<18x16x384xbf16, #tpu.memory_space<vmem>>, vector<16x16x384xbf16>
    %18 = vector.shape_cast %17 : vector<16x16x384xbf16> to vector<256x384xbf16>
    %c0_23 = arith.constant 0 : index
    %c0_24 = arith.constant 0 : index
    %c0_25 = arith.constant 0 : index
    %19 = vector.load %arg2[%c0_23, %c0_24, %c0_25] : memref<3x384x128xbf16, #tpu.memory_space<vmem>>, vector<1x384x128xbf16>
    %20 = vector.shape_cast %19 : vector<1x384x128xbf16> to vector<384x128xbf16>
    %cst_26 = arith.constant dense<0.000000e+00> : vector<256x128xf32>
    %21 = tpu.matmul %18, %20, %cst_26 {dimension_numbers = #tpu.dot_dimension_numbers<[1], [0], [0], [1], [0, 0, 1, 1], [], []>} : vector<256x384xbf16>, vector<384x128xbf16>, vector<256x128xf32> -> vector<256x128xf32>
    %c1_27 = arith.constant 1 : index
    %c0_28 = arith.constant 0 : index
    %c0_29 = arith.constant 0 : index
    %22 = vector.load %arg7[%c1_27, %c0_28, %c0_29] : memref<18x16x384xbf16, #tpu.memory_space<vmem>>, vector<16x16x384xbf16>
    %23 = vector.shape_cast %22 : vector<16x16x384xbf16> to vector<256x384xbf16>
    %c1_30 = arith.constant 1 : index
    %c0_31 = arith.constant 0 : index
    %c0_32 = arith.constant 0 : index
    %24 = vector.load %arg2[%c1_30, %c0_31, %c0_32] : memref<3x384x128xbf16, #tpu.memory_space<vmem>>, vector<1x384x128xbf16>
    %25 = vector.shape_cast %24 : vector<1x384x128xbf16> to vector<384x128xbf16>
    %cst_33 = arith.constant dense<0.000000e+00> : vector<256x128xf32>
    %26 = tpu.matmul %23, %25, %cst_33 {dimension_numbers = #tpu.dot_dimension_numbers<[1], [0], [0], [1], [0, 0, 1, 1], [], []>} : vector<256x384xbf16>, vector<384x128xbf16>, vector<256x128xf32> -> vector<256x128xf32>
    %27 = arith.addf %21, %26 : vector<256x128xf32>
    %c2 = arith.constant 2 : index
    %c0_34 = arith.constant 0 : index
    %c0_35 = arith.constant 0 : index
    %28 = vector.load %arg7[%c2, %c0_34, %c0_35] : memref<18x16x384xbf16, #tpu.memory_space<vmem>>, vector<16x16x384xbf16>
    %29 = vector.shape_cast %28 : vector<16x16x384xbf16> to vector<256x384xbf16>
    %c2_36 = arith.constant 2 : index
    %c0_37 = arith.constant 0 : index
    %c0_38 = arith.constant 0 : index
    %30 = vector.load %arg2[%c2_36, %c0_37, %c0_38] : memref<3x384x128xbf16, #tpu.memory_space<vmem>>, vector<1x384x128xbf16>
    %31 = vector.shape_cast %30 : vector<1x384x128xbf16> to vector<384x128xbf16>
    %cst_39 = arith.constant dense<0.000000e+00> : vector<256x128xf32>
    %32 = tpu.matmul %29, %31, %cst_39 {dimension_numbers = #tpu.dot_dimension_numbers<[1], [0], [0], [1], [0, 0, 1, 1], [], []>} : vector<256x384xbf16>, vector<384x128xbf16>, vector<256x128xf32> -> vector<256x128xf32>
    %33 = arith.addf %27, %32 : vector<256x128xf32>
    %c0_40 = arith.constant 0 : index
    %c0_41 = arith.constant 0 : index
    %34 = vector.load %arg3[%c0_40, %c0_41] : memref<1x128xf32, #tpu.memory_space<vmem>>, vector<1x128xf32>
    %35 = vector.broadcast %34 : vector<1x128xf32> to vector<256x128xf32>
    %36 = arith.addf %33, %35 : vector<256x128xf32>
    %cst_42 = arith.constant 0.000000e+00 : f32
    %37 = vector.broadcast %cst_42 : f32 to vector<256x128xf32>
    %38 = arith.maximumf %36, %37 : vector<256x128xf32>
    %39 = arith.truncf %38 : vector<256x128xf32> to vector<256x128xbf16>
    %40 = vector.shape_cast %39 : vector<256x128xbf16> to vector<16x16x128xbf16>
    %cst_43 = arith.constant 0.000000e+00 : bf16
    %41 = vector.broadcast %cst_43 : bf16 to vector<16x384xbf16>
    %cst_44 = arith.constant 0.000000e+00 : bf16
    %42 = vector.broadcast %cst_44 : bf16 to vector<16x1x128xbf16>
    %c0_45 = arith.constant 0 : index
    %c0_46 = arith.constant 0 : index
    %c0_47 = arith.constant 0 : index
    %43 = vector.load %arg8[%c0_45, %c0_46, %c0_47] : memref<18x16x384xbf16, #tpu.memory_space<vmem>>, vector<1x16x384xbf16>
    %44 = vector.shape_cast %43 : vector<1x16x384xbf16> to vector<16x384xbf16>
    %45 = vector.shape_cast %41 : vector<16x384xbf16> to vector<1x16x384xbf16>
    tpu.vector_store %arg8[%c0_45, %c0_46, %c0_47], %45 {strides = array<i32>} : memref<18x16x384xbf16, #tpu.memory_space<vmem>>, vector<1x16x384xbf16>,
    %c17_48 = arith.constant 17 : index
    %c0_49 = arith.constant 0 : index
    %c0_50 = arith.constant 0 : index
    %46 = vector.load %arg8[%c17_48, %c0_49, %c0_50] : memref<18x16x384xbf16, #tpu.memory_space<vmem>>, vector<1x16x384xbf16>
    %47 = vector.shape_cast %46 : vector<1x16x384xbf16> to vector<16x384xbf16>
    %48 = vector.shape_cast %41 : vector<16x384xbf16> to vector<1x16x384xbf16>
    tpu.vector_store %arg8[%c17_48, %c0_49, %c0_50], %48 {strides = array<i32>} : memref<18x16x384xbf16, #tpu.memory_space<vmem>>, vector<1x16x384xbf16>,
    %c1_51 = arith.constant 1 : index
    %c0_52 = arith.constant 0 : index
    %c128_53 = arith.constant 128 : index
    %49 = vector.load %arg8[%c1_51, %c0_52, %c128_53] : memref<18x16x384xbf16, #tpu.memory_space<vmem>>, vector<16x16x128xbf16>
    tpu.vector_store %arg8[%c1_51, %c0_52, %c128_53], %40 {strides = array<i32>} : memref<18x16x384xbf16, #tpu.memory_space<vmem>>, vector<16x16x128xbf16>,
    %c1_54 = arith.constant 1 : index
    %c0_55 = arith.constant 0 : index
    %c0_56 = arith.constant 0 : index
    %50 = vector.load %arg8[%c1_54, %c0_55, %c0_56] : memref<18x16x384xbf16, #tpu.memory_space<vmem>>, vector<16x1x128xbf16>
    tpu.vector_store %arg8[%c1_54, %c0_55, %c0_56], %42 {strides = array<i32>} : memref<18x16x384xbf16, #tpu.memory_space<vmem>>, vector<16x1x128xbf16>,
    %51 = vector.extract_strided_slice %40 {offsets = [0, 0, 0], sizes = [16, 15, 128], strides = [1, 1, 1]} : vector<16x16x128xbf16> to vector<16x15x128xbf16>
    %c1_57 = arith.constant 1 : index
    %c1_58 = arith.constant 1 : index
    %c0_59 = arith.constant 0 : index
    %52 = vector.load %arg8[%c1_57, %c1_58, %c0_59] : memref<18x16x384xbf16, #tpu.memory_space<vmem>>, vector<16x15x128xbf16>
    tpu.vector_store %arg8[%c1_57, %c1_58, %c0_59], %51 {strides = array<i32>} : memref<18x16x384xbf16, #tpu.memory_space<vmem>>, vector<16x15x128xbf16>,
    %53 = vector.extract_strided_slice %40 {offsets = [0, 1, 0], sizes = [16, 15, 128], strides = [1, 1, 1]} : vector<16x16x128xbf16> to vector<16x15x128xbf16>
    %c1_60 = arith.constant 1 : index
    %c0_61 = arith.constant 0 : index
    %c256_62 = arith.constant 256 : index
    %54 = vector.load %arg8[%c1_60, %c0_61, %c256_62] : memref<18x16x384xbf16, #tpu.memory_space<vmem>>, vector<16x15x128xbf16>
    tpu.vector_store %arg8[%c1_60, %c0_61, %c256_62], %53 {strides = array<i32>} : memref<18x16x384xbf16, #tpu.memory_space<vmem>>, vector<16x15x128xbf16>,
    %c1_63 = arith.constant 1 : index
    %c15_64 = arith.constant 15 : index
    %c256_65 = arith.constant 256 : index
    %55 = vector.load %arg8[%c1_63, %c15_64, %c256_65] : memref<18x16x384xbf16, #tpu.memory_space<vmem>>, vector<16x1x128xbf16>
    tpu.vector_store %arg8[%c1_63, %c15_64, %c256_65], %42 {strides = array<i32>} : memref<18x16x384xbf16, #tpu.memory_space<vmem>>, vector<16x1x128xbf16>,
    %c0_66 = arith.constant 0 : index
    %c0_67 = arith.constant 0 : index
    %c0_68 = arith.constant 0 : index
    %56 = vector.load %arg8[%c0_66, %c0_67, %c0_68] : memref<18x16x384xbf16, #tpu.memory_space<vmem>>, vector<16x16x384xbf16>
    %57 = vector.shape_cast %56 : vector<16x16x384xbf16> to vector<256x384xbf16>
    %c0_69 = arith.constant 0 : index
    %c0_70 = arith.constant 0 : index
    %c0_71 = arith.constant 0 : index
    %58 = vector.load %arg4[%c0_69, %c0_70, %c0_71] : memref<3x384x128xbf16, #tpu.memory_space<vmem>>, vector<1x384x128xbf16>
    %59 = vector.shape_cast %58 : vector<1x384x128xbf16> to vector<384x128xbf16>
    %cst_72 = arith.constant dense<0.000000e+00> : vector<256x128xf32>
    %60 = tpu.matmul %57, %59, %cst_72 {dimension_numbers = #tpu.dot_dimension_numbers<[1], [0], [0], [1], [0, 0, 1, 1], [], []>} : vector<256x384xbf16>, vector<384x128xbf16>, vector<256x128xf32> -> vector<256x128xf32>
    %c1_73 = arith.constant 1 : index
    %c0_74 = arith.constant 0 : index
    %c0_75 = arith.constant 0 : index
    %61 = vector.load %arg8[%c1_73, %c0_74, %c0_75] : memref<18x16x384xbf16, #tpu.memory_space<vmem>>, vector<16x16x384xbf16>
    %62 = vector.shape_cast %61 : vector<16x16x384xbf16> to vector<256x384xbf16>
    %c1_76 = arith.constant 1 : index
    %c0_77 = arith.constant 0 : index
    %c0_78 = arith.constant 0 : index
    %63 = vector.load %arg4[%c1_76, %c0_77, %c0_78] : memref<3x384x128xbf16, #tpu.memory_space<vmem>>, vector<1x384x128xbf16>
    %64 = vector.shape_cast %63 : vector<1x384x128xbf16> to vector<384x128xbf16>
    %cst_79 = arith.constant dense<0.000000e+00> : vector<256x128xf32>
    %65 = tpu.matmul %62, %64, %cst_79 {dimension_numbers = #tpu.dot_dimension_numbers<[1], [0], [0], [1], [0, 0, 1, 1], [], []>} : vector<256x384xbf16>, vector<384x128xbf16>, vector<256x128xf32> -> vector<256x128xf32>
    %66 = arith.addf %60, %65 : vector<256x128xf32>
    %c2_80 = arith.constant 2 : index
    %c0_81 = arith.constant 0 : index
    %c0_82 = arith.constant 0 : index
    %67 = vector.load %arg8[%c2_80, %c0_81, %c0_82] : memref<18x16x384xbf16, #tpu.memory_space<vmem>>, vector<16x16x384xbf16>
    %68 = vector.shape_cast %67 : vector<16x16x384xbf16> to vector<256x384xbf16>
    %c2_83 = arith.constant 2 : index
    %c0_84 = arith.constant 0 : index
    %c0_85 = arith.constant 0 : index
    %69 = vector.load %arg4[%c2_83, %c0_84, %c0_85] : memref<3x384x128xbf16, #tpu.memory_space<vmem>>, vector<1x384x128xbf16>
    %70 = vector.shape_cast %69 : vector<1x384x128xbf16> to vector<384x128xbf16>
    %cst_86 = arith.constant dense<0.000000e+00> : vector<256x128xf32>
    %71 = tpu.matmul %68, %70, %cst_86 {dimension_numbers = #tpu.dot_dimension_numbers<[1], [0], [0], [1], [0, 0, 1, 1], [], []>} : vector<256x384xbf16>, vector<384x128xbf16>, vector<256x128xf32> -> vector<256x128xf32>
    %72 = arith.addf %66, %71 : vector<256x128xf32>
    %c0_87 = arith.constant 0 : index
    %c0_88 = arith.constant 0 : index
    %73 = vector.load %arg5[%c0_87, %c0_88] : memref<1x128xf32, #tpu.memory_space<vmem>>, vector<1x128xf32>
    %74 = vector.broadcast %73 : vector<1x128xf32> to vector<256x128xf32>
    %75 = arith.addf %72, %74 : vector<256x128xf32>
    %cst_89 = arith.constant 0.000000e+00 : f32
    %76 = vector.broadcast %cst_89 : f32 to vector<256x128xf32>
    %77 = arith.maximumf %75, %76 : vector<256x128xf32>
    %78 = vector.shape_cast %77 : vector<256x128xf32> to vector<16x16x128xf32>
    %c0_90 = arith.constant 0 : index
    %c0_91 = arith.constant 0 : index
    %c0_92 = arith.constant 0 : index
    %c0_93 = arith.constant 0 : index
    %79 = vector.load %arg6[%c0_90, %c0_91, %c0_92, %c0_93] : memref<1x16x16x128xf32, #tpu.memory_space<vmem>>, vector<1x16x16x128xf32>
    %80 = vector.shape_cast %79 : vector<1x16x16x128xf32> to vector<16x16x128xf32>
    %81 = vector.shape_cast %78 : vector<16x16x128xf32> to vector<1x16x16x128xf32>
    tpu.vector_store %arg6[%c0_90, %c0_91, %c0_92, %c0_93], %81 {strides = array<i32>} : memref<1x16x16x128xf32, #tpu.memory_space<vmem>>, vector<1x16x16x128xf32>,
    return
  }
  func.func @transform_0(%arg0: i32) -> (i32, i32, i32, i32) {
    %c0_i32 = arith.constant 0 : i32
    %c0_i32_0 = arith.constant 0 : i32
    %c0_i32_1 = arith.constant 0 : i32
    %c0_i32_2 = arith.constant 0 : i32
    return %arg0, %c0_i32, %c0_i32_0, %c0_i32_1 : i32, i32, i32, i32
  }
  func.func @transform_1(%arg0: i32) -> (i32, i32, i32) {
    %c0_i32 = arith.constant 0 : i32
    %c0_i32_0 = arith.constant 0 : i32
    %c0_i32_1 = arith.constant 0 : i32
    %c0_i32_2 = arith.constant 0 : i32
    return %c0_i32, %c0_i32_0, %c0_i32_1 : i32, i32, i32
  }
  func.func @transform_2(%arg0: i32) -> (i32, i32) {
    %c0_i32 = arith.constant 0 : i32
    %c0_i32_0 = arith.constant 0 : i32
    %c0_i32_1 = arith.constant 0 : i32
    return %c0_i32, %c0_i32_0 : i32, i32
  }
  func.func @transform_3(%arg0: i32) -> (i32, i32, i32) {
    %c0_i32 = arith.constant 0 : i32
    %c0_i32_0 = arith.constant 0 : i32
    %c0_i32_1 = arith.constant 0 : i32
    %c0_i32_2 = arith.constant 0 : i32
    return %c0_i32, %c0_i32_0, %c0_i32_1 : i32, i32, i32
  }
  func.func @transform_4(%arg0: i32) -> (i32, i32) {
    %c0_i32 = arith.constant 0 : i32
    %c0_i32_0 = arith.constant 0 : i32
    %c0_i32_1 = arith.constant 0 : i32
    return %c0_i32, %c0_i32_0 : i32, i32
  }
  func.func @transform_5(%arg0: i32) -> (i32, i32, i32, i32) {
    %c0_i32 = arith.constant 0 : i32
    %c0_i32_0 = arith.constant 0 : i32
    %c0_i32_1 = arith.constant 0 : i32
    %c0_i32_2 = arith.constant 0 : i32
    return %arg0, %c0_i32, %c0_i32_0, %c0_i32_1 : i32, i32, i32, i32
  }
}

</mosaic_0001>

<bundles_post_ra>
// kernel: tpu_custom_call.1
= control target key start
LH: loop header
LB: loop body
LE: loop exit
PB: predicated region body
PF: predicated region fallthrough
CT: control target
= control target key end

     0   :  { %10 = vsyncpa [#allocation5], 0  ;;  %s8884_s0 = inlined_call_operand.hbm [shape: bf16[2,16,16,128], index: 0, kind: input, shape index: {}]   ;;  %s8885_s1 = inlined_call_operand.hbm [shape: bf16[3,384,128], index: 1, kind: input, shape index: {}]   ;;  %s8886_s2 = inlined_call_operand.vmem [shape: f32[1,128], index: 2, kind: input, shape index: {}]   ;;  %s8887_s3 = inlined_call_operand.hbm [shape: bf16[3,384,128], index: 3, kind: input, shape index: {}]   ;;  %s8888_s4 = inlined_call_operand.vmem [shape: f32[1,128], index: 4, kind: input, shape index: {}]   ;;  %s8889_s5 = inlined_call_operand.hbm [shape: f32[2,16,16,128], index: 5, kind: output, shape index: {}]  }
   0x1   :  { %12 = vsyncpa [#allocation5 + $0x1], 0 }
   0x2   :  { %13 = vsyncpa [#allocation8], 0 }
   0x3   :  { %14 = vsyncpa [#allocation6], 0 }
   0x4   :  { %16 = vsyncpa [#allocation6 + $0x1], 0  ;;  %s6975_s18 = smov 0   ;;  %s6977_s19 = smov 0  }
   0x5   :  { %s6979_s20 = smov 0   ;;  %s6981_s21 = smov 0  }
   0x6 LB: > { %s6996_s22 = sadd.s32 4294967295, %s6934_s21   ;;  %s4934_s23 = sadd.s32 4294967294, %s6934_s21   ;;  %s6934_s21 = sphi %s6981_s21, %s8979_s21   ;;  %s6930_s20 = sphi %s6979_s20, %s8978_s20   ;;  %s6926_s19 = sphi %s6977_s19, %s8977_s19   ;;  %s6922_s18 = sphi %s6975_s18, %s8976_s18  }
   0x7   : > { %p42_p0 = scmp.ne.s32.totalorder %s6926_s19, %s6922_s18  ;;  %p8890_p1 = scmp.eq.s32.totalorder %s6996_s22, 0 }
   0x8   : > { %p156_p3 = scmp.eq.s32.totalorder %s4934_s23, 1  ;;  %p4935_p5 = scmp.ge.s32.totalorder %s6934_s21, 1 }
   0x9   : > { %p7005_p4 = por %p8890_p1, %p42_p0  ;;  %p163_p7 = scmp.lt.s32.totalorder %s6934_s21, 3 }
   0xa   : > { %p7010_p6 = por %p156_p3, %p42_p0  ;;  %s6936_s27 = smov [#allocation7]  }
   0xb   : > { %s8904_s24 = scalar_select %p7005_p4, 1, 0 }
   0xc   : > { %s8905_s25 = scalar_select %p7010_p6, 1, 0 }
   0xd   : > { %p7015_p8 = pnand %p4935_p5, %p163_p7  ;;  %s175_s28 = sshll.u32 %s6936_s27, 4  ;;  %s7019_s28 = int_to_ptr.vmem [resolvable:$true] %s175_s28 }
   0xe   : > { %s6937_s30 = smov [#allocation9]   ;;  %s6778_s9 = scalar_lea.hbm %s8885_s1, 9216 }
   0xf   : > { %p6552_p9 = pneg %p7015_p8  ;;  %s191_s6 = sshll.u32 %s6937_s30, 4  ;;  %s7030_s6 = int_to_ptr.vmem [resolvable:$true] %s191_s6 }
  0x10   : > { %p6779_p12 = scmp.ne.s32.totalorder %s8885_s1, %s6778_s9  ;;  %p6785_p5 = scmp.lt.u32.totalorder %s6778_s9, %s8885_s1 }
  0x11   : > { %p7026_p11 = pnand %p6552_p9, %p8890_p1 }
  0x13   : > { %p6780_p13 = pneg %p7026_p11 }
  0x15   : > { %p6781_p0 = pnand %p6780_p13, %p6779_p12 }
  0x17   : > { %p6782_p3 = pneg %p6781_p0 }
  0x19   : > { %p6787_p7 = pnand %p6785_p5, %p6782_p3 }
  0x1b   : > { %6790 = shalt.err (!%p6787_p7)
}
  0x1c   : > { %s6791_s14 = scalar_lea.vmem %s7019_s28, 9216  ;;  %p6799_p2 = scmp.lt.s32.totalorder %s7019_s28, %s7019_s28 }
  0x1d   : > { %p6792_p9 = scmp.ne.s32.totalorder %s7019_s28, %s6791_s14  ;;  %p6800_p12 = scmp.lt.s32.totalorder %s6791_s14, %s6791_s14 }
  0x1f   : > { %p6794_p10 = pnand %p6792_p9, %p6780_p13  ;;  %p6801_p0 = por %p6800_p12, %p6799_p2 }
  0x21   : > { %p6795_p1 = pneg %p6794_p10 }
  0x23   : > { %p6802_p6 = pnand %p6801_p0, %p6795_p1 }
  0x25   : > { %6805 = shalt.err (!%p6802_p6)
}
  0x26   : > { %s6938_s15 = smov 64   ;;  %s6939_s16 = smov 4  }
  0x27   : > { %6555 = dma.hbm_to_vmem [thread:$0]  (!%p7026_p11), %s8885_s1, 9216, %s7019_s28, [#allocation8], %s6938_s15, %s6938_s15, %s6939_s16  }
  0x28   : > { %s6806_s7 = scalar_lea.hbm %s8887_s3, 9216 }
  0x29   : > { %p6807_p1 = scmp.ne.s32.totalorder %s8887_s3, %s6806_s7  ;;  %p6813_p10 = scmp.lt.u32.totalorder %s6806_s7, %s8887_s3 }
  0x2b   : > { %p6809_p2 = pnand %p6807_p1, %p6780_p13 }
  0x2d   : > { %p6810_p6 = pneg %p6809_p2 }
  0x2f   : > { %p6815_p3 = pnand %p6813_p10, %p6810_p6 }
  0x31   : > { %6818 = shalt.err (!%p6815_p3)
}
  0x32   : > { %s6819_s28 = scalar_lea.vmem %s7030_s6, 9216  ;;  %p6827_p12 = scmp.lt.s32.totalorder %s7030_s6, %s7030_s6 }
  0x33   : > { %p6820_p5 = scmp.ne.s32.totalorder %s7030_s6, %s6819_s28  ;;  %p6828_p0 = scmp.lt.s32.totalorder %s6819_s28, %s6819_s28 }
  0x35   : > { %p6822_p7 = pnand %p6820_p5, %p6780_p13  ;;  %p6829_p1 = por %p6828_p0, %p6827_p12 }
  0x37   : > { %p6823_p9 = pneg %p6822_p7 }
  0x39   : > { %p6830_p2 = pnand %p6829_p1, %p6823_p9 }
  0x3b   : > { %6833 = shalt.err (!%p6830_p2)
}
  0x3c   : > { %6558 = dma.hbm_to_vmem [thread:$0]  (!%p7026_p11), %s8887_s3, 9216, %s7030_s6, [#allocation8], %s6938_s15, %s6938_s15, %s6939_s16  }
  0x3d   : > { %s7091_s29 = sadd.s32 1, %s6934_s21   ;;  %s29_s14 = sadd.s32 1, %s6930_s20 }
  0x3e   : > { %s26_s17 = ssub.s32 %s6934_s21, %s7091_s29  ;;  %p36_p13 = scmp.ne.s32.totalorder %s6930_s20, %s6926_s19 }
  0x3f   : > { %p27_p6 = scmp.eq.s32.totalorder %s26_s17, 0  ;;  %p37_p10 = scmp.eq.s32.totalorder %s6934_s21, 0 }
  0x40   : > { %p8908_p3 = scmp.eq.s32.totalorder %s6996_s22, 1  ;;  %p6569_p7 = scmp.lt.s32.totalorder %s6934_s21, 2 }
  0x41   : > { %s7107_s27 = scalar_select %p27_p6, %s6930_s20, %s29_s14  }
  0x42   : > { %p7101_p5 = por %p8908_p3, %p36_p13  ;;  %p38_p9 = por %p37_p10, %p36_p13 }
  0x43   : > { %s208_s30 = sand.u32 1, %s6930_s20   ;;  %s5114_s6 = sshll.u32 %s6934_s21, 11 }
  0x44   : > { %s8909_s23 = scalar_select %p7101_p5, 1, 0 }
  0x45   : > { %s4939_s7 = sshll.u32 %s208_s30, 7  ;;  %s7114_s10 = scalar_lea.hbm %s8884_s0, %s5114_s6 }
  0x46   : > { %s212_s11 = scalar_lea.vmem [#allocation4], %s4939_s7  ;;  %p7118_p11 = pnand %p6569_p7, %p38_p9 }
  0x47   : > { %s219_s28 = sshll.u32 %s212_s11, 4  ;;  %s7122_s13 = scalar_lea.sflag [#allocation5], %s208_s30  ;;  %s7116_s28 = int_to_ptr.vmem [resolvable:$true] %s219_s28 }
  0x48   : > { %s6834_s14 = scalar_lea.hbm %s7114_s10, 2048  ;;  %p6836_p0 = pneg %p7118_p11 }
  0x49   : > { %p6835_p12 = scmp.ne.s32.totalorder %s7114_s10, %s6834_s14  ;;  %s6839_s6 = scalar_lea.hbm %s8884_s0, 4096 }
  0x4a   : > { %p6840_p13 = scmp.lt.u32.totalorder %s7114_s10, %s8884_s0  ;;  %p6841_p6 = scmp.lt.u32.totalorder %s6839_s6, %s6834_s14 }
  0x4b   : > { %p6837_p1 = pnand %p6836_p0, %p6835_p12  ;;  %p6843_p3 = scmp.lt.u32.totalorder %s6834_s14, %s7114_s10 }
  0x4c   : > { %p6842_p10 = por %p6841_p6, %p6840_p13 }
  0x4d   : > { %p6838_p2 = pneg %p6837_p1 }
  0x4e   : > { %p6844_p7 = por %p6843_p3, %p6842_p10 }
  0x50   : > { %p6845_p9 = pnand %p6844_p7, %p6838_p2 }
  0x52   : > { %6848 = shalt.err (!%p6845_p9)
}
  0x53   : > { %s6849_s30 = scalar_lea.vmem %s7116_s28, 2048  ;;  %s6940_s11 = smov [#allocation4]  }
  0x54   : > { %p6850_p12 = scmp.ne.s32.totalorder %s7116_s28, %s6849_s30  ;;  %s6854_s17 = sshll.u32 %s6940_s11, 4  ;;  %s6855_s17 = int_to_ptr.vmem [resolvable:$false] %s6854_s17 }
  0x55   : > { %s6856_s7 = scalar_lea.vmem %s6855_s17, 4096  ;;  %p6857_p4 = scmp.lt.s32.totalorder %s7116_s28, %s6855_s17 }
  0x56   : > { %p6852_p1 = pnand %p6850_p12, %p6836_p0  ;;  %p6858_p13 = scmp.lt.s32.totalorder %s6856_s7, %s6849_s30 }
  0x58   : > { %p6853_p5 = pneg %p6852_p1  ;;  %p6859_p6 = por %p6858_p13, %p6857_p4 }
  0x5a   : > { %p6860_p10 = pnand %p6859_p6, %p6853_p5 }
  0x5c   : > { %6863 = shalt.err (!%p6860_p10)
}
  0x5d   : > { %6562 = dma.hbm_to_vmem [thread:$0]  (!%p7118_p11), %s7114_s10, 2048, %s7116_s28, %s7122_s13, %s6938_s15, %s6938_s15, %s6939_s16  }
  0x5e   : > { %231 = sbr.rel (%p7015_p8) target bundleno = 1196 (0x4ac), region = 40 }
  0x65   : > { %s7156_s14 = sand.u32 1, %s6926_s19   ;;  %p8911_p4 = scmp.ne.s32.totalorder %s8904_s24, 0 }
  0x66   : > { %s4943_s6 = sshll.u32 %s7156_s14, 7  ;;  %s234_s8 = scalar_lea.sflag [#allocation5], %s7156_s14 }
  0x67   : > { %s7160_s9 = scalar_lea.vmem [#allocation4], %s4943_s6 }
  0x68   : > { %6909 = dma.done.wait (%p8911_p4), %s234_s8, 2048  }
  0x69   : > { %6911 = vsyncadd (%p8911_p4), %s234_s8, 4294965248  ;;  %p8912_p5 = scmp.eq.s32.totalorder %s6996_s22, 0 }
  0x6b   : > { %6913 = dma.done.wait (%p8912_p5), [#allocation8], 18432   ;;  %p8913_p8 = pmov %p8912_p5 }
  0x6c   : > { %v6941_v0 = vmov 0   ;;  %v6612_v1 = vld [vmem:[#allocation7 + $0x100] sm:$0xff]   ;;  %v6616_v5 = vld [vmem:[#allocation7 + $0x108] sm:$0xff]   ;;  %v6620_v9 = vld [vmem:[#allocation7 + $0x110] sm:$0xff]   ;;  %vm426_vm0 = vsmask.f32 256 }
  0x6d   : > { %6915 = vsyncadd (%p8913_p8), [#allocation8], 4294948864  ;;  %306 = vst [vmem:[#allocation2 + $0x8] sm:$0xff] %v6941_v0  ;;  %1639 = vmatprep.mubr.bf16.mxu1 %v6941_v0  ;;  %v6613_v2 = vld [vmem:[#allocation7 + $0xc0] sm:$0xff]   ;;  %5116 = vmatprep.subr.bf16.mxu0 %v6612_v1  ;;  %v6617_v6 = vld [vmem:[#allocation7 + $0xc8] sm:$0xff]   ;;  %vm425_vm1 = vcmask 1040384  }
  0x6e   : > { %v6614_v3 = vld [vmem:[#allocation7 + $0x40] sm:$0xff]   ;;  %5117 = vmatpush3.bf16.msra.mxu0 %v6613_v2  ;;  %v6618_v7 = vld [vmem:[#allocation7 + $0x48] sm:$0xff]   ;;  %v6621_v10 = vld [vmem:[#allocation7 + $0xd0] sm:$0xff]   ;;  %vm605_vm3 = vsmask.f32 7938  ;;  %vm604_vm4 = vcmask 1047552  }
  0x6f   : > { %v6615_v4 = vld [vmem:[#allocation7] sm:$0xff]   ;;  %5252 = vmatprep.subr.bf16.mxu1 %v6614_v3  ;;  %5118 = vmatprep.subr.bf16.mxu0 %v6616_v5  ;;  %v6619_v8 = vld [vmem:[#allocation7 + $0x8] sm:$0xff]   ;;  %v6622_v11 = vld [vmem:[#allocation7 + $0x50] sm:$0xff]   ;;  %v8916_v54 = vmov 0  ;;  %vm703_vm6 = vsmask.f32 7424 }
  0x70   : > { %5253 = vmatpush3.bf16.msra.mxu1 %v6615_v4  ;;  %v6623_v12 = vld [vmem:[#allocation7 + $0x10] sm:$0xff]   ;;  %v6624_v13 = vld [vmem:[#allocation7 + $0x118] sm:$0xff]   ;;  %v6628_v17 = vld [vmem:[#allocation7 + $0x120] sm:$0xff]   ;;  %vm753_vm8 = vcmask 1047559   ;;  %vm754_vm9 = vsmask.f32 7966 }
  0x71   : > { %5254 = vmatprep.subr.bf16.mxu1 %v6618_v7  ;;  %v6625_v14 = vld [vmem:[#allocation7 + $0xd8] sm:$0xff]   ;;  %v6629_v18 = vld [vmem:[#allocation7 + $0xe0] sm:$0xff]   ;;  %v6632_v21 = vld [vmem:[#allocation7 + $0x128] sm:$0xff]   ;;  %s4946_s12 = sshll.u32 %s7156_s14, 8  ;;  %s5115_s30 = sshll.u32 %s6996_s22, 12 }
  0x72   : > { %5119 = vmatpush3.bf16.msra.mxu0 %v6617_v6  ;;  %v6626_v15 = vld [vmem:[#allocation7 + $0x58] sm:$0xff]   ;;  %v6630_v19 = vld [vmem:[#allocation7 + $0x60] sm:$0xff]   ;;  %v6633_v22 = vld [vmem:[#allocation7 + $0xe8] sm:$0xff]   ;;  %s8743_s13 = scalar_lea.vmem [#allocation10], %s4946_s12  ;;  %s8835_s6 = scalar_lea.hbm %s8889_s5, %s5115_s30 }
  0x73   : > { %5120 = vmatprep.subr.bf16.mxu0 %v6620_v9  ;;  %v6627_v16 = vld [vmem:[#allocation7 + $0x18] sm:$0xff]   ;;  %v6631_v20 = vld [vmem:[#allocation7 + $0x20] sm:$0xff]   ;;  %v6634_v23 = vld [vmem:[#allocation7 + $0x68] sm:$0xff]   ;;  %s4842_s11 = sshll.u32 %s8743_s13, 4  ;;  %s4829_s22 = scalar_lea.sflag [#allocation6], %s7156_s14  ;;  %s8837_s11 = int_to_ptr.vmem [resolvable:$true] %s4842_s11 }
  0x74   : > { %5255 = vmatpush3.bf16.msra.mxu1 %v6619_v8  ;;  %v6635_v24 = vld [vmem:[#allocation7 + $0x28] sm:$0xff]   ;;  %vm7173_vm2 = vmand %vm425_vm1, %vm426_vm0  ;;  %v6636_v26 = vld [vmem:[#allocation7 + $0x130] sm:$0xff]   ;;  %s6864_s8 = scalar_lea.vmem %s8837_s11, 4096  ;;  %p8973_p0 = scmp.ne.s32.totalorder %s8909_s23, 0 }
  0x75   : > { %5256 = vmatprep.subr.bf16.mxu1 %v6622_v11  ;;  %v6637_v27 = vld [vmem:[#allocation7 + $0xf0] sm:$0xff]   ;;  %v6640_v30 = vld [vmem:[#allocation7 + $0x138] sm:$0xff]   ;;  %v7178_v34 = vld [vmem:[%s7160_s9] sm:$0xff]   ;;  %p6865_p11 = scmp.ne.s32.totalorder %s8837_s11, %s6864_s8 }
  0x76   : > { %5121 = vmatpush3.bf16.msra.mxu0 %v6621_v10  ;;  %v6638_v28 = vld [vmem:[#allocation7 + $0x70] sm:$0xff]   ;;  %v6641_v31 = vld [vmem:[#allocation7 + $0xf8] sm:$0xff]   ;;  %v477_v36 = vshrl.u32 %v7178_v34, 16  ;;  %1173 = vmatprep.mubr.bf16.mxu0 %v7178_v34  ;;  %v6645_v38 = vld [vmem:[#allocation7 + $0x140] sm:$0xff]   ;;  %v480_v39 = vshll.u32 %v7178_v34, 16 }
  0x77   : > { %5122 = vmatprep.subr.bf16.mxu0 %v6624_v13  ;;  %v6639_v29 = vld [vmem:[#allocation7 + $0x30] sm:$0xff]   ;;  %v6642_v32 = vld [vmem:[#allocation7 + $0x78] sm:$0xff]   ;;  %v7186_v40 = vld [vmem:[%s7160_s9 + $0x8] sm:$0xff]   ;;  %p6866_p2 = pnand %p6865_p11, %p8973_p0 }
  0x78   : > { %5257 = vmatpush3.bf16.msra.mxu1 %v6623_v12  ;;  %v6643_v33 = vld [vmem:[#allocation7 + $0x38] sm:$0xff]   ;;  %v431_v41 = vld [vmem:[#allocation2 + $0x30] sm:$0x1]  ;;  %v479_v42 = vrot.slane %v477_v36, 7  ;;  %410 = vst [vmem:[#allocation2 + $0x38] sm:$0xff] %v7186_v40  ;;  %v484_v44 = vshrl.u32 %v7186_v40, 16  ;;  %vm7214_vm5 = vmand %vm604_vm4, %vm605_vm3 }
  0x79   : > { %5258 = vmatprep.subr.bf16.mxu1 %v6626_v15  ;;  %v428_v35 = vld [vmem:[#allocation2 + $0x18] sm:$0x1]  ;;  %v432_v43 = vsel %vm7173_vm2, 0, %v431_v41  ;;  %v487_v45 = vshll.u32 %v7186_v40, 16  ;;  %v7198_v46 = vld [vmem:[%s7160_s9 + $0x10] sm:$0xff]   ;;  %v8917_v54 = vsel %vm7214_vm5, 4294967295, %v8916_v54  ;;  %vm7432_vm7 = vmand %vm604_vm4, %vm703_vm6  ;;  %p6867_p3 = pneg %p6866_p2 }
  0x7a   : > { %5123 = vmatpush3.bf16.msra.mxu0 %v6625_v14  ;;  %v429_v37 = vsel %vm7173_vm2, 0, %v428_v35  ;;  %433 = vst [vmem:[#allocation2 + $0x30] sm:$0x1] %v432_v43  ;;  %v434_v47 = vld [vmem:[#allocation2 + $0x48] sm:$0x1]  ;;  %v7203_v49 = vld [vmem:[%s7160_s9 + $0x18] sm:$0xff]   ;;  %v482_v50 = vor.u32 %v480_v39, %v479_v42  ;;  %vm7515_vm10 = vmand %vm753_vm8, %vm754_vm9 }
  0x7b   : > { %5124 = vmatprep.subr.bf16.mxu0 %v6628_v17  ;;  %430 = vst [vmem:[#allocation2 + $0x18] sm:$0x1] %v429_v37  ;;  %v435_v48 = vsel %vm7173_vm2, 0, %v434_v47  ;;  %v486_v51 = vrot.slane %v484_v44, 7  ;;  %411 = vst [vmem:[#allocation2 + $0x50] sm:$0xff] %v7198_v46  ;;  %v491_v52 = vshrl.u32 %v7198_v46, 16 }
  0x7c   : > { %5259 = vmatpush3.bf16.msra.mxu1 %v6627_v16  ;;  %v494_v53 = vshll.u32 %v7198_v46, 16  ;;  %436 = vst [vmem:[#allocation2 + $0x48] sm:$0x1] %v435_v48  ;;  %8918 = vst [vmem:[#allocation14_spill] sm:$0xff] %v8917_v54  ;;  %v6648_v55 = vld [vmem:[#allocation7 + $0x148] sm:$0xff]   ;;  %v498_v56 = vshrl.u32 %v7203_v49, 16 }
  0x7d   : > { %5260 = vmatprep.subr.bf16.mxu1 %v6630_v19  ;;  %412 = vst [vmem:[#allocation2 + $0x68] sm:$0xff] %v7203_v49  ;;  %v501_v57 = vshll.u32 %v7203_v49, 16  ;;  %v437_v58 = vld [vmem:[#allocation2 + $0x60] sm:$0x1]  ;;  %v489_v59 = vor.u32 %v487_v45, %v486_v51  ;;  %v493_v60 = vrot.slane %v491_v52, 7  ;;  %v6651_v8 = vld [vmem:[#allocation7 + $0x150] sm:$0xff]  }
  0x7e   : > { %5125 = vmatpush3.bf16.msra.mxu0 %v6629_v18  ;;  %v438_v61 = vsel %vm7173_vm2, 0, %v437_v58  ;;  %v500_v63 = vrot.slane %v498_v56, 7  ;;  %v440_v1 = vld [vmem:[#allocation2 + $0x78] sm:$0x1]  ;;  %v7242_v9 = vld [vmem:[%s7160_s9 + $0x28] sm:$0xff]   ;;  %v7258_v18 = vld [vmem:[%s7160_s9 + $0x30] sm:$0xff]  }
  0x7f   : > { %5126 = vmatprep.subr.bf16.mxu0 %v6632_v21  ;;  %439 = vst [vmem:[#allocation2 + $0x60] sm:$0x1] %v438_v61  ;;  %v496_v3 = vor.u32 %v494_v53, %v493_v60  ;;  %v441_v4 = vsel %vm7173_vm2, 0, %v440_v1  ;;  %v443_v12 = vld [vmem:[#allocation2 + $0x90] sm:$0x1]  ;;  %414 = vst [vmem:[#allocation2 + $0x98] sm:$0xff] %v7242_v9 }
  0x80   : > { %5261 = vmatpush3.bf16.msra.mxu1 %v6631_v20  ;;  %442 = vst [vmem:[#allocation2 + $0x78] sm:$0x1] %v441_v4  ;;  %v503_v11 = vor.u32 %v501_v57, %v500_v63  ;;  %v512_v15 = vshrl.u32 %v7242_v9, 16  ;;  %v515_v16 = vshll.u32 %v7242_v9, 16  ;;  %v444_v17 = vsel %vm7173_vm2, 0, %v443_v12  ;;  %415 = vst [vmem:[#allocation2 + $0xb0] sm:$0xff] %v7258_v18 }
  0x81   : > { %5262 = vmatprep.subr.bf16.mxu1 %v6634_v23  ;;  %v610_v5 = vld [vmem:[#allocation2 + $0x30] sm:$0xff]  ;;  %445 = vst [vmem:[#allocation2 + $0x90] sm:$0x1] %v444_v17  ;;  %v446_v20 = vld [vmem:[#allocation2 + $0xa8] sm:$0x1]  ;;  %v519_v23 = vshrl.u32 %v7258_v18, 16 }
  0x82   : > { %5127 = vmatpush3.bf16.msra.mxu0 %v6633_v22  ;;  %v607_v62 = vld [vmem:[#allocation2 + $0x18] sm:$0xff]  ;;  %v611_v10 = vsel %vm7214_vm5, %v489_v59, %v610_v5  ;;  %v514_v22 = vrot.slane %v512_v15, 7  ;;  %v6658_v63 = vld [vmem:[#allocation7 + $0x80] sm:$0xff]  }
  0x83   : > { %5128 = vmatprep.subr.bf16.mxu0 %v6636_v26  ;;  %v608_v2 = vsel %vm7214_vm5, %v482_v50, %v607_v62  ;;  %612 = vst [vmem:[#allocation2 + $0x30] sm:$0xff] %v611_v10  ;;  %v613_v13 = vld [vmem:[#allocation2 + $0x48] sm:$0xff]  ;;  %v452_v47 = vld [vmem:[#allocation2 + $0xd8] sm:$0x1] }
  0x84   : > { %5263 = vmatpush3.bf16.msra.mxu1 %v6635_v24  ;;  %609 = vst [vmem:[#allocation2 + $0x18] sm:$0xff] %v608_v2  ;;  %v7262_v19 = vsel %vm7214_vm5, %v496_v3, %v613_v13  ;;  %v522_v24 = vshll.u32 %v7258_v18, 16  ;;  %v517_v35 = vor.u32 %v515_v16, %v514_v22  ;;  %v453_v51 = vsel %vm7173_vm2, 0, %v452_v47  ;;  %v455_v3 = vld [vmem:[#allocation2 + $0xf0] sm:$0x1]  ;;  %v7366_v47 = vld [vmem:[%s7160_s9 + $0x58] sm:$0xff]  }
  0x85   : > { %5264 = vmatprep.subr.bf16.mxu1 %v6638_v28  ;;  %615 = vst [vmem:[#allocation2 + $0x48] sm:$0xff] %v7262_v19  ;;  %v6654_v28 = vld [vmem:[#allocation7 + $0x158] sm:$0xff]   ;;  %454 = vst [vmem:[#allocation2 + $0xd8] sm:$0x1] %v453_v51  ;;  %v456_v5 = vsel %vm7173_vm2, 0, %v455_v3 }
  0x86   : > { %5129 = vmatpush3.bf16.msra.mxu0 %v6637_v27  ;;  %v616_v26 = vld [vmem:[#allocation2 + $0x60] sm:$0xff]  ;;  %v447_v27 = vsel %vm7173_vm2, 0, %v446_v20  ;;  %457 = vst [vmem:[#allocation2 + $0xf0] sm:$0x1] %v456_v5  ;;  %420 = vst [vmem:[#allocation2 + $0x128] sm:$0xff] %v7366_v47  ;;  %v6719_v54 = vld [vmem:[#allocation9 + $0x158] sm:$0xff]  }
  0x87   : > { %5130 = vmatprep.subr.bf16.mxu0 %v6640_v30  ;;  %v521_v30 = vrot.slane %v519_v23, 7  ;;  %448 = vst [vmem:[#allocation2 + $0xa8] sm:$0x1] %v447_v27  ;;  %v461_v51 = vld [vmem:[#allocation2 + $0x120] sm:$0x1] }
  0x88   : > { %5265 = vmatpush3.bf16.msra.mxu1 %v6639_v29  ;;  %v7276_v29 = vsel %vm7214_vm5, %v503_v11, %v616_v26  ;;  %v622_v58 = vld [vmem:[#allocation2 + $0x90] sm:$0xff] }
  0x89   : > { %5266 = vmatprep.subr.bf16.mxu1 %v6642_v32  ;;  %v449_v32 = vld [vmem:[#allocation2 + $0xc0] sm:$0x1]  ;;  %618 = vst [vmem:[#allocation2 + $0x60] sm:$0xff] %v7276_v29  ;;  %v524_v59 = vor.u32 %v522_v24, %v521_v30  ;;  %v7312_v61 = vsel %vm7214_vm5, %v517_v35, %v622_v58  ;;  %v462_v58 = vsel %vm7173_vm2, 0, %v461_v51  ;;  %v7408_v51 = vrot.slane %v494_v53, 1 }
  0x8a   : > { %5131 = vmatpush3.bf16.msra.mxu0 %v6641_v31  ;;  %v7281_v31 = vld [vmem:[%s7160_s9 + $0x38] sm:$0xff]   ;;  %v450_v37 = vsel %vm7173_vm2, 0, %v449_v32  ;;  %624 = vst [vmem:[#allocation2 + $0x90] sm:$0xff] %v7312_v61  ;;  %v6662_v32 = vld [vmem:[#allocation7 + $0x88] sm:$0xff]   ;;  %463 = vst [vmem:[#allocation2 + $0x120] sm:$0x1] %v462_v58 }
  0x8b   : > { %5932 = vmatprep.subr.bf16.mxu0 %v6645_v38  ;;  %416 = vst [vmem:[#allocation2 + $0xc8] sm:$0xff] %v7281_v31  ;;  %v526_v42 = vshrl.u32 %v7281_v31, 16  ;;  %v529_v43 = vshll.u32 %v7281_v31, 16  ;;  %451 = vst [vmem:[#allocation2 + $0xc0] sm:$0x1] %v450_v37 }
  0x8c   : > { %5267 = vmatpush3.bf16.msra.mxu1 %v6643_v33  ;;  %v619_v33 = vld [vmem:[#allocation2 + $0x78] sm:$0xff] }
  0x8d   : > { %1174 = vmatmul.mubr.bf16.vlgmr.msra.gmra.mrb[0].mxu0 %v608_v2  ;;  %v528_v60 = vrot.slane %v526_v42, 7  ;;  %5980 = vmatprep.subr.bf16.mxu1 %v6658_v63  ;;  %v631_v30 = vld [vmem:[#allocation2 + $0xd8] sm:$0xff] }
  0x8e   : > { %5933 = vmatpush3.bf16.msra.mxu0 %v6645_v38  ;;  %1181 = vmatprep.mubr.bf16.mxu0 %v7186_v40  ;;  %v7289_v38 = vld [vmem:[%s7160_s9 + $0x40] sm:$0xff]   ;;  %v625_v4 = vld [vmem:[#allocation2 + $0xa8] sm:$0xff] }
  0x8f   : > { %1640 = vmatmul.mubr.bf16.vlgmr.msra.gmra.mrb[0].mxu1 %v6941_v0  ;;  %v7230_v0 = vld [vmem:[%s7160_s9 + $0x20] sm:$0xff]   ;;  %5934 = vmatprep.subr.bf16.mxu0 %v6648_v55  ;;  %417 = vst [vmem:[#allocation2 + $0xe0] sm:$0xff] %v7289_v38  ;;  %v533_v48 = vshrl.u32 %v7289_v38, 16  ;;  %v536_v50 = vshll.u32 %v7289_v38, 16  ;;  %v531_v1 = vor.u32 %v529_v43, %v528_v60  ;;  %v557_v60 = vshll.u32 %v7366_v47, 16 }
  0x90   : > { %1647 = vmatprep.mubr.bf16.mxu1 %v7178_v34  ;;  %413 = vst [vmem:[#allocation2 + $0x80] sm:$0xff] %v7230_v0  ;;  %v505_v6 = vshrl.u32 %v7230_v0, 16  ;;  %v508_v7 = vshll.u32 %v7230_v0, 16  ;;  %5981 = vmatpush3.bf16.msra.mxu1 %v6658_v63  ;;  %v634_v63 = vld [vmem:[#allocation2 + $0xf0] sm:$0xff] }
  0x91   : > { %v535_v62 = vrot.slane %v533_v48, 7  ;;  %5982 = vmatprep.subr.bf16.mxu1 %v6662_v32 }
  0x92   : > { %v507_v14 = vrot.slane %v505_v6, 7  ;;  %5935 = vmatpush3.bf16.msra.mxu0 %v6648_v55  ;;  %v6657_v55 = vld [vmem:[#allocation7 + $0x160] sm:$0xff]  }
  0x93   : > { %5936 = vmatprep.subr.bf16.mxu0 %v6651_v8  ;;  %v538_v11 = vor.u32 %v536_v50, %v535_v62  ;;  %v628_v17 = vld [vmem:[#allocation2 + $0xc0] sm:$0xff]  ;;  %v464_v62 = vld [vmem:[#allocation2 + $0x138] sm:$0x1] }
  0x94   : > { %v510_v21 = vor.u32 %v508_v7, %v507_v14  ;;  %v458_v14 = vld [vmem:[#allocation2 + $0x108] sm:$0x1]  ;;  %v7346_v26 = vsel %vm7214_vm5, %v531_v1, %v628_v17  ;;  %5983 = vmatpush3.bf16.msra.mxu1 %v6662_v32 }
  0x95   : > { %1182 = vmatmul.mubr.bf16.gmra.mrb[4].mxu0 %v611_v10  ;;  %v459_v22 = vsel %vm7173_vm2, 0, %v458_v14  ;;  %630 = vst [vmem:[#allocation2 + $0xc0] sm:$0xff] %v7346_v26  ;;  %v7361_v35 = vsel %vm7214_vm5, %v538_v11, %v631_v30  ;;  %v6665_v14 = vld [vmem:[#allocation7 + $0x170] sm:$0xff]   ;;  %v655_v30 = vrot.slane %v480_v39, 1  ;;  %v7404_v32 = vld [vmem:[%s7160_s9 + $0x68] sm:$0xff]  }
  0x96   : > { %v7293_v41 = vsel %vm7214_vm5, %v510_v21, %v619_v33  ;;  %1189 = vmatprep.mubr.bf16.mxu0 %v7198_v46  ;;  %5937 = vmatpush3.bf16.msra.mxu0 %v6651_v8  ;;  %v7325_v8 = vld [vmem:[%s7160_s9 + $0x50] sm:$0xff]   ;;  %460 = vst [vmem:[#allocation2 + $0x108] sm:$0x1] %v459_v22  ;;  %v7357_v33 = vrot.slane %v487_v45, 1  ;;  %633 = vst [vmem:[#allocation2 + $0xd8] sm:$0xff] %v7361_v35  ;;  %v7372_v45 = vld [vmem:[%s7160_s9 + $0x60] sm:$0xff]  }
  0x97   : > { %1648 = vmatmul.mubr.bf16.gmra.mrb[4].mxu1 %v608_v2  ;;  %621 = vst [vmem:[#allocation2 + $0x78] sm:$0xff] %v7293_v41  ;;  %5938 = vmatprep.subr.bf16.mxu0 %v6654_v28  ;;  %v7320_v2 = vld [vmem:[%s7160_s9 + $0x48] sm:$0xff]   ;;  %419 = vst [vmem:[#allocation2 + $0x110] sm:$0xff] %v7325_v8  ;;  %v547_v20 = vshrl.u32 %v7325_v8, 16  ;;  %v550_v21 = vshll.u32 %v7325_v8, 16  ;;  %v8894_v1 = vshrl.u32 %v7372_v45, 16 }
  0x98   : > { %1655 = vmatprep.mubr.bf16.mxu1 %v7186_v40  ;;  %418 = vst [vmem:[#allocation2 + $0xf8] sm:$0xff] %v7320_v2  ;;  %v540_v12 = vshrl.u32 %v7320_v2, 16  ;;  %v543_v13 = vshll.u32 %v7320_v2, 16  ;;  %421 = vst [vmem:[#allocation2 + $0x140] sm:$0xff] %v7372_v45  ;;  %v8895_v3 = vshll.u32 %v7372_v45, 16  ;;  %v8893_v53 = vshrl.u32 %v7404_v32, 16 }
  0x99   : > { %v563_v22 = vrot.slane %v8894_v1, 7  ;;  %422 = vst [vmem:[#allocation2 + $0x158] sm:$0xff] %v7404_v32  ;;  %v661_v1 = vrot.slane %v501_v57, 1  ;;  %v658_v57 = vor.u32 %v7357_v33, %v484_v44  ;;  %v663_v40 = vrot.slane %v508_v7, 1  ;;  %v705_v44 = vld [vmem:[#allocation2 + $0x28] sm:$0xff]  ;;  %v708_v33 = vld [vmem:[#allocation2 + $0x40] sm:$0xff] }
  0x9a   : > { %5939 = vmatpush3.bf16.msra.mxu0 %v6654_v28  ;;  %v542_v27 = vrot.slane %v540_v12, 7  ;;  %v6661_v28 = vld [vmem:[#allocation7 + $0x168] sm:$0xff]  }
  0x9b   : > { %5940 = vmatprep.subr.bf16.mxu0 %v6657_v55  ;;  %v566_v58 = vor.u32 %v8895_v3, %v563_v22 }
  0x9c   : > { %v545_v37 = vor.u32 %v543_v13, %v542_v27  ;;  %v6666_v27 = vld [vmem:[#allocation7 + $0x90] sm:$0xff]  }
  0x9d   : > { %1190 = vmatmul.mubr.bf16.gmra.mrb[8].mxu0 %v7262_v19  ;;  %v637_v17 = vld [vmem:[#allocation2 + $0x108] sm:$0xff]  ;;  %5984 = vmatprep.subr.bf16.mxu1 %v6666_v27 }
  0x9e   : > { %1197 = vmatprep.mubr.bf16.mxu0 %v7203_v49  ;;  %5941 = vmatpush3.bf16.msra.mxu0 %v6657_v55  ;;  %v554_v55 = vshrl.u32 %v7366_v47, 16  ;;  %v7386_v5 = vsel %vm7214_vm5, %v545_v37, %v634_v63  ;;  %v467_v37 = vld [vmem:[#allocation2 + $0x150] sm:$0x1] }
  0x9f   : > { %1656 = vmatmul.mubr.bf16.gmra.mrb[8].mxu1 %v611_v10  ;;  %v7329_v10 = vsel %vm7214_vm5, %v524_v59, %v625_v4  ;;  %5942 = vmatprep.subr.bf16.mxu0 %v6661_v28  ;;  %v465_v4 = vsel %vm7173_vm2, 0, %v464_v62  ;;  %636 = vst [vmem:[#allocation2 + $0xf0] sm:$0xff] %v7386_v5  ;;  %v468_v39 = vsel %vm7173_vm2, 0, %v467_v37  ;;  %v640_v62 = vld [vmem:[#allocation2 + $0x120] sm:$0xff]  ;;  %v7421_v63 = vld [vmem:[%s7160_s9 + $0x70] sm:$0xff]   ;;  %v8919_v37 = vmov 0 }
  0xa0   : > { %1663 = vmatprep.mubr.bf16.mxu1 %v7198_v46  ;;  %627 = vst [vmem:[#allocation2 + $0xa8] sm:$0xff] %v7329_v10  ;;  %v556_v11 = vrot.slane %v554_v55, 7  ;;  %466 = vst [vmem:[#allocation2 + $0x138] sm:$0x1] %v465_v4  ;;  %5985 = vmatpush3.bf16.msra.mxu1 %v6666_v27  ;;  %v470_v4 = vld [vmem:[#allocation2 + $0x168] sm:$0x1] }
  0xa1   : > { %469 = vst [vmem:[#allocation2 + $0x150] sm:$0x1] %v468_v39  ;;  %v471_v22 = vsel %vm7173_vm2, 0, %v470_v4  ;;  %v8920_v37 = vsel %vm7432_vm7, 4294967295, %v8919_v37  ;;  %423 = vst [vmem:[#allocation2 + $0x170] sm:$0xff] %v7421_v63  ;;  %v8896_v27 = vshrl.u32 %v7421_v63, 16 }
  0xa2   : > { %5943 = vmatpush3.bf16.msra.mxu0 %v6661_v28  ;;  %8921 = vst [vmem:[#allocation15_spill] sm:$0xff] %v8920_v37  ;;  %472 = vst [vmem:[#allocation2 + $0x168] sm:$0x1] %v471_v22  ;;  %v6670_v39 = vld [vmem:[#allocation7 + $0x178] sm:$0xff]   ;;  %v6672_v22 = vld [vmem:[#allocation7 + $0xa8] sm:$0xff]   ;;  %v667_v46 = vrot.slane %v522_v24, 1  ;;  %v664_v24 = vor.u32 %v663_v40, %v505_v6 }
  0xa3   : > { %5944 = vmatprep.subr.bf16.mxu0 %v6665_v14  ;;  %v577_v3 = vrot.slane %v8896_v27, 7  ;;  %v8922_v6 = vmov 0  ;;  %v720_v40 = vld [vmem:[#allocation2 + $0xa0] sm:$0xff] }
  0xa4   : > { %v8923_v6 = vsel %vm7515_vm10, 4294967295, %v8922_v6 }
  0xa5   : > { %1198 = vmatmul.mubr.bf16.gmra.mrb[12].mxu0 %v7276_v29  ;;  %8924 = vst [vmem:[#allocation16_spill] sm:$0xff] %v8923_v6 }
  0xa6   : > { %1205 = vmatprep.mubr.bf16.mxu0 %v7230_v0  ;;  %5945 = vmatpush3.bf16.msra.mxu0 %v6665_v14 }
  0xa7   : > { %1664 = vmatmul.mubr.bf16.gmra.mrb[12].mxu1 %v7262_v19  ;;  %v549_v19 = vrot.slane %v547_v20, 7  ;;  %v643_v14 = vld [vmem:[#allocation2 + $0x138] sm:$0xff]  ;;  %5946 = vmatprep.subr.bf16.mxu0 %v6670_v39 }
  0xa8   : > { %1671 = vmatprep.mubr.bf16.mxu1 %v7203_v49 }
  0xa9   : > { %v552_v59 = vor.u32 %v550_v21, %v549_v19  ;;  %v559_v19 = vor.u32 %v557_v60, %v556_v11 }
  0xaa   : > { %5947 = vmatpush3.bf16.msra.mxu0 %v6670_v39  ;;  %v665_v39 = vrot.slane %v515_v16, 1 }
  0xab   : > { %v7399_v28 = vsel %vm7214_vm5, %v552_v59, %v637_v17  ;;  %v8897_v59 = vshll.u32 %v7404_v32, 16  ;;  %v7425_v11 = vsel %vm7214_vm5, %v559_v19, %v640_v62  ;;  %v570_v17 = vrot.slane %v8893_v53, 7  ;;  %v6671_v53 = vld [vmem:[#allocation7 + $0xa0] sm:$0xff]  }
  0xac   : > { %639 = vst [vmem:[#allocation2 + $0x108] sm:$0xff] %v7399_v28  ;;  %642 = vst [vmem:[#allocation2 + $0x120] sm:$0xff] %v7425_v11  ;;  %v578_v19 = vshll.u32 %v7421_v63, 16  ;;  %v7442_v62 = vsel %vm7214_vm5, %v566_v58, %v643_v14  ;;  %v7454_v58 = vld [vmem:[%s7160_s9 + $0x78] sm:$0xff]   ;;  %v473_v14 = vld [vmem:[#allocation2 + $0x180] sm:$0x1] }
  0xad   : > { %v573_v4 = vor.u32 %v8897_v59, %v570_v17  ;;  %645 = vst [vmem:[#allocation2 + $0x138] sm:$0xff] %v7442_v62  ;;  %1206 = vmatmul.mubr.bf16.gmra.mrb[16].mxu0 %v7293_v41  ;;  %v656_v17 = vor.u32 %v655_v30, %v477_v36  ;;  %424 = vst [vmem:[#allocation2 + $0x188] sm:$0xff] %v7454_v58  ;;  %v582_v34 = vshrl.u32 %v7454_v58, 16  ;;  %v585_v36 = vshll.u32 %v7454_v58, 16  ;;  %s6942_s9 = smov [#allocation10]  }
  0xae   : > { %1213 = vmatprep.mubr.bf16.mxu0 %v7242_v9  ;;  %v580_v27 = vor.u32 %v578_v19, %v577_v3  ;;  %v660_v3 = vor.u32 %v7408_v51, %v491_v52  ;;  %v662_v30 = vor.u32 %v661_v1, %v498_v56  ;;  %v6676_v52 = vld [vmem:[#allocation7 + $0x1c0] sm:$0xff]   ;;  %v669_v56 = vrot.slane %v529_v43, 1  ;;  %v6674_v1 = vld [vmem:[#allocation7 + $0xb0] sm:$0xff]   ;;  %v711_v51 = vld [vmem:[#allocation2 + $0x58] sm:$0xff]  ;;  %s6868_s24 = sshll.u32 %s6942_s9, 4  ;;  %s6869_s24 = int_to_ptr.vmem [resolvable:$false] %s6868_s24 }
  0xaf   : > { %1672 = vmatmul.mubr.bf16.gmra.mrb[16].mxu1 %v7276_v29  ;;  %v6668_v29 = vld [vmem:[#allocation7 + $0x98] sm:$0xff]   ;;  %v584_v7 = vrot.slane %v582_v34, 7  ;;  %5388 = vmatprep.subr.bf16.mxu0 %v6676_v52  ;;  %v666_v43 = vor.u32 %v665_v39, %v512_v15  ;;  %v671_v15 = vrot.slane %v536_v50, 1  ;;  %v726_v39 = vld [vmem:[#allocation2 + $0xd0] sm:$0xff]  ;;  %v729_v52 = vld [vmem:[#allocation2 + $0xe8] sm:$0xff]  ;;  %s6870_s26 = scalar_lea.vmem %s6869_s24, 8192  ;;  %p6871_p7 = scmp.lt.s32.totalorder %s8837_s11, %s6869_s24 }
  0xb0   : > { %1679 = vmatprep.mubr.bf16.mxu1 %v7230_v0  ;;  %5986 = vmatprep.subr.bf16.mxu1 %v6668_v29  ;;  %p6872_p9 = scmp.lt.s32.totalorder %s6870_s26, %s6864_s8 }
  0xb1   : > { %5987 = vmatpush3.bf16.msra.mxu1 %v6668_v29  ;;  %v646_v29 = vld [vmem:[#allocation2 + $0x150] sm:$0xff]  ;;  %v587_v16 = vor.u32 %v585_v36, %v584_v7  ;;  %v721_v50 = vsel %vm7432_vm7, %v666_v43, %v720_v40  ;;  %v735_v40 = vld [vmem:[#allocation2 + $0x118] sm:$0xff] }
  0xb2   : > { %v7469_v59 = vsel %vm7214_vm5, %v573_v4, %v646_v29  ;;  %5988 = vmatprep.subr.bf16.mxu1 %v6671_v53  ;;  %v649_v4 = vld [vmem:[#allocation2 + $0x168] sm:$0xff]  ;;  %722 = vst [vmem:[#allocation2 + $0xa0] sm:$0xff] %v721_v50  ;;  %p6873_p12 = por %p6872_p9, %p6871_p7 }
  0xb3   : > { %648 = vst [vmem:[#allocation2 + $0x150] sm:$0xff] %v7469_v59  ;;  %v7494_v49 = vsel %vm7214_vm5, %v580_v27, %v649_v4  ;;  %v712_v27 = vsel %vm7432_vm7, %v660_v3, %v711_v51 }
  0xb4   : > { %651 = vst [vmem:[#allocation2 + $0x168] sm:$0xff] %v7494_v49  ;;  %713 = vst [vmem:[#allocation2 + $0x58] sm:$0xff] %v712_v27  ;;  %v7568_v27 = vld [vmem:[#allocation7 + $0x200] sm:$0xff]   ;;  %p6874_p1 = pnand %p6873_p12, %p6867_p3 }
  0xb5   : > { %5989 = vmatpush3.bf16.msra.mxu1 %v6671_v53  ;;  %v706_v53 = vsel %vm7432_vm7, %v656_v17, %v705_v44  ;;  %v714_v17 = vld [vmem:[#allocation2 + $0x70] sm:$0xff]  ;;  %1214 = vmatmul.mubr.bf16.gmra.mrb[20].mxu0 %v7312_v61  ;;  %v668_v44 = vor.u32 %v667_v46, %v519_v23  ;;  %v723_v23 = vld [vmem:[#allocation2 + $0xb8] sm:$0xff]  ;;  %v675_v46 = vrot.slane %v550_v21, 1 }
  0xb6   : > { %5990 = vmatprep.subr.bf16.mxu1 %v6672_v22  ;;  %707 = vst [vmem:[#allocation2 + $0x28] sm:$0xff] %v706_v53  ;;  %v715_v29 = vsel %vm7432_vm7, %v662_v30, %v714_v17  ;;  %1221 = vmatprep.mubr.bf16.mxu0 %v7258_v18 }
  0xb7   : > { %1680 = vmatmul.mubr.bf16.gmra.mrb[20].mxu1 %v7293_v41  ;;  %v474_v41 = vsel %vm7173_vm2, 0, %v473_v14  ;;  %v709_v14 = vsel %vm7432_vm7, %v658_v57, %v708_v33  ;;  %v6675_v57 = vld [vmem:[#allocation7 + $0xb8] sm:$0xff]   ;;  %716 = vst [vmem:[#allocation2 + $0x70] sm:$0xff] %v715_v29  ;;  %v670_v33 = vor.u32 %v669_v56, %v526_v42  ;;  %v672_v42 = vor.u32 %v671_v15, %v533_v48  ;;  %v732_v56 = vld [vmem:[#allocation2 + $0x100] sm:$0xff] }
  0xb8   : > { %1687 = vmatprep.mubr.bf16.mxu1 %v7242_v9  ;;  %475 = vst [vmem:[#allocation2 + $0x180] sm:$0x1] %v474_v41  ;;  %710 = vst [vmem:[#allocation2 + $0x40] sm:$0xff] %v709_v14  ;;  %v717_v9 = vld [vmem:[#allocation2 + $0x88] sm:$0xff]  ;;  %v724_v7 = vsel %vm7432_vm7, %v668_v44, %v723_v23  ;;  %v676_v17 = vor.u32 %v675_v46, %v547_v20  ;;  %v8926_v15 = vshll.u32 %v7404_v32, 16  ;;  %v738_v44 = vld [vmem:[#allocation2 + $0x130] sm:$0xff] }
  0xb9   : > { %5991 = vmatpush3.bf16.msra.mxu1 %v6672_v22  ;;  %v718_v41 = vsel %vm7432_vm7, %v664_v24, %v717_v9  ;;  %v727_v53 = vsel %vm7432_vm7, %v670_v33, %v726_v39  ;;  %725 = vst [vmem:[#allocation2 + $0xb8] sm:$0xff] %v724_v7  ;;  %v771_v24 = vld [vmem:[#allocation2 + $0xa0] sm:$0x80]  ;;  %v8928_v23 = vshrl.u32 %v7404_v32, 16  ;;  %v685_v7 = vrot.slane %v585_v36, 1 }
  0xba   : > { %5992 = vmatprep.subr.bf16.mxu1 %v6674_v1  ;;  %719 = vst [vmem:[#allocation2 + $0x88] sm:$0xff] %v718_v41  ;;  %728 = vst [vmem:[#allocation2 + $0xd0] sm:$0xff] %v727_v53 }
  0xbb   : > { %v762_v14 = vld [vmem:[#allocation2 + $0x58] sm:$0x80]  ;;  %v6773_v37 = vld [vmem:[#allocation2 + $0x168] sm:$0xff] }
  0xbc   : > { %v763_v48 = vsel %vm7515_vm10, 0, %v762_v14 }
  0xbd   : > { %5993 = vmatpush3.bf16.msra.mxu1 %v6674_v1  ;;  %1222 = vmatmul.mubr.bf16.gmra.mrb[24].mxu0 %v7329_v10  ;;  %764 = vst [vmem:[#allocation2 + $0x58] sm:$0x80] %v763_v48 }
  0xbe   : > { %5994 = vmatprep.subr.bf16.mxu1 %v6675_v57  ;;  %1229 = vmatprep.mubr.bf16.mxu0 %v7281_v31 }
  0xbf   : > { %1688 = vmatmul.mubr.bf16.gmra.mrb[24].mxu1 %v7312_v61  ;;  %v652_v0 = vld [vmem:[#allocation2 + $0x180] sm:$0xff]  ;;  %v673_v61 = vrot.slane %v543_v13, 1  ;;  %v756_v13 = vld [vmem:[#allocation2 + $0x28] sm:$0x80] }
  0xc0   : > { %1695 = vmatprep.mubr.bf16.mxu1 %v7258_v18  ;;  %v7525_v22 = vsel %vm7214_vm5, %v587_v16, %v652_v0  ;;  %v759_v3 = vld [vmem:[#allocation2 + $0x40] sm:$0x80]  ;;  %v757_v30 = vsel %vm7515_vm10, 0, %v756_v13  ;;  %v677_v16 = vrot.slane %v557_v60, 1  ;;  %v8925_v0 = vshll.u32 %v7372_v45, 16 }
  0xc1   : > { %654 = vst [vmem:[#allocation2 + $0x180] sm:$0xff] %v7525_v22  ;;  %v760_v18 = vsel %vm7515_vm10, 0, %v759_v3  ;;  %v674_v4 = vor.u32 %v673_v61, %v540_v12  ;;  %758 = vst [vmem:[#allocation2 + $0x28] sm:$0x80] %v757_v30  ;;  %5995 = vmatpush3.bf16.msra.mxu1 %v6675_v57  ;;  %v765_v12 = vld [vmem:[#allocation2 + $0x70] sm:$0x80] }
  0xc2   : > { %761 = vst [vmem:[#allocation2 + $0x40] sm:$0x80] %v760_v18  ;;  %v766_v21 = vsel %vm7515_vm10, 0, %v765_v12  ;;  %v768_v51 = vld [vmem:[#allocation2 + $0x88] sm:$0x80]  ;;  %v678_v43 = vor.u32 %v677_v16, %v554_v55  ;;  %6028 = vmatprep.subr.bf16.mxu1 %v7568_v27  ;;  %v679_v9 = vrot.slane %v8925_v0, 1  ;;  %v736_v55 = vsel %vm7432_vm7, %v676_v17, %v735_v40 }
  0xc3   : > { %v733_v1 = vsel %vm7432_vm7, %v674_v4, %v732_v56  ;;  %767 = vst [vmem:[#allocation2 + $0x70] sm:$0x80] %v766_v21  ;;  %v769_v60 = vsel %vm7515_vm10, 0, %v768_v51  ;;  %v774_v57 = vld [vmem:[#allocation2 + $0xb8] sm:$0x80]  ;;  %v681_v61 = vrot.slane %v8926_v15, 1 }
  0xc4   : > { %734 = vst [vmem:[#allocation2 + $0x100] sm:$0xff] %v733_v1  ;;  %770 = vst [vmem:[#allocation2 + $0x88] sm:$0x80] %v769_v60  ;;  %v777_v29 = vld [vmem:[#allocation2 + $0xd0] sm:$0x80]  ;;  %v775_v41 = vsel %vm7515_vm10, 0, %v774_v57  ;;  %v739_v33 = vsel %vm7432_vm7, %v678_v43, %v738_v44 }
  0xc5   : > { %v778_v20 = vsel %vm7515_vm10, 0, %v777_v29  ;;  %1230 = vmatmul.mubr.bf16.gmra.mrb[28].mxu0 %v7346_v26  ;;  %776 = vst [vmem:[#allocation2 + $0xb8] sm:$0x80] %v775_v41  ;;  %737 = vst [vmem:[#allocation2 + $0x118] sm:$0xff] %v736_v55  ;;  %v8927_v30 = vshrl.u32 %v7372_v45, 16  ;;  %v682_v39 = vor.u32 %v681_v61, %v8928_v23  ;;  %v683_v4 = vrot.slane %v578_v19, 1 }
  0xc6   : > { %779 = vst [vmem:[#allocation2 + $0xd0] sm:$0x80] %v778_v20  ;;  %1237 = vmatprep.mubr.bf16.mxu0 %v7289_v38  ;;  %740 = vst [vmem:[#allocation2 + $0x130] sm:$0xff] %v739_v33  ;;  %v8929_v12 = vshrl.u32 %v7421_v63, 16  ;;  %v747_v56 = vld [vmem:[#allocation2 + $0x178] sm:$0xff]  ;;  %v750_v16 = vld [vmem:[#allocation2 + $0x190] sm:$0xff] }
  0xc7   : > { %1696 = vmatmul.mubr.bf16.gmra.mrb[28].mxu1 %v7329_v10  ;;  %v730_v10 = vsel %vm7432_vm7, %v672_v42, %v729_v52  ;;  %v680_v18 = vor.u32 %v679_v9, %v8927_v30  ;;  %v741_v42 = vld [vmem:[#allocation2 + $0x148] sm:$0xff]  ;;  %v6681_v17 = vld [vmem:[#allocation7 + $0x190] sm:$0xff]   ;;  %v6682_v43 = vld [vmem:[#allocation7 + $0x1d8] sm:$0xff]  }
  0xc8   : > { %1703 = vmatprep.mubr.bf16.mxu1 %v7281_v31  ;;  %731 = vst [vmem:[#allocation2 + $0xe8] sm:$0xff] %v730_v10  ;;  %v772_v31 = vsel %vm7515_vm10, 0, %v771_v24  ;;  %v684_v52 = vor.u32 %v683_v4, %v8929_v12  ;;  %v6694_v57 = vld [vmem:[#allocation7 + $0x220] sm:$0xff]   ;;  %v6683_v0 = vld [vmem:[#allocation7 + $0x198] sm:$0xff]   ;;  %v6695_v9 = vld [vmem:[#allocation7 + $0x228] sm:$0xff]  }
  0xc9   : > { %773 = vst [vmem:[#allocation2 + $0xa0] sm:$0x80] %v772_v31  ;;  %v742_v53 = vsel %vm7432_vm7, %v680_v18, %v741_v42  ;;  %v6684_v15 = vld [vmem:[#allocation7 + $0x1e0] sm:$0xff]   ;;  %v6688_v20 = vld [vmem:[#allocation7 + $0x1e8] sm:$0xff]   ;;  %v6698_v40 = vld [vmem:[#allocation7 + $0x230] sm:$0xff]  }
  0xca   : > { %743 = vst [vmem:[#allocation2 + $0x148] sm:$0xff] %v742_v53  ;;  %v748_v21 = vsel %vm7432_vm7, %v684_v52, %v747_v56  ;;  %v6685_v41 = vld [vmem:[#allocation7 + $0x1a0] sm:$0xff]   ;;  %v6689_v55 = vld [vmem:[#allocation7 + $0x1a8] sm:$0xff]   ;;  %v6692_v33 = vld [vmem:[#allocation7 + $0x1f0] sm:$0xff]  }
  0xcb   : > { %v783_v13 = vld [vmem:[#allocation2 + $0x100] sm:$0x80]  ;;  %749 = vst [vmem:[#allocation2 + $0x178] sm:$0xff] %v748_v21  ;;  %v6697_v18 = vld [vmem:[#allocation7 + $0x1b8] sm:$0xff]  }
  0xcc   : > { %v786_v46 = vld [vmem:[#allocation2 + $0x118] sm:$0x80]  ;;  %v1936_v52 = vld [vmem:[#allocation2 + $0x60] sm:$0xff] }
  0xcd   : > { %1238 = vmatmul.mubr.bf16.gmra.mrb[32].mxu0 %v7361_v35  ;;  %v789_v48 = vld [vmem:[#allocation2 + $0x130] sm:$0x80]  ;;  %v787_v19 = vsel %vm7515_vm10, 0, %v786_v46  ;;  %v7678_v61 = vld [vmem:[#allocation2 + $0xb8] sm:$0xff] }
  0xce   : > { %1245 = vmatprep.mubr.bf16.mxu0 %v7320_v2  ;;  %v790_v36 = vsel %vm7515_vm10, 0, %v789_v48  ;;  %788 = vst [vmem:[#allocation2 + $0x118] sm:$0x80] %v787_v19  ;;  %v923_v44 = vld [vmem:[#allocation2 + $0xd0] sm:$0xff]  ;;  %v1931_v53 = vld [vmem:[#allocation2 + $0x38] sm:$0xff]  ;;  %v1933_v48 = vld [vmem:[#allocation2 + $0x48] sm:$0xff] }
  0xcf   : > { %1704 = vmatmul.mubr.bf16.gmra.mrb[32].mxu1 %v7346_v26  ;;  %v780_v50 = vld [vmem:[#allocation2 + $0xe8] sm:$0x80]  ;;  %v784_v26 = vsel %vm7515_vm10, 0, %v783_v13  ;;  %791 = vst [vmem:[#allocation2 + $0x130] sm:$0x80] %v790_v36  ;;  %v1934_v46 = vld [vmem:[#allocation2 + $0x50] sm:$0xff] }
  0xd0   : > { %1711 = vmatprep.mubr.bf16.mxu1 %v7289_v38  ;;  %v781_v3 = vsel %vm7515_vm10, 0, %v780_v50  ;;  %785 = vst [vmem:[#allocation2 + $0x100] sm:$0x80] %v784_v26  ;;  %v744_v38 = vld [vmem:[#allocation2 + $0x160] sm:$0xff]  ;;  %v6699_v50 = vld [vmem:[#allocation7 + $0x238] sm:$0xff]   ;;  %v1937_v19 = vld [vmem:[#allocation2 + $0x68] sm:$0xff] }
  0xd1   : > { %782 = vst [vmem:[#allocation2 + $0xe8] sm:$0x80] %v781_v3  ;;  %v745_v14 = vsel %vm7432_vm7, %v682_v39, %v744_v38  ;;  %v792_v10 = vld [vmem:[#allocation2 + $0x148] sm:$0x80]  ;;  %v7675_v29 = vld [vmem:[#allocation2 + $0xa0] sm:$0xff]  ;;  %v6693_v3 = vld [vmem:[#allocation7 + $0x1b0] sm:$0xff]  }
  0xd2   : > { %746 = vst [vmem:[#allocation2 + $0x160] sm:$0xff] %v745_v14  ;;  %v793_v51 = vsel %vm7515_vm10, 0, %v792_v10  ;;  %v798_v60 = vld [vmem:[#allocation2 + $0x178] sm:$0x80]  ;;  %v1930_v14 = vld [vmem:[#allocation2 + $0x30] sm:$0xff] }
  0xd3   : > { %794 = vst [vmem:[#allocation2 + $0x148] sm:$0x80] %v793_v51  ;;  %v799_v31 = vsel %vm7515_vm10, 0, %v798_v60  ;;  %v6696_v26 = vld [vmem:[#allocation7 + $0x1f8] sm:$0xff]  }
  0xd4   : > { %800 = vst [vmem:[#allocation2 + $0x178] sm:$0x80] %v799_v31 }
  0xd5   : > { %1246 = vmatmul.mubr.bf16.gmra.mrb[36].mxu0 %v7386_v5  ;;  %v932_v23 = vld [vmem:[#allocation2 + $0x118] sm:$0xff] }
  0xd6   : > { %1253 = vmatprep.mubr.bf16.mxu0 %v7325_v8  ;;  %v935_v39 = vld [vmem:[#allocation2 + $0x130] sm:$0xff] }
  0xd7   : > { %1712 = vmatmul.mubr.bf16.gmra.mrb[36].mxu1 %v7361_v35  ;;  %v686_v35 = vor.u32 %v685_v7, %v582_v34  ;;  %v929_v30 = vld [vmem:[#allocation2 + $0x100] sm:$0xff] }
  0xd8   : > { %1719 = vmatprep.mubr.bf16.mxu1 %v7320_v2  ;;  %v926_v13 = vld [vmem:[#allocation2 + $0xe8] sm:$0xff] }
  0xd9   : > { %v751_v2 = vsel %vm7432_vm7, %v686_v35, %v750_v16  ;;  %v795_v1 = vld [vmem:[#allocation2 + $0x160] sm:$0x80] }
  0xda   : > { %752 = vst [vmem:[#allocation2 + $0x190] sm:$0xff] %v751_v2  ;;  %v796_v34 = vsel %vm7515_vm10, 0, %v795_v1  ;;  %v7683_v42 = vld [vmem:[#allocation2 + $0x148] sm:$0xff]  ;;  %v1940_v16 = vld [vmem:[#allocation2 + $0x80] sm:$0xff] }
  0xdb   : > { %797 = vst [vmem:[#allocation2 + $0x160] sm:$0x80] %v796_v34  ;;  %v7690_v4 = vld [vmem:[#allocation2 + $0x178] sm:$0xff] }
  0xdd   : > { %1254 = vmatmul.mubr.bf16.gmra.mrb[40].mxu0 %v7399_v28 }
  0xde   : > { %1261 = vmatprep.mubr.bf16.mxu0 %v7366_v47 }
  0xdf   : > { %1720 = vmatmul.mubr.bf16.gmra.mrb[40].mxu1 %v7386_v5 }
  0xe0   : > { %1727 = vmatprep.mubr.bf16.mxu1 %v7325_v8  ;;  %v7654_v8 = vld [vmem:[#allocation2 + $0x8] sm:$0xff] }
  0xe1   : > { %v801_v24 = vld [vmem:[#allocation2 + $0x190] sm:$0x80] }
  0xe2   : > { %v802_v5 = vsel %vm7515_vm10, 0, %v801_v24  ;;  %v7685_v38 = vld [vmem:[#allocation2 + $0x160] sm:$0xff]  ;;  %v1939_v24 = vld [vmem:[#allocation2 + $0x78] sm:$0xff] }
  0xe3   : > { %803 = vst [vmem:[#allocation2 + $0x190] sm:$0x80] %v802_v5 }
  0xe5   : > { %1262 = vmatmul.mubr.bf16.gmra.mrb[44].mxu0 %v7425_v11 }
  0xe6   : > { %1269 = vmatprep.mubr.bf16.mxu0 %v7372_v45 }
  0xe7   : > { %1728 = vmatmul.mubr.bf16.gmra.mrb[44].mxu1 %v7399_v28  ;;  %v6687_v28 = vld [vmem:[#allocation7 + $0x208] sm:$0xff]  }
  0xe8   : > { %1735 = vmatprep.mubr.bf16.mxu1 %v7366_v47  ;;  %v902_v47 = vld [vmem:[#allocation2 + $0x28] sm:$0xff] }
  0xea   : > { %v7696_v7 = vld [vmem:[#allocation2 + $0x190] sm:$0xff] }
  0xed   : > { %1270 = vmatmul.mubr.bf16.gmra.mrb[48].mxu0 %v7442_v62 }
  0xee   : > { %1277 = vmatprep.mubr.bf16.mxu0 %v7404_v32 }
  0xef   : > { %1736 = vmatmul.mubr.bf16.gmra.mrb[48].mxu1 %v7425_v11  ;;  %v6678_v11 = vld [vmem:[#allocation7 + $0x1c8] sm:$0xff]  }
  0xf0   : > { %1743 = vmatprep.mubr.bf16.mxu1 %v7372_v45  ;;  %v7657_v45 = vld [vmem:[#allocation2 + $0x40] sm:$0xff] }
  0xf5   : > { %1278 = vmatmul.mubr.bf16.gmra.mrb[52].mxu0 %v7469_v59 }
  0xf6   : > { %1285 = vmatprep.mubr.bf16.mxu0 %v7421_v63 }
  0xf7   : > { %1744 = vmatmul.mubr.bf16.gmra.mrb[52].mxu1 %v7442_v62  ;;  %v6691_v62 = vld [vmem:[#allocation7 + $0x218] sm:$0xff]  }
  0xf8   : > { %1751 = vmatprep.mubr.bf16.mxu1 %v7404_v32  ;;  %v6690_v32 = vld [vmem:[#allocation7 + $0x210] sm:$0xff]  }
  0xfd   : > { %1286 = vmatmul.mubr.bf16.gmra.mrb[56].mxu0 %v7494_v49 }
  0xfe   : > { %1293 = vmatprep.mubr.bf16.mxu0 %v7454_v58  ;;  %v7664_v58 = vld [vmem:[#allocation2 + $0x70] sm:$0xff] }
  0xff   : > { %1752 = vmatmul.mubr.bf16.gmra.mrb[56].mxu1 %v7469_v59  ;;  %v6677_v59 = vld [vmem:[#allocation7 + $0x180] sm:$0xff]  }
 0x100   : > { %1759 = vmatprep.mubr.bf16.mxu1 %v7421_v63  ;;  %v7662_v63 = vld [vmem:[#allocation2 + $0x58] sm:$0xff] }
 0x105   : > { %1294 = vmatmul.mubr.bf16.gmra.mrb[60].mxu0 %v7525_v22  ;;  %v6680_v22 = vld [vmem:[#allocation7 + $0x1d0] sm:$0xff]  }
 0x106   : > { %5948 = vmatprep.mubr.bf16.mxu0 %v902_v47 }
 0x107   : > { %1760 = vmatmul.mubr.bf16.gmra.mrb[60].mxu1 %v7494_v49  ;;  %v6679_v49 = vld [vmem:[#allocation7 + $0x188] sm:$0xff]  }
 0x108   : > { %5996 = vmatprep.mubr.bf16.mxu1 %v7654_v8 }
 0x10d   : > { %5949 = vmatmul.mubr.bf16.vlgmr.msra.gmra.mrb[64].mxu0 %v7657_v45 }
 0x10e   : > { %5389 = vmatpush3.bf16.msra.mxu0 %v6677_v59  ;;  %5952 = vmatprep.mubr.bf16.mxu0 %v7662_v63 }
 0x10f   : > { %5997 = vmatmul.mubr.bf16.vlgmr.msra.gmra.mrb[64].mxu1 %v902_v47  ;;  %5390 = vmatprep.subr.bf16.mxu0 %v6678_v11 }
 0x110   : > { %6000 = vmatprep.mubr.bf16.mxu1 %v7657_v45  ;;  %6029 = vmatpush3.bf16.msra.mxu1 %v7568_v27  ;;  %v7670_v27 = vld [vmem:[#allocation2 + $0x88] sm:$0xff] }
 0x111   : > { %6030 = vmatprep.subr.bf16.mxu1 %v6687_v28 }
 0x112   : > { %5391 = vmatpush3.bf16.msra.mxu0 %v6679_v49 }
 0x113   : > { %5392 = vmatprep.subr.bf16.mxu0 %v6680_v22 }
 0x114   : > { %6031 = vmatpush3.bf16.msra.mxu1 %v6687_v28  ;;  %v1943_v28 = vld [vmem:[#allocation2 + $0x98] sm:$0xff] }
 0x115   : > { %6032 = vmatprep.subr.bf16.mxu1 %v6690_v32  ;;  %5953 = vmatmul.mubr.bf16.gmra.mrb[68].mxu0 %v7664_v58 }
 0x116   : > { %5956 = vmatprep.mubr.bf16.mxu0 %v7670_v27  ;;  %5393 = vmatpush3.bf16.msra.mxu0 %v6681_v17 }
 0x117   : > { %6001 = vmatmul.mubr.bf16.gmra.mrb[68].mxu1 %v7662_v63  ;;  %5394 = vmatprep.subr.bf16.mxu0 %v6682_v43 }
 0x118   : > { %6004 = vmatprep.mubr.bf16.mxu1 %v7664_v58  ;;  %6033 = vmatpush3.bf16.msra.mxu1 %v6690_v32 }
 0x119   : > { %6034 = vmatprep.subr.bf16.mxu1 %v6691_v62 }
 0x11a   : > { %5395 = vmatpush3.bf16.msra.mxu0 %v6683_v0  ;;  %v1946_v0 = vld [vmem:[#allocation2 + $0xb0] sm:$0xff] }
 0x11b   : > { %5396 = vmatprep.subr.bf16.mxu0 %v6684_v15 }
 0x11c   : > { %6035 = vmatpush3.bf16.msra.mxu1 %v6691_v62 }
 0x11d   : > { %6036 = vmatprep.subr.bf16.mxu1 %v6694_v57  ;;  %5957 = vmatmul.mubr.bf16.gmra.mrb[72].mxu0 %v7675_v29 }
 0x11e   : > { %5960 = vmatprep.mubr.bf16.mxu0 %v7678_v61  ;;  %5397 = vmatpush3.bf16.msra.mxu0 %v6685_v41 }
 0x11f   : > { %6005 = vmatmul.mubr.bf16.gmra.mrb[72].mxu1 %v7670_v27  ;;  %5398 = vmatprep.subr.bf16.mxu0 %v6688_v20 }
 0x120   : > { %6008 = vmatprep.mubr.bf16.mxu1 %v7675_v29  ;;  %6037 = vmatpush3.bf16.msra.mxu1 %v6694_v57 }
 0x121   : > { %6038 = vmatprep.subr.bf16.mxu1 %v6695_v9 }
 0x122   : > { %5399 = vmatpush3.bf16.msra.mxu0 %v6689_v55 }
 0x123   : > { %5400 = vmatprep.subr.bf16.mxu0 %v6692_v33  ;;  %v1945_v33 = vld [vmem:[#allocation2 + $0xa8] sm:$0xff] }
 0x124   : > { %6039 = vmatpush3.bf16.msra.mxu1 %v6695_v9 }
 0x125   : > { %6040 = vmatprep.subr.bf16.mxu1 %v6698_v40  ;;  %5961 = vmatmul.mubr.bf16.gmra.mrb[76].mxu0 %v923_v44 }
 0x126   : > { %5964 = vmatprep.mubr.bf16.mxu0 %v926_v13  ;;  %5401 = vmatpush3.bf16.msra.mxu0 %v6693_v3 }
 0x127   : > { %6009 = vmatmul.mubr.bf16.gmra.mrb[76].mxu1 %v7678_v61  ;;  %5402 = vmatprep.subr.bf16.mxu0 %v6696_v26 }
 0x128   : > { %6012 = vmatprep.mubr.bf16.mxu1 %v923_v44  ;;  %6041 = vmatpush3.bf16.msra.mxu1 %v6698_v40 }
 0x129   : > { %6042 = vmatprep.subr.bf16.mxu1 %v6699_v50 }
 0x12a   : > { %5403 = vmatpush3.bf16.msra.mxu0 %v6697_v18 }
 0x12c   : > { %6043 = vmatpush3.bf16.msra.mxu1 %v6699_v50 }
 0x12d   : > { %5965 = vmatmul.mubr.bf16.gmra.mrb[80].mxu0 %v929_v30 }
 0x12e   : > { %5968 = vmatprep.mubr.bf16.mxu0 %v932_v23 }
 0x12f   : > { %6013 = vmatmul.mubr.bf16.gmra.mrb[80].mxu1 %v926_v13 }
 0x130   : > { %6016 = vmatprep.mubr.bf16.mxu1 %v929_v30 }
 0x135   : > { %5969 = vmatmul.mubr.bf16.gmra.mrb[84].mxu0 %v935_v39 }
 0x136   : > { %5972 = vmatprep.mubr.bf16.mxu0 %v7683_v42 }
 0x137   : > { %6017 = vmatmul.mubr.bf16.gmra.mrb[84].mxu1 %v932_v23 }
 0x138   : > { %6020 = vmatprep.mubr.bf16.mxu1 %v935_v39 }
 0x13d   : > { %5973 = vmatmul.mubr.bf16.gmra.mrb[88].mxu0 %v7685_v38 }
 0x13e   : > { %5976 = vmatprep.mubr.bf16.mxu0 %v7690_v4 }
 0x13f   : > { %6021 = vmatmul.mubr.bf16.gmra.mrb[88].mxu1 %v7683_v42 }
 0x140   : > { %6024 = vmatprep.mubr.bf16.mxu1 %v7685_v38 }
 0x145   : > { %5977 = vmatmul.mubr.bf16.gmra.mrb[92].mxu0 %v7696_v7 }
 0x146   : > { %2203 = vmatprep.mubr.bf16.mxu0 %v1931_v53 }
 0x147   : > { %6025 = vmatmul.mubr.bf16.gmra.mrb[92].mxu1 %v7690_v4 }
 0x148   : > { %6044 = vmatprep.mubr.bf16.mxu1 %v7657_v45 }
 0x14d   : > { %2204 = vmatmul.mubr.bf16.vlgmr.msra.gmra.mrb[96].mxu0 %v1930_v14 }
 0x14e   : > { %2211 = vmatprep.mubr.bf16.mxu0 %v1934_v46 }
 0x14f   : > { %6045 = vmatmul.mubr.bf16.vlgmr.msra.gmra.mrb[64].mxu1 %v7662_v63 }
 0x150   : > { %6048 = vmatprep.mubr.bf16.mxu1 %v7664_v58 }
 0x155   : > { %2212 = vmatmul.mubr.bf16.gmra.mrb[100].mxu0 %v1933_v48  ;;  %v1948_v48 = vld [vmem:[#allocation2 + $0xc0] sm:$0xff] }
 0x156   : > { %2219 = vmatprep.mubr.bf16.mxu0 %v1937_v19 }
 0x157   : > { %6049 = vmatmul.mubr.bf16.gmra.mrb[68].mxu1 %v7670_v27  ;;  %v1942_v27 = vld [vmem:[#allocation2 + $0x90] sm:$0xff] }
 0x158   : > { %6052 = vmatprep.mubr.bf16.mxu1 %v7675_v29 }
 0x15d   : > { %2220 = vmatmul.mubr.bf16.gmra.mrb[104].mxu0 %v1936_v52 }
 0x15e   : > { %2227 = vmatprep.mubr.bf16.mxu0 %v1940_v16 }
 0x15f   : > { %6053 = vmatmul.mubr.bf16.gmra.mrb[72].mxu1 %v7678_v61 }
 0x160   : > { %6056 = vmatprep.mubr.bf16.mxu1 %v923_v44  ;;  %v5132_v10 = vpop.f32.mrb[0].mxu0 }
 0x161   : > { %v5133_v51 = vpop.f32.mrb[1].mxu0 }
 0x162   : > { %v5268_v36 = vpop.f32.mrb[0].mxu1  ;;  %v5135_v60 = vpop.f32.mrb[2].mxu0  ;;  %v7710_v47 = vadd.f32 %v5133_v51, %v5132_v10 }
 0x163   : > { %v5269_v12 = vpop.f32.mrb[1].mxu1  ;;  %v5136_v45 = vpop.f32.mrb[3].mxu0 }
 0x164   : > { %v7704_v35 = vadd.f32 %v5269_v12, %v5268_v36  ;;  %v5271_v56 = vpop.f32.mrb[2].mxu1  ;;  %v7714_v63 = vadd.f32 %v5136_v45, %v5135_v60  ;;  %v1951_v60 = vld [vmem:[#allocation2 + $0xd8] sm:$0xff] }
 0x165   : > { %v5272_v21 = vpop.f32.mrb[3].mxu1  ;;  %2228 = vmatmul.mubr.bf16.gmra.mrb[108].mxu0 %v1939_v24 }
 0x166   : > { %v7706_v2 = vadd.f32 %v5272_v21, %v5271_v56  ;;  %2235 = vmatprep.mubr.bf16.mxu0 %v1943_v28  ;;  %v1952_v56 = vld [vmem:[#allocation2 + $0xe0] sm:$0xff] }
 0x167   : > { %6057 = vmatmul.mubr.bf16.gmra.mrb[76].mxu1 %v926_v13 }
 0x168   : > { %6060 = vmatprep.mubr.bf16.mxu1 %v929_v30  ;;  %v5138_v11 = vpop.f32.mrb[4].mxu0  ;;  %v1949_v30 = vld [vmem:[#allocation2 + $0xc8] sm:$0xff] }
 0x169   : > { %v5139_v58 = vpop.f32.mrb[5].mxu0 }
 0x16a   : > { %v5274_v1 = vpop.f32.mrb[4].mxu1  ;;  %v5141_v22 = vpop.f32.mrb[6].mxu0  ;;  %v7718_v57 = vadd.f32 %v5139_v58, %v5138_v11 }
 0x16b   : > { %v5275_v34 = vpop.f32.mrb[5].mxu1  ;;  %v5142_v29 = vpop.f32.mrb[7].mxu0 }
 0x16c   : > { %v7708_v31 = vadd.f32 %v5275_v34, %v5274_v1  ;;  %v5277_v5 = vpop.f32.mrb[6].mxu1  ;;  %v7722_v61 = vadd.f32 %v5142_v29, %v5141_v22 }
 0x16d   : > { %v5278_v32 = vpop.f32.mrb[7].mxu1  ;;  %2236 = vmatmul.mubr.bf16.gmra.mrb[112].mxu0 %v1942_v27 }
 0x16e   : > { %v7712_v59 = vadd.f32 %v5278_v32, %v5277_v5  ;;  %2243 = vmatprep.mubr.bf16.mxu0 %v1946_v0  ;;  %v1955_v32 = vld [vmem:[#allocation2 + $0xf8] sm:$0xff]  ;;  %v1954_v0 = vld [vmem:[#allocation2 + $0xf0] sm:$0xff] }
 0x16f   : > { %6061 = vmatmul.mubr.bf16.gmra.mrb[80].mxu1 %v932_v23 }
 0x170   : > { %6064 = vmatprep.mubr.bf16.mxu1 %v935_v39  ;;  %v5144_v41 = vpop.f32.mrb[8].mxu0 }
 0x171   : > { %v5145_v40 = vpop.f32.mrb[9].mxu0 }
 0x172   : > { %v5280_v62 = vpop.f32.mrb[8].mxu1  ;;  %v5147_v55 = vpop.f32.mrb[10].mxu0  ;;  %v7728_v3 = vadd.f32 %v5145_v40, %v5144_v41 }
 0x173   : > { %v5281_v49 = vpop.f32.mrb[9].mxu1  ;;  %v5148_v26 = vpop.f32.mrb[11].mxu0 }
 0x174   : > { %v7716_v17 = vadd.f32 %v5281_v49, %v5280_v62  ;;  %v5283_v43 = vpop.f32.mrb[10].mxu1  ;;  %v7732_v39 = vadd.f32 %v5148_v26, %v5147_v55 }
 0x175   : > { %v5284_v9 = vpop.f32.mrb[11].mxu1  ;;  %2244 = vmatmul.mubr.bf16.gmra.mrb[116].mxu0 %v1945_v33 }
 0x176   : > { %v7720_v15 = vadd.f32 %v5284_v9, %v5283_v43  ;;  %2251 = vmatprep.mubr.bf16.mxu0 %v1949_v30 }
 0x177   : > { %6065 = vmatmul.mubr.bf16.gmra.mrb[84].mxu1 %v7683_v42 }
 0x178   : > { %6068 = vmatprep.mubr.bf16.mxu1 %v7685_v38  ;;  %v5150_v42 = vpop.f32.mrb[12].mxu0 }
 0x179   : > { %v5151_v53 = vpop.f32.mrb[13].mxu0 }
 0x17a   : > { %v5286_v20 = vpop.f32.mrb[12].mxu1  ;;  %v5153_v46 = vpop.f32.mrb[14].mxu0  ;;  %v7738_v12 = vadd.f32 %v5151_v53, %v5150_v42  ;;  %v1957_v53 = vld [vmem:[#allocation2 + $0x108] sm:$0xff] }
 0x17b   : > { %v5287_v44 = vpop.f32.mrb[13].mxu1  ;;  %v5154_v52 = vpop.f32.mrb[15].mxu0 }
 0x17c   : > { %v7726_v50 = vadd.f32 %v5287_v44, %v5286_v20  ;;  %v5289_v13 = vpop.f32.mrb[14].mxu1  ;;  %v1958_v44 = vld [vmem:[#allocation2 + $0x110] sm:$0xff] }
 0x17d   : > { %v5290_v18 = vpop.f32.mrb[15].mxu1  ;;  %2252 = vmatmul.mubr.bf16.gmra.mrb[120].mxu0 %v1948_v48 }
 0x17e   : > { %v7730_v23 = vadd.f32 %v5290_v18, %v5289_v13  ;;  %2259 = vmatprep.mubr.bf16.mxu0 %v1952_v56 }
 0x17f   : > { %6069 = vmatmul.mubr.bf16.gmra.mrb[88].mxu1 %v7690_v4  ;;  %v7742_v4 = vadd.f32 %v5154_v52, %v5153_v46  ;;  %v1961_v52 = vld [vmem:[#allocation2 + $0x128] sm:$0xff] }
 0x180   : > { %6072 = vmatprep.mubr.bf16.mxu1 %v7696_v7  ;;  %v5156_v7 = vpop.f32.mrb[16].mxu0 }
 0x181   : > { %v5157_v1 = vpop.f32.mrb[17].mxu0 }
 0x182   : > { %v5292_v38 = vpop.f32.mrb[16].mxu1  ;;  %v5159_v34 = vpop.f32.mrb[18].mxu0  ;;  %v7747_v45 = vadd.f32 %v5157_v1, %v5156_v7  ;;  %v6701_v1 = vld [vmem:[#allocation9 + $0xc0] sm:$0xff]  }
 0x183   : > { %v5293_v14 = vpop.f32.mrb[17].mxu1  ;;  %v5160_v28 = vpop.f32.mrb[19].mxu0 }
 0x184   : > { %v7736_v19 = vadd.f32 %v5293_v14, %v5292_v38  ;;  %v5295_v36 = vpop.f32.mrb[18].mxu1  ;;  %v7751_v58 = vadd.f32 %v5160_v28, %v5159_v34  ;;  %v6702_v28 = vld [vmem:[#allocation9 + $0x108] sm:$0xff]  }
 0x185   : > { %v5296_v16 = vpop.f32.mrb[19].mxu1  ;;  %2260 = vmatmul.mubr.bf16.gmra.mrb[124].mxu0 %v1951_v60 }
 0x186   : > { %v7740_v21 = vadd.f32 %v5296_v16, %v5295_v36  ;;  %2267 = vmatprep.mubr.bf16.mxu0 %v1955_v32 }
 0x187   : > { %6073 = vmatmul.mubr.bf16.gmra.mrb[92].mxu1 %v7654_v8 }
 0x188   : > { %v5162_v49 = vpop.f32.mrb[20].mxu0 }
 0x189   : > { %v5163_v27 = vpop.f32.mrb[21].mxu0 }
 0x18a   : > { %v5298_v10 = vpop.f32.mrb[20].mxu1  ;;  %v5165_v29 = vpop.f32.mrb[22].mxu0  ;;  %v7755_v20 = vadd.f32 %v5163_v27, %v5162_v49 }
 0x18b   : > { %v5299_v51 = vpop.f32.mrb[21].mxu1  ;;  %v5166_v40 = vpop.f32.mrb[23].mxu0 }
 0x18c   : > { %v7745_v24 = vadd.f32 %v5299_v51, %v5298_v10  ;;  %v5301_v5 = vpop.f32.mrb[22].mxu1  ;;  %v7759_v13 = vadd.f32 %v5166_v40, %v5165_v29  ;;  %v6700_v10 = vld [vmem:[#allocation9 + $0x100] sm:$0xff]  }
 0x18d   : > { %v5302_v11 = vpop.f32.mrb[23].mxu1  ;;  %2268 = vmatmul.mubr.bf16.gmra.mrb[128].mxu0 %v1954_v0  ;;  %5524 = vmatprep.subr.bf16.mxu0 %v6700_v10  ;;  %v1964_v0 = vld [vmem:[#allocation2 + $0x140] sm:$0xff] }
 0x18e   : > { %v7749_v62 = vadd.f32 %v5302_v11, %v5301_v5  ;;  %2275 = vmatprep.mubr.bf16.mxu0 %v1958_v44  ;;  %5525 = vmatpush3.bf16.msra.mxu0 %v6701_v1  ;;  %v1960_v11 = vld [vmem:[#allocation2 + $0x120] sm:$0xff]  ;;  %v6707_v1 = vld [vmem:[#allocation9 + $0xd8] sm:$0xff]  }
 0x18f   : > { %5526 = vmatprep.subr.bf16.mxu0 %v6702_v28 }
 0x190   : > { %v5168_v26 = vpop.f32.mrb[24].mxu0 }
 0x191   : > { %v5169_v18 = vpop.f32.mrb[25].mxu0 }
 0x192   : > { %v5304_v22 = vpop.f32.mrb[24].mxu1  ;;  %v5171_v38 = vpop.f32.mrb[26].mxu0  ;;  %v7763_v48 = vadd.f32 %v5169_v18, %v5168_v26  ;;  %v6705_v26 = vld [vmem:[#allocation9 + $0xd0] sm:$0xff]  }
 0x193   : > { %v5305_v43 = vpop.f32.mrb[25].mxu1  ;;  %v5172_v36 = vpop.f32.mrb[27].mxu0 }
 0x194   : > { %v7753_v9 = vadd.f32 %v5305_v43, %v5304_v22  ;;  %v5307_v41 = vpop.f32.mrb[26].mxu1  ;;  %v7767_v7 = vadd.f32 %v5172_v36, %v5171_v38  ;;  %v6703_v43 = vld [vmem:[#allocation9 + $0xc8] sm:$0xff]  }
 0x195   : > { %v5308_v55 = vpop.f32.mrb[27].mxu1  ;;  %2276 = vmatmul.mubr.bf16.gmra.mrb[132].mxu0 %v1957_v53  ;;  %v6706_v53 = vld [vmem:[#allocation9 + $0x118] sm:$0xff]  }
 0x196   : > { %v7757_v33 = vadd.f32 %v5308_v55, %v5307_v41  ;;  %2283 = vmatprep.mubr.bf16.mxu0 %v1961_v52  ;;  %5527 = vmatpush3.bf16.msra.mxu0 %v6703_v43  ;;  %v6704_v55 = vld [vmem:[#allocation9 + $0x110] sm:$0xff]   ;;  %v1963_v52 = vld [vmem:[#allocation2 + $0x138] sm:$0xff] }
 0x197   : > { %5528 = vmatprep.subr.bf16.mxu0 %v6704_v55 }
 0x198   : > { %v5174_v51 = vpop.f32.mrb[28].mxu0 }
 0x199   : > { %v5175_v60 = vpop.f32.mrb[29].mxu0 }
 0x19a   : > { %v5310_v30 = vpop.f32.mrb[28].mxu1  ;;  %v5177_v32 = vpop.f32.mrb[30].mxu0  ;;  %v7771_v27 = vadd.f32 %v5175_v60, %v5174_v51  ;;  %5529 = vmatpush3.bf16.msra.mxu0 %v6705_v26  ;;  %v1966_v26 = vld [vmem:[#allocation2 + $0x150] sm:$0xff] }
 0x19b   : > { %v5311_v42 = vpop.f32.mrb[29].mxu1  ;;  %v5178_v29 = vpop.f32.mrb[31].mxu0  ;;  %5530 = vmatprep.subr.bf16.mxu0 %v6706_v53  ;;  %v1970_v53 = vld [vmem:[#allocation2 + $0x170] sm:$0xff] }
 0x19c   : > { %v7761_v14 = vadd.f32 %v5311_v42, %v5310_v30  ;;  %v5313_v46 = vpop.f32.mrb[30].mxu1  ;;  %v7775_v44 = vadd.f32 %v5178_v29, %v5177_v32  ;;  %v6708_v32 = vld [vmem:[#allocation9 + $0x120] sm:$0xff]  }
 0x19d   : > { %v5314_v56 = vpop.f32.mrb[31].mxu1  ;;  %2284 = vmatmul.mubr.bf16.gmra.mrb[136].mxu0 %v1960_v11  ;;  %v6709_v11 = vld [vmem:[#allocation9 + $0xe0] sm:$0xff]  }
 0x19e   : > { %v7765_v16 = vadd.f32 %v5314_v56, %v5313_v46  ;;  %2291 = vmatprep.mubr.bf16.mxu0 %v1964_v0  ;;  %5531 = vmatpush3.bf16.msra.mxu0 %v6707_v1 }
 0x19f   : > { %5532 = vmatprep.subr.bf16.mxu0 %v6708_v32  ;;  %v6714_v32 = vld [vmem:[#allocation9 + $0x130] sm:$0xff]  }
 0x1a0   : > { %v5180_v30 = vpop.f32.mrb[32].mxu0 }
 0x1a1   : > { %v5181_v42 = vpop.f32.mrb[33].mxu0 }
 0x1a2   : > { %v5316_v34 = vpop.f32.mrb[32].mxu1  ;;  %v7777_v46 = vadd.f32 %v5181_v42, %v5180_v30  ;;  %v5183_v36 = vpop.f32.mrb[34].mxu0  ;;  %5533 = vmatpush3.bf16.msra.mxu0 %v6709_v11  ;;  %v6711_v42 = vld [vmem:[#allocation9 + $0x128] sm:$0xff]   ;;  %v6715_v11 = vld [vmem:[#allocation9 + $0xf0] sm:$0xff]  }
 0x1a3   : > { %v5317_v5 = vpop.f32.mrb[33].mxu1  ;;  %v5184_v51 = vpop.f32.mrb[35].mxu0  ;;  %5534 = vmatprep.subr.bf16.mxu0 %v6711_v42 }
 0x1a4   : > { %v7769_v49 = vadd.f32 %v5317_v5, %v5316_v34  ;;  %v5319_v22 = vpop.f32.mrb[34].mxu1  ;;  %v1967_v34 = vld [vmem:[#allocation2 + $0x158] sm:$0xff]  ;;  %v7781_v5 = vadd.f32 %v5184_v51, %v5183_v36  ;;  %v2636_v51 = vld [vmem:[#allocation3 + $0x18] sm:$0x1] }
 0x1a5   : > { %v5320_v41 = vpop.f32.mrb[35].mxu1  ;;  %2292 = vmatmul.mubr.bf16.gmra.mrb[140].mxu0 %v1963_v52  ;;  %v6712_v52 = vld [vmem:[#allocation9 + $0xe8] sm:$0xff]  }
 0x1a6   : > { %v7773_v40 = vadd.f32 %v5320_v41, %v5319_v22  ;;  %2299 = vmatprep.mubr.bf16.mxu0 %v1967_v34  ;;  %v2637_v34 = vsel %vm7173_vm2, 0, %v2636_v51  ;;  %5535 = vmatpush3.bf16.msra.mxu0 %v6712_v52  ;;  %v6713_v52 = vld [vmem:[#allocation9 + $0x148] sm:$0xff]   ;;  %v6718_v51 = vld [vmem:[#allocation9 + $0xf8] sm:$0xff]  }
 0x1a7   : > { %2638 = vst [vmem:[#allocation3 + $0x18] sm:$0x1] %v2637_v34  ;;  %5536 = vmatprep.subr.bf16.mxu0 %v6714_v32  ;;  %v2639_v32 = vld [vmem:[#allocation3 + $0x30] sm:$0x1] }
 0x1a8   : > { %v5186_v22 = vpop.f32.mrb[36].mxu0 }
 0x1a9   : > { %v5187_v29 = vpop.f32.mrb[37].mxu0 }
 0x1aa   : > { %v5322_v18 = vpop.f32.mrb[36].mxu1  ;;  %v7785_v41 = vadd.f32 %v5187_v29, %v5186_v22  ;;  %v5189_v55 = vpop.f32.mrb[38].mxu0  ;;  %5537 = vmatpush3.bf16.msra.mxu0 %v6715_v11  ;;  %v6716_v11 = vld [vmem:[#allocation9 + $0x150] sm:$0xff]  }
 0x1ab   : > { %v5323_v38 = vpop.f32.mrb[37].mxu1 }
 0x1ac   : > { %v7779_v56 = vadd.f32 %v5323_v38, %v5322_v18  ;;  %v5325_v10 = vpop.f32.mrb[38].mxu1  ;;  %v5190_v38 = vpop.f32.mrb[39].mxu0 }
 0x1ad   : > { %v5326_v60 = vpop.f32.mrb[39].mxu1  ;;  %2300 = vmatmul.mubr.bf16.gmra.mrb[144].mxu0 %v1966_v26 }
 0x1ae   : > { %v7783_v28 = vadd.f32 %v5326_v60, %v5325_v10  ;;  %v7789_v10 = vadd.f32 %v5190_v38, %v5189_v55  ;;  %2307 = vmatprep.mubr.bf16.mxu0 %v1970_v53  ;;  %v6710_v60 = vld [vmem:[#allocation9 + $0x140] sm:$0xff]   ;;  %v6717_v38 = vld [vmem:[#allocation9 + $0x138] sm:$0xff]  }
 0x1af   : > { %6076 = vmatprep.subr.bf16.mxu1 %v6710_v60  ;;  %5538 = vmatprep.subr.bf16.mxu0 %v6717_v38 }
 0x1b0   : > { %v5192_v22 = vpop.f32.mrb[40].mxu0  ;;  %6077 = vmatpush3.bf16.msra.mxu1 %v6710_v60  ;;  %v2640_v60 = vsel %vm7173_vm2, 0, %v2639_v32  ;;  %5539 = vmatpush3.bf16.msra.mxu0 %v6718_v51  ;;  %v6775_v51 = vld [vmem:[#allocation2 + $0x180] sm:$0xff] }
 0x1b1   : > { %v5193_v29 = vpop.f32.mrb[41].mxu0  ;;  %6078 = vmatprep.subr.bf16.mxu1 %v6713_v52  ;;  %2641 = vst [vmem:[#allocation3 + $0x30] sm:$0x1] %v2640_v60  ;;  %v2642_v60 = vld [vmem:[#allocation3 + $0x48] sm:$0x1] }
 0x1b2   : > { %v5328_v43 = vpop.f32.mrb[40].mxu1  ;;  %v7795_v55 = vadd.f32 %v5193_v29, %v5192_v22  ;;  %v6774_v22 = vld [vmem:[#allocation2 + $0x188] sm:$0xff] }
 0x1b3   : > { %v5329_v0 = vpop.f32.mrb[41].mxu1 }
 0x1b4   : > { %v7787_v30 = vadd.f32 %v5329_v0, %v5328_v43  ;;  %v5331_v18 = vpop.f32.mrb[42].mxu1  ;;  %6079 = vmatpush3.bf16.msra.mxu1 %v6713_v52 }
 0x1b5   : > { %v5332_v36 = vpop.f32.mrb[43].mxu1  ;;  %2308 = vmatmul.mubr.bf16.gmra.mrb[148].mxu0 %v6773_v37  ;;  %6080 = vmatprep.subr.bf16.mxu1 %v6716_v11 }
 0x1b6   : > { %v7791_v1 = vadd.f32 %v5332_v36, %v5331_v18  ;;  %v5195_v18 = vpop.f32.mrb[42].mxu0  ;;  %2315 = vmatprep.mubr.bf16.mxu0 %v6774_v22 }
 0x1b7   : > { %v5196_v53 = vpop.f32.mrb[43].mxu0 }
 0x1b8   : > { %8930 = vst [vmem:[#allocation17_spill] sm:$0xff] %v7791_v1  ;;  %v7799_v34 = vadd.f32 %v5196_v53, %v5195_v18  ;;  %6081 = vmatpush3.bf16.msra.mxu1 %v6716_v11  ;;  %v6721_v1 = vld [vmem:[#allocation9 + $0x168] sm:$0xff]  }
 0x1b9   : > { %6082 = vmatprep.subr.bf16.mxu1 %v6719_v54 }
 0x1ba   : > { %v5334_v43 = vpop.f32.mrb[44].mxu1 }
 0x1bb   : > { %v5335_v0 = vpop.f32.mrb[45].mxu1 }
 0x1bc   : > { %v7797_v26 = vadd.f32 %v5335_v0, %v5334_v43  ;;  %v5337_v42 = vpop.f32.mrb[46].mxu1  ;;  %v5198_v43 = vpop.f32.mrb[44].mxu0  ;;  %6083 = vmatpush3.bf16.msra.mxu1 %v6719_v54 }
 0x1bd   : > { %v5338_v36 = vpop.f32.mrb[47].mxu1  ;;  %v5199_v0 = vpop.f32.mrb[45].mxu0  ;;  %2316 = vmatmul.mubr.bf16.gmra.mrb[152].mxu0 %v6775_v51 }
 0x1be   : > { %v7801_v6 = vadd.f32 %v5338_v36, %v5337_v42  ;;  %v7805_v42 = vadd.f32 %v5199_v0, %v5198_v43  ;;  %v5201_v38 = vpop.f32.mrb[46].mxu0  ;;  %2323 = vmatprep.mubr.bf16.mxu0 %v7654_v8  ;;  %v2643_v43 = vsel %vm7173_vm2, 0, %v2642_v60  ;;  %v2645_v60 = vld [vmem:[#allocation3 + $0x60] sm:$0x1] }
 0x1bf   : > { %v5202_v36 = vpop.f32.mrb[47].mxu0  ;;  %2644 = vst [vmem:[#allocation3 + $0x48] sm:$0x1] %v2643_v43  ;;  %v2646_v43 = vsel %vm7173_vm2, 0, %v2645_v60  ;;  %v2648_v60 = vld [vmem:[#allocation3 + $0x78] sm:$0x1] }
 0x1c0   : > { %8931 = vst [vmem:[#allocation18_spill] sm:$0xff] %v7801_v6  ;;  %v7809_v22 = vadd.f32 %v5202_v36, %v5201_v38  ;;  %v5204_v11 = vpop.f32.mrb[48].mxu0  ;;  %2647 = vst [vmem:[#allocation3 + $0x60] sm:$0x1] %v2646_v43  ;;  %v2649_v43 = vsel %vm7173_vm2, 0, %v2648_v60 }
 0x1c1   : > { %2650 = vst [vmem:[#allocation3 + $0x78] sm:$0x1] %v2649_v43 }
 0x1c2   : > { %v5340_v29 = vpop.f32.mrb[48].mxu1 }
 0x1c3   : > { %v5341_v18 = vpop.f32.mrb[49].mxu1 }
 0x1c4   : > { %v7807_v53 = vadd.f32 %v5341_v18, %v5340_v29  ;;  %v5343_v37 = vpop.f32.mrb[50].mxu1  ;;  %v6720_v29 = vld [vmem:[#allocation9 + $0x160] sm:$0xff]   ;;  %v5205_v18 = vpop.f32.mrb[49].mxu0 }
 0x1c5   : > { %v5344_v32 = vpop.f32.mrb[51].mxu1  ;;  %6084 = vmatprep.subr.bf16.mxu1 %v6720_v29  ;;  %v7816_v38 = vadd.f32 %v5205_v18, %v5204_v11  ;;  %2324 = vmatmul.mubr.bf16.gmra.mrb[156].mxu0 %v7654_v8 }
 0x1c6   : > { %8932 = vst [vmem:[#allocation19_spill] sm:$0xff] %v7807_v53  ;;  %v7811_v52 = vadd.f32 %v5344_v32, %v5343_v37  ;;  %v5207_v37 = vpop.f32.mrb[50].mxu0  ;;  %6085 = vmatpush3.bf16.msra.mxu1 %v6720_v29 }
 0x1c7   : > { %8934 = vst [vmem:[#allocation21_spill] sm:$0xff] %v7816_v38  ;;  %v5208_v51 = vpop.f32.mrb[51].mxu0  ;;  %6086 = vmatprep.subr.bf16.mxu1 %v6721_v1 }
 0x1c8   : > { %8933 = vst [vmem:[#allocation20_spill] sm:$0xff] %v7811_v52  ;;  %v7820_v6 = vadd.f32 %v5208_v51, %v5207_v37  ;;  %v5210_v11 = vpop.f32.mrb[52].mxu0 }
 0x1c9   : > { %v5211_v29 = vpop.f32.mrb[53].mxu0 }
 0x1ca   : > { %v5346_v0 = vpop.f32.mrb[52].mxu1  ;;  %8936 = vst [vmem:[#allocation23_spill] sm:$0xff] %v7820_v6  ;;  %6087 = vmatpush3.bf16.msra.mxu1 %v6721_v1  ;;  %v5213_v37 = vpop.f32.mrb[54].mxu0 }
 0x1cb   : > { %v5347_v53 = vpop.f32.mrb[53].mxu1  ;;  %v5214_v8 = vpop.f32.mrb[55].mxu0 }
 0x1cc   : > { %v7818_v36 = vadd.f32 %v5347_v53, %v5346_v0  ;;  %v5349_v32 = vpop.f32.mrb[54].mxu1  ;;  %v6722_v53 = vld [vmem:[#allocation9 + $0x170] sm:$0xff]   ;;  %v7831_v6 = vadd.f32 %v5214_v8, %v5213_v37 }
 0x1cd   : > { %v5350_v52 = vpop.f32.mrb[55].mxu1  ;;  %6088 = vmatprep.subr.bf16.mxu1 %v6722_v53 }
 0x1ce   : > { %8935 = vst [vmem:[#allocation22_spill] sm:$0xff] %v7818_v36  ;;  %v7822_v54 = vadd.f32 %v5350_v52, %v5349_v32  ;;  %v7827_v36 = vadd.f32 %v5211_v29, %v5210_v11  ;;  %6089 = vmatpush3.bf16.msra.mxu1 %v6722_v53  ;;  %8940 = vst [vmem:[#allocation27_spill] sm:$0xff] %v7831_v6  ;;  %v2651_v6 = vld [vmem:[#allocation3 + $0x90] sm:$0x1] }
 0x1d0   : > { %8937 = vst [vmem:[#allocation24_spill] sm:$0xff] %v7822_v54  ;;  %8938 = vst [vmem:[#allocation25_spill] sm:$0xff] %v7827_v36  ;;  %v6723_v54 = vld [vmem:[#allocation9 + $0x178] sm:$0xff]   ;;  %v5216_v11 = vpop.f32.mrb[56].mxu0 }
 0x1d1   : > { %6090 = vmatprep.subr.bf16.mxu1 %v6723_v54 }
 0x1d2   : > { %v5352_v0 = vpop.f32.mrb[56].mxu1  ;;  %6091 = vmatpush3.bf16.msra.mxu1 %v6723_v54  ;;  %v2652_v54 = vsel %vm7173_vm2, 0, %v2651_v6 }
 0x1d3   : > { %v5353_v18 = vpop.f32.mrb[57].mxu1  ;;  %2653 = vst [vmem:[#allocation3 + $0x90] sm:$0x1] %v2652_v54 }
 0x1d4   : > { %v7829_v52 = vadd.f32 %v5353_v18, %v5352_v0  ;;  %v5355_v32 = vpop.f32.mrb[58].mxu1  ;;  %v5217_v0 = vpop.f32.mrb[57].mxu0 }
 0x1d5   : > { %v5356_v51 = vpop.f32.mrb[59].mxu1  ;;  %v5219_v53 = vpop.f32.mrb[58].mxu0 }
 0x1d6   : > { %8939 = vst [vmem:[#allocation26_spill] sm:$0xff] %v7829_v52  ;;  %v7833_v1 = vadd.f32 %v5356_v51, %v5355_v32  ;;  %v7837_v52 = vadd.f32 %v5217_v0, %v5216_v11  ;;  %v5220_v8 = vpop.f32.mrb[59].mxu0 }
 0x1d7   : > { %v7841_v51 = vadd.f32 %v5220_v8, %v5219_v53 }
 0x1d8   : > { %8941 = vst [vmem:[#allocation28_spill] sm:$0xff] %v7833_v1  ;;  %v5222_v60 = vpop.f32.mrb[60].mxu0 }
 0x1d9   : > { %v5223_v43 = vpop.f32.mrb[61].mxu0 }
 0x1da   : > { %v5358_v29 = vpop.f32.mrb[60].mxu1  ;;  %v7847_v36 = vadd.f32 %v5223_v43, %v5222_v60  ;;  %v5225_v11 = vpop.f32.mrb[62].mxu0 }
 0x1db   : > { %v5359_v18 = vpop.f32.mrb[61].mxu1  ;;  %v5226_v0 = vpop.f32.mrb[63].mxu0 }
 0x1dc   : > { %v7839_v38 = vadd.f32 %v5359_v18, %v5358_v29  ;;  %v5361_v37 = vpop.f32.mrb[62].mxu1  ;;  %v7849_v29 = vadd.f32 %v5226_v0, %v5225_v11  ;;  %v2654_v18 = vld [vmem:[#allocation3 + $0xa8] sm:$0x1] }
 0x1dd   : > { %v5362_v32 = vpop.f32.mrb[63].mxu1  ;;  %v2655_v53 = vsel %vm7173_vm2, 0, %v2654_v18 }
 0x1de   : > { %v7843_v1 = vadd.f32 %v5362_v32, %v5361_v37  ;;  %2656 = vst [vmem:[#allocation3 + $0xa8] sm:$0x1] %v2655_v53  ;;  %v2657_v53 = vld [vmem:[#allocation3 + $0xc0] sm:$0x1] }
 0x1e0   : > { %8942 = vst [vmem:[#allocation29_spill] sm:$0xff] %v7843_v1  ;;  %v5950_v37 = vpop.f32.mrb[64].mxu0 }
 0x1e1   : > { %v1345_v8 = vadd.f32 %v5950_v37, %v7718_v57  ;;  %v1336_v32 = vpop.f32.mrb[65].mxu0 }
 0x1e2   : > { %v1337_v6 = vadd.f32 %v7710_v47, %v1336_v32  ;;  %v5951_v54 = vpop.f32.mrb[66].mxu0  ;;  %v2658_v47 = vsel %vm7173_vm2, 0, %v2657_v53 }
 0x1e3   : > { %v7856_v1 = vadd.f32 %v7708_v31, %v1345_v8  ;;  %v1348_v60 = vadd.f32 %v5951_v54, %v7722_v61  ;;  %v1339_v43 = vpop.f32.mrb[67].mxu0  ;;  %2659 = vst [vmem:[#allocation3 + $0xc0] sm:$0x1] %v2658_v47 }
 0x1e4   : > { %v7860_v11 = vadd.f32 %v7704_v35, %v1337_v6  ;;  %v1340_v0 = vadd.f32 %v7714_v63, %v1339_v43 }
 0x1e5   : > { %v7864_v18 = vadd.f32 %v7712_v59, %v1348_v60  ;;  %v2660_v60 = vld [vmem:[#allocation3 + $0xd8] sm:$0x1] }
 0x1e6   : > { %v7867_v57 = vadd.f32 %v7706_v2, %v1340_v0 }
 0x1e8   : > { %v5954_v31 = vpop.f32.mrb[68].mxu0 }
 0x1e9   : > { %v1361_v61 = vadd.f32 %v5954_v31, %v7738_v12  ;;  %v1352_v37 = vpop.f32.mrb[69].mxu0 }
 0x1ea   : > { %v1353_v35 = vadd.f32 %v7728_v3, %v1352_v37  ;;  %v5955_v8 = vpop.f32.mrb[70].mxu0  ;;  %v2661_v3 = vsel %vm7173_vm2, 0, %v2660_v60 }
 0x1eb   : > { %v7874_v63 = vadd.f32 %v7726_v50, %v1361_v61  ;;  %v1364_v59 = vadd.f32 %v5955_v8, %v7742_v4  ;;  %v1355_v32 = vpop.f32.mrb[71].mxu0  ;;  %2662 = vst [vmem:[#allocation3 + $0xd8] sm:$0x1] %v2661_v3  ;;  %v2663_v61 = vld [vmem:[#allocation3 + $0xf0] sm:$0x1] }
 0x1ec   : > { %v7878_v2 = vadd.f32 %v7716_v17, %v1353_v35  ;;  %v1356_v6 = vadd.f32 %v7732_v39, %v1355_v32 }
 0x1ed   : > { %v7882_v54 = vadd.f32 %v7730_v23, %v1364_v59 }
 0x1ee   : > { %v7885_v12 = vadd.f32 %v7720_v15, %v1356_v6  ;;  %v2666_v6 = vld [vmem:[#allocation3 + $0x108] sm:$0x1] }
 0x1f0   : > { %v5958_v50 = vpop.f32.mrb[72].mxu0 }
 0x1f1   : > { %v1377_v4 = vadd.f32 %v5958_v50, %v7755_v20  ;;  %v1368_v43 = vpop.f32.mrb[73].mxu0 }
 0x1f2   : > { %v1369_v17 = vadd.f32 %v7747_v45, %v1368_v43  ;;  %v5959_v0 = vpop.f32.mrb[74].mxu0  ;;  %v2664_v45 = vsel %vm7173_vm2, 0, %v2663_v61  ;;  %v8943_v61 = vld [vmem:[#allocation18_spill] sm:$0xff] }
 0x1f3   : > { %v7892_v39 = vadd.f32 %v7745_v24, %v1377_v4  ;;  %v1380_v23 = vadd.f32 %v5959_v0, %v7759_v13  ;;  %v1371_v53 = vpop.f32.mrb[75].mxu0  ;;  %2665 = vst [vmem:[#allocation3 + $0xf0] sm:$0x1] %v2664_v45 }
 0x1f4   : > { %v7896_v15 = vadd.f32 %v7736_v19, %v1369_v17  ;;  %v1372_v47 = vadd.f32 %v7751_v58, %v1371_v53  ;;  %v2669_v17 = vld [vmem:[#allocation3 + $0x120] sm:$0x1] }
 0x1f5   : > { %v7900_v31 = vadd.f32 %v7749_v62, %v1380_v23 }
 0x1f6   : > { %v7903_v20 = vadd.f32 %v7740_v21, %v1372_v47 }
 0x1f8   : > { %v5962_v24 = vpop.f32.mrb[76].mxu0 }
 0x1f9   : > { %v1393_v13 = vadd.f32 %v5962_v24, %v7771_v27  ;;  %v1384_v37 = vpop.f32.mrb[77].mxu0  ;;  %v2672_v24 = vld [vmem:[#allocation3 + $0x138] sm:$0x1] }
 0x1fa   : > { %v1385_v19 = vadd.f32 %v7763_v48, %v1384_v37  ;;  %v5963_v35 = vpop.f32.mrb[78].mxu0  ;;  %v2667_v48 = vsel %vm7173_vm2, 0, %v2666_v6  ;;  %v8945_v37 = vld [vmem:[#allocation25_spill] sm:$0xff] }
 0x1fb   : > { %v7910_v58 = vadd.f32 %v7761_v14, %v1393_v13  ;;  %v1396_v62 = vadd.f32 %v5963_v35, %v7775_v44  ;;  %v1387_v8 = vpop.f32.mrb[79].mxu0  ;;  %2668 = vst [vmem:[#allocation3 + $0x108] sm:$0x1] %v2667_v48  ;;  %v8946_v35 = vld [vmem:[#allocation21_spill] sm:$0xff] }
 0x1fc   : > { %v7914_v21 = vadd.f32 %v7753_v9, %v1385_v19  ;;  %v1388_v59 = vadd.f32 %v7767_v7, %v1387_v8  ;;  %v8947_v8 = vld [vmem:[#allocation22_spill] sm:$0xff] }
 0x1fd   : > { %v7918_v32 = vadd.f32 %v7765_v16, %v1396_v62 }
 0x1fe   : > { %v7921_v27 = vadd.f32 %v7757_v33, %v1388_v59  ;;  %v8949_v59 = vld [vmem:[#allocation27_spill] sm:$0xff] }
 0x200   : > { %v5966_v14 = vpop.f32.mrb[80].mxu0 }
 0x201   : > { %v1409_v44 = vadd.f32 %v5966_v14, %v7785_v41  ;;  %v1400_v60 = vpop.f32.mrb[81].mxu0  ;;  %v8950_v14 = vld [vmem:[#allocation19_spill] sm:$0xff] }
 0x202   : > { %v1401_v9 = vadd.f32 %v7777_v46, %v1400_v60  ;;  %v5967_v3 = vpop.f32.mrb[82].mxu0  ;;  %v2670_v46 = vsel %vm7173_vm2, 0, %v2669_v17  ;;  %v8951_v60 = vld [vmem:[#allocation23_spill] sm:$0xff] }
 0x203   : > { %v7928_v7 = vadd.f32 %v7779_v56, %v1409_v44  ;;  %v1412_v16 = vadd.f32 %v5967_v3, %v7789_v10  ;;  %v1403_v50 = vpop.f32.mrb[83].mxu0  ;;  %2671 = vst [vmem:[#allocation3 + $0x120] sm:$0x1] %v2670_v46  ;;  %v8952_v3 = vld [vmem:[#allocation24_spill] sm:$0xff] }
 0x204   : > { %v7932_v33 = vadd.f32 %v7769_v49, %v1401_v9  ;;  %v1404_v4 = vadd.f32 %v7781_v5, %v1403_v50  ;;  %v2675_v50 = vld [vmem:[#allocation3 + $0x150] sm:$0x1] }
 0x205   : > { %v7936_v43 = vadd.f32 %v7783_v28, %v1412_v16  ;;  %v2676_v46 = vsel %vm7173_vm2, 0, %v2675_v50 }
 0x206   : > { %v7939_v41 = vadd.f32 %v7773_v40, %v1404_v4  ;;  %v8954_v4 = vld [vmem:[#allocation20_spill] sm:$0xff]  ;;  %2677 = vst [vmem:[#allocation3 + $0x150] sm:$0x1] %v2676_v46  ;;  %v8012_v46 = vld [vmem:[%s8886_s2] ss:$0 sm:$0xff] }
 0x208   : > { %v5970_v56 = vpop.f32.mrb[84].mxu0 }
 0x209   : > { %v1425_v10 = vadd.f32 %v5970_v56, %v7805_v42  ;;  %v1416_v0 = vpop.f32.mrb[85].mxu0  ;;  %v8944_v42 = vld [vmem:[#allocation17_spill] sm:$0xff]  ;;  %v6727_v56 = vld [vmem:[#allocation9 + $0x40] sm:$0xff]  }
 0x20a   : > { %v1417_v49 = vadd.f32 %v7795_v55, %v1416_v0  ;;  %v5971_v23 = vpop.f32.mrb[86].mxu0  ;;  %v2673_v55 = vsel %vm7173_vm2, 0, %v2672_v24  ;;  %5660 = vmatprep.subr.bf16.mxu0 %v6727_v56  ;;  %v2681_v56 = vld [vmem:[#allocation3 + $0x180] sm:$0x1] }
 0x20b   : > { %v7946_v5 = vadd.f32 %v7797_v26, %v1425_v10  ;;  %v1428_v28 = vadd.f32 %v5971_v23, %v7809_v22  ;;  %v1419_v53 = vpop.f32.mrb[87].mxu0  ;;  %2674 = vst [vmem:[#allocation3 + $0x138] sm:$0x1] %v2673_v55 }
 0x20c   : > { %v7950_v40 = vadd.f32 %v7787_v30, %v1417_v49  ;;  %v1420_v47 = vadd.f32 %v7799_v34, %v1419_v53 }
 0x20d   : > { %v7954_v45 = vadd.f32 %v8943_v61, %v1428_v28 }
 0x20e   : > { %v7957_v13 = vadd.f32 %v8944_v42, %v1420_v47 }
 0x210   : > { %v5974_v26 = vpop.f32.mrb[88].mxu0 }
 0x211   : > { %v1441_v22 = vadd.f32 %v5974_v26, %v8945_v37  ;;  %v1432_v19 = vpop.f32.mrb[89].mxu0  ;;  %v8956_v37 = vld [vmem:[#allocation26_spill] sm:$0xff] }
 0x212   : > { %v1433_v30 = vadd.f32 %v8946_v35, %v1432_v19  ;;  %v5975_v62 = vpop.f32.mrb[90].mxu0  ;;  %v8958_v35 = vld [vmem:[#allocation29_spill] sm:$0xff] }
 0x213   : > { %v7964_v34 = vadd.f32 %v8947_v8, %v1441_v22  ;;  %v1444_v6 = vadd.f32 %v5975_v62, %v8949_v59  ;;  %v1435_v48 = vpop.f32.mrb[91].mxu0  ;;  %v8960_v62 = vld [vmem:[#allocation28_spill] sm:$0xff]  ;;  %v7999_v59 = vld [vmem:[#allocation9 + $0x80] sm:$0xff]  }
 0x214   : > { %v7968_v44 = vadd.f32 %v8950_v14, %v1433_v30  ;;  %v1436_v9 = vadd.f32 %v8951_v60, %v1435_v48  ;;  %v2678_v30 = vld [vmem:[#allocation3 + $0x168] sm:$0x1]  ;;  %6124 = vmatprep.subr.bf16.mxu1 %v7999_v59 }
 0x215   : > { %8948 = vst [vmem:[#allocation18_spill] sm:$0xff] %v7964_v34  ;;  %v7972_v16 = vadd.f32 %v8952_v3, %v1444_v6 }
 0x216   : > { %v7975_v17 = vadd.f32 %v8954_v4, %v1436_v9 }
 0x217   : > { %8953 = vst [vmem:[#allocation17_spill] sm:$0xff] %v7972_v16 }
 0x218   : > { %v5978_v10 = vpop.f32.mrb[92].mxu0 }
 0x219   : > { %v1457_v49 = vadd.f32 %v5978_v10, %v7847_v36  ;;  %v1448_v23 = vpop.f32.mrb[93].mxu0 }
 0x21a   : > { %v1449_v53 = vadd.f32 %v7837_v52, %v1448_v23  ;;  %v5979_v47 = vpop.f32.mrb[94].mxu0  ;;  %v2682_v23 = vsel %vm7173_vm2, 0, %v2681_v56 }
 0x21b   : > { %v7982_v24 = vadd.f32 %v7839_v38, %v1457_v49  ;;  %v1460_v42 = vadd.f32 %v5979_v47, %v7849_v29  ;;  %v1451_v55 = vpop.f32.mrb[95].mxu0  ;;  %v2679_v38 = vsel %vm7173_vm2, 0, %v2678_v30  ;;  %2683 = vst [vmem:[#allocation3 + $0x180] sm:$0x1] %v2682_v23 }
 0x21c   : > { %v7986_v22 = vadd.f32 %v8956_v37, %v1449_v53  ;;  %v1452_v19 = vadd.f32 %v7841_v51, %v1451_v55  ;;  %2680 = vst [vmem:[#allocation3 + $0x168] sm:$0x1] %v2679_v38 }
 0x21d   : > { %8955 = vst [vmem:[#allocation25_spill] sm:$0xff] %v7982_v24  ;;  %v7990_v36 = vadd.f32 %v8958_v35, %v1460_v42 }
 0x21e   : > { %8957 = vst [vmem:[#allocation21_spill] sm:$0xff] %v7986_v22  ;;  %v7993_v52 = vadd.f32 %v8960_v62, %v1452_v19 }
 0x21f   : > { %8959 = vst [vmem:[#allocation22_spill] sm:$0xff] %v7990_v36 }
 0x220   : > { %8961 = vst [vmem:[#allocation27_spill] sm:$0xff] %v7993_v52  ;;  %v5404_v8 = vpop.f32.mrb[96].mxu0 }
 0x221   : > { %v5405_v6 = vpop.f32.mrb[97].mxu0 }
 0x222   : > { %v6046_v0 = vpop.f32.mrb[64].mxu1  ;;  %v5406_v51 = vadd.f32 %v5405_v6, %v5404_v8  ;;  %v5407_v14 = vpop.f32.mrb[98].mxu0 }
 0x223   : > { %v2366_v28 = vpop.f32.mrb[65].mxu1  ;;  %v5408_v9 = vpop.f32.mrb[99].mxu0 }
 0x224   : > { %v6047_v61 = vpop.f32.mrb[66].mxu1  ;;  %v6226_v50 = vadd.f32 %v5406_v51, %v7860_v11  ;;  %v5409_v4 = vadd.f32 %v5408_v9, %v5407_v14 }
 0x225   : > { %v2369_v26 = vpop.f32.mrb[67].mxu1 }
 0x226   : > { %v6227_v10 = vadd.f32 %v6226_v50, %v2366_v28  ;;  %v6234_v49 = vadd.f32 %v5409_v4, %v7867_v57 }
 0x228   : > { %v2532_v53 = vadd.f32 %v6227_v10, %v8012_v46  ;;  %v6235_v47 = vadd.f32 %v6234_v49, %v2369_v26  ;;  %v5410_v42 = vpop.f32.mrb[100].mxu0 }
 0x229   : > { %v5411_v11 = vpop.f32.mrb[101].mxu0 }
 0x22a   : > { %v7997_v29 = vpop.f32.mrb[68].mxu1  ;;  %v2533_v19 = vadd.f32 %v6235_v47, %v8012_v46  ;;  %v5412_v35 = vadd.f32 %v5411_v11, %v5410_v42  ;;  %v5413_v30 = vpop.f32.mrb[102].mxu0  ;;  %v2564_v25 = vmax.f32 %v2532_v53, 0.0 }
 0x22b   : > { %v8001_v48 = vpop.f32.mrb[69].mxu1  ;;  %v5414_v57 = vpop.f32.mrb[103].mxu0 }
 0x22c   : > { %v8003_v60 = vpop.f32.mrb[70].mxu1  ;;  %v2565_v38 = vmax.f32 %v2533_v19, 0.0  ;;  %v6222_v8 = vadd.f32 %v5412_v35, %v7856_v1  ;;  %v5415_v26 = vadd.f32 %v5414_v57, %v5413_v30  ;;  %v2908_v19 = vld [vmem:[#allocation3 + $0x28] sm:$0xff] }
 0x22d   : > { %v8006_v3 = vpop.f32.mrb[71].mxu1 }
 0x22e   : > { %v2596_v6 = vpack.c.bf16 %v2565_v38, %v2564_v25  ;;  %v6223_v51 = vadd.f32 %v6222_v8, %v6046_v0  ;;  %v6230_v14 = vadd.f32 %v5415_v26, %v7864_v18  ;;  %v2812_v18 = vld [vmem:[#allocation3 + $0x18] sm:$0xff] }
 0x230   : > { %2620 = vst [vmem:[#allocation3 + $0x20] sm:$0xff] %v2596_v6  ;;  %v2685_v9 = vshrl.u32 %v2596_v6, 16  ;;  %v2688_v50 = vshll.u32 %v2596_v6, 16  ;;  %v2534_v4 = vadd.f32 %v6223_v51, %v8012_v46  ;;  %v6231_v56 = vadd.f32 %v6230_v14, %v6047_v61  ;;  %v5416_v10 = vpop.f32.mrb[104].mxu0  ;;  %3373 = vmatprep.mubr.bf16.mxu0 %v2596_v6  ;;  %v6728_v6 = vld [vmem:[#allocation9] sm:$0xff]   ;;  %v6730_v14 = vld [vmem:[#allocation9 + $0x48] sm:$0xff]  }
 0x231   : > { %v5417_v23 = vpop.f32.mrb[105].mxu0 }
 0x232   : > { %v8018_v55 = vpop.f32.mrb[72].mxu1  ;;  %v2687_v47 = vrot.slane %v2685_v9, 7  ;;  %v2860_v1 = vrot.slane %v2688_v50, 1  ;;  %v2535_v42 = vadd.f32 %v6231_v56, %v8012_v46  ;;  %v5419_v0 = vpop.f32.mrb[106].mxu0  ;;  %v2566_v35 = vmax.f32 %v2534_v4, 0.0 }
 0x233   : > { %v8020_v37 = vpop.f32.mrb[73].mxu1  ;;  %v5418_v30 = vadd.f32 %v5417_v23, %v5416_v10  ;;  %v5420_v57 = vpop.f32.mrb[107].mxu0 }
 0x234   : > { %v8023_v28 = vpop.f32.mrb[74].mxu1  ;;  %v2690_v25 = vor.u32 %v2688_v50, %v2687_v47  ;;  %v2861_v38 = vor.u32 %v2860_v1, %v2685_v9  ;;  %v2567_v8 = vmax.f32 %v2535_v42, 0.0  ;;  %v5421_v26 = vadd.f32 %v5420_v57, %v5419_v0  ;;  %v6731_v1 = vld [vmem:[#allocation9 + $0x8] sm:$0xff]   ;;  %v2911_v57 = vld [vmem:[#allocation3 + $0x40] sm:$0xff] }
 0x235   : > { %v8025_v62 = vpop.f32.mrb[75].mxu1  ;;  %v6242_v51 = vadd.f32 %v5418_v30, %v7878_v2 }
 0x236   : > { %v2813_v56 = vsel %vm7214_vm5, %v2690_v25, %v2812_v18  ;;  %v2909_v52 = vsel %vm7432_vm7, %v2861_v38, %v2908_v19  ;;  %v2597_v22 = vpack.c.bf16 %v2567_v8, %v2566_v35  ;;  %v6250_v4 = vadd.f32 %v5421_v26, %v7885_v12 }
 0x237   : > { %2814 = vst [vmem:[#allocation3 + $0x18] sm:$0xff] %v2813_v56  ;;  %2910 = vst [vmem:[#allocation3 + $0x28] sm:$0xff] %v2909_v52  ;;  %v6243_v50 = vadd.f32 %v6242_v51, %v8001_v48  ;;  %3374 = vmatmul.mubr.bf16.vlgmr.msra.gmra.mrb[160].mxu0 %v2813_v56  ;;  %v6732_v52 = vld [vmem:[#allocation9 + $0x50] sm:$0xff]  }
 0x238   : > { %2621 = vst [vmem:[#allocation3 + $0x38] sm:$0xff] %v2597_v22  ;;  %v2692_v9 = vshrl.u32 %v2597_v22, 16  ;;  %v2695_v10 = vshll.u32 %v2597_v22, 16  ;;  %v6251_v2 = vadd.f32 %v6250_v4, %v8006_v3  ;;  %v5422_v23 = vpop.f32.mrb[108].mxu0  ;;  %3381 = vmatprep.mubr.bf16.mxu0 %v2597_v22  ;;  %5661 = vmatpush3.bf16.msra.mxu0 %v6728_v6  ;;  %v2815_v22 = vld [vmem:[#allocation3 + $0x30] sm:$0xff]  ;;  %v6733_v56 = vld [vmem:[#allocation9 + $0x10] sm:$0xff]  }
 0x239   : > { %v2536_v42 = vadd.f32 %v6243_v50, %v8012_v46  ;;  %v5423_v0 = vpop.f32.mrb[109].mxu0  ;;  %5662 = vmatprep.subr.bf16.mxu0 %v6730_v14  ;;  %v6735_v50 = vld [vmem:[#allocation9 + $0x58] sm:$0xff]  }
 0x23a   : > { %v8030_v49 = vpop.f32.mrb[76].mxu1  ;;  %v2694_v48 = vrot.slane %v2692_v9, 7  ;;  %v2862_v18 = vrot.slane %v2695_v10, 1  ;;  %v2537_v19 = vadd.f32 %v6251_v2, %v8012_v46  ;;  %v5424_v35 = vadd.f32 %v5423_v0, %v5422_v23  ;;  %v5425_v30 = vpop.f32.mrb[110].mxu0 }
 0x23b   : > { %v8032_v53 = vpop.f32.mrb[77].mxu1  ;;  %v2568_v25 = vmax.f32 %v2536_v42, 0.0  ;;  %v5426_v38 = vpop.f32.mrb[111].mxu0 }
 0x23c   : > { %v8035_v11 = vpop.f32.mrb[78].mxu1  ;;  %v2697_v26 = vor.u32 %v2695_v10, %v2694_v48  ;;  %v2863_v6 = vor.u32 %v2862_v18, %v2692_v9  ;;  %v2569_v51 = vmax.f32 %v2537_v19, 0.0  ;;  %v6238_v14 = vadd.f32 %v5424_v35, %v7874_v63  ;;  %5663 = vmatpush3.bf16.msra.mxu0 %v6731_v1  ;;  %v6736_v19 = vld [vmem:[#allocation9 + $0x18] sm:$0xff]   ;;  %v6749_v10 = vld [vmem:[#allocation9 + $0x180] sm:$0xff]  }
 0x23d   : > { %v8037_v61 = vpop.f32.mrb[79].mxu1  ;;  %v5427_v4 = vadd.f32 %v5426_v38, %v5425_v30  ;;  %5664 = vmatprep.subr.bf16.mxu0 %v6732_v52 }
 0x23e   : > { %v2956_v2 = vld [vmem:[#allocation3 + $0x28] sm:$0x80]  ;;  %v2816_v23 = vsel %vm7214_vm5, %v2697_v26, %v2815_v22  ;;  %v2912_v42 = vsel %vm7432_vm7, %v2863_v6, %v2911_v57  ;;  %v2598_v0 = vpack.c.bf16 %v2569_v51, %v2568_v25  ;;  %v6239_v16 = vadd.f32 %v6238_v14, %v7997_v29  ;;  %v2914_v14 = vld [vmem:[#allocation3 + $0x58] sm:$0xff] }
 0x23f   : > { %v2957_v9 = vsel %vm7515_vm10, 0, %v2956_v2  ;;  %2817 = vst [vmem:[#allocation3 + $0x30] sm:$0xff] %v2816_v23  ;;  %2913 = vst [vmem:[#allocation3 + $0x40] sm:$0xff] %v2912_v42  ;;  %v6246_v63 = vadd.f32 %v5427_v4, %v7882_v54  ;;  %3382 = vmatmul.mubr.bf16.gmra.mrb[164].mxu0 %v2816_v23  ;;  %v6737_v54 = vld [vmem:[#allocation9 + $0x60] sm:$0xff]   ;;  %v2818_v51 = vld [vmem:[#allocation3 + $0x48] sm:$0xff] }
 0x240   : > { %2958 = vst [vmem:[#allocation3 + $0x28] sm:$0x80] %v2957_v9  ;;  %2622 = vst [vmem:[#allocation3 + $0x50] sm:$0xff] %v2598_v0  ;;  %v2699_v1 = vshrl.u32 %v2598_v0, 16  ;;  %v2702_v52 = vshll.u32 %v2598_v0, 16  ;;  %v5428_v48 = vpop.f32.mrb[112].mxu0  ;;  %3389 = vmatprep.mubr.bf16.mxu0 %v2598_v0  ;;  %5665 = vmatpush3.bf16.msra.mxu0 %v6733_v56  ;;  %v2538_v29 = vadd.f32 %v6239_v16, %v8012_v46 }
 0x241   : > { %v6247_v35 = vadd.f32 %v6246_v63, %v8003_v60  ;;  %v5429_v30 = vpop.f32.mrb[113].mxu0  ;;  %5666 = vmatprep.subr.bf16.mxu0 %v6735_v50  ;;  %v6738_v50 = vld [vmem:[#allocation9 + $0x20] sm:$0xff]   ;;  %v6740_v63 = vld [vmem:[#allocation9 + $0x68] sm:$0xff]  }
 0x242   : > { %v8047_v47 = vpop.f32.mrb[80].mxu1  ;;  %v2701_v57 = vrot.slane %v2699_v1, 7  ;;  %v2864_v25 = vrot.slane %v2702_v52, 1  ;;  %v5430_v38 = vadd.f32 %v5429_v30, %v5428_v48  ;;  %v5431_v26 = vpop.f32.mrb[114].mxu0  ;;  %v2570_v0 = vmax.f32 %v2538_v29, 0.0 }
 0x243   : > { %v8050_v12 = vpop.f32.mrb[81].mxu1  ;;  %v2539_v56 = vadd.f32 %v6247_v35, %v8012_v46  ;;  %v5432_v4 = vpop.f32.mrb[115].mxu0 }
 0x244   : > { %v8053_v3 = vpop.f32.mrb[82].mxu1  ;;  %v2704_v16 = vor.u32 %v2702_v52, %v2701_v57  ;;  %v2865_v60 = vor.u32 %v2864_v25, %v2699_v1  ;;  %v6258_v23 = vadd.f32 %v5430_v38, %v7896_v15  ;;  %v5433_v42 = vadd.f32 %v5432_v4, %v5431_v26  ;;  %5667 = vmatpush3.bf16.msra.mxu0 %v6736_v19 }
 0x245   : > { %v8055_v8 = vpop.f32.mrb[83].mxu1  ;;  %v2571_v9 = vmax.f32 %v2539_v56, 0.0  ;;  %5668 = vmatprep.subr.bf16.mxu0 %v6737_v54 }
 0x246   : > { %v2959_v48 = vld [vmem:[#allocation3 + $0x40] sm:$0x80]  ;;  %v2819_v30 = vsel %vm7214_vm5, %v2704_v16, %v2818_v51  ;;  %v2915_v35 = vsel %vm7432_vm7, %v2865_v60, %v2914_v14  ;;  %v6259_v34 = vadd.f32 %v6258_v23, %v8020_v37  ;;  %v6266_v1 = vadd.f32 %v5433_v42, %v7903_v20  ;;  %v6741_v37 = vld [vmem:[#allocation9 + $0x28] sm:$0xff]  }
 0x247   : > { %v2960_v15 = vsel %vm7515_vm10, 0, %v2959_v48  ;;  %2820 = vst [vmem:[#allocation3 + $0x48] sm:$0xff] %v2819_v30  ;;  %2916 = vst [vmem:[#allocation3 + $0x58] sm:$0xff] %v2915_v35  ;;  %v2599_v52 = vpack.c.bf16 %v2571_v9, %v2570_v0  ;;  %v3102_v19 = vld [vmem:[#allocation3 + $0x28] sm:$0xff]  ;;  %3390 = vmatmul.mubr.bf16.gmra.mrb[168].mxu0 %v2819_v30  ;;  %v6742_v14 = vld [vmem:[#allocation9 + $0x70] sm:$0xff]  }
 0x248   : > { %2961 = vst [vmem:[#allocation3 + $0x40] sm:$0x80] %v2960_v15  ;;  %v2540_v29 = vadd.f32 %v6259_v34, %v8012_v46  ;;  %v6267_v54 = vadd.f32 %v6266_v1, %v8025_v62  ;;  %v5434_v57 = vpop.f32.mrb[116].mxu0  ;;  %6092 = vmatprep.mubr.bf16.mxu1 %v3102_v19  ;;  %5669 = vmatpush3.bf16.msra.mxu0 %v6738_v50  ;;  %v2821_v50 = vld [vmem:[#allocation3 + $0x60] sm:$0xff]  ;;  %v2917_v0 = vld [vmem:[#allocation3 + $0x70] sm:$0xff] }
 0x249   : > { %2623 = vst [vmem:[#allocation3 + $0x68] sm:$0xff] %v2599_v52  ;;  %v2706_v20 = vshrl.u32 %v2599_v52, 16  ;;  %v2709_v38 = vshll.u32 %v2599_v52, 16  ;;  %v5435_v26 = vpop.f32.mrb[117].mxu0  ;;  %3397 = vmatprep.mubr.bf16.mxu0 %v2599_v52  ;;  %5670 = vmatprep.subr.bf16.mxu0 %v6740_v63 }
 0x24a   : > { %v8066_v18 = vpop.f32.mrb[84].mxu1  ;;  %v2541_v56 = vadd.f32 %v6267_v54, %v8012_v46  ;;  %v5436_v34 = vadd.f32 %v5435_v26, %v5434_v57  ;;  %v5437_v4 = vpop.f32.mrb[118].mxu0  ;;  %v2572_v9 = vmax.f32 %v2540_v29, 0.0  ;;  %v6725_v57 = vld [vmem:[#allocation9 + $0x88] sm:$0xff]   ;;  %v6743_v26 = vld [vmem:[#allocation9 + $0x30] sm:$0xff]  }
 0x24b   : > { %v8070_v22 = vpop.f32.mrb[85].mxu1  ;;  %v2708_v16 = vrot.slane %v2706_v20, 7  ;;  %v2866_v60 = vrot.slane %v2709_v38, 1  ;;  %v5438_v23 = vpop.f32.mrb[119].mxu0 }
 0x24c   : > { %v8072_v6 = vpop.f32.mrb[86].mxu1  ;;  %v2573_v48 = vmax.f32 %v2541_v56, 0.0  ;;  %v6254_v30 = vadd.f32 %v5436_v34, %v7892_v39  ;;  %v5439_v35 = vadd.f32 %v5438_v23, %v5437_v4  ;;  %5671 = vmatpush3.bf16.msra.mxu0 %v6741_v37 }
 0x24d   : > { %v8075_v2 = vpop.f32.mrb[87].mxu1  ;;  %v2711_v63 = vor.u32 %v2709_v38, %v2708_v16  ;;  %v2867_v1 = vor.u32 %v2866_v60, %v2706_v20  ;;  %5672 = vmatprep.subr.bf16.mxu0 %v6742_v14  ;;  %v6745_v20 = vld [vmem:[#allocation9 + $0x78] sm:$0xff]  }
 0x24e   : > { %v2962_v15 = vld [vmem:[#allocation3 + $0x58] sm:$0x80]  ;;  %v2600_v52 = vpack.c.bf16 %v2573_v48, %v2572_v9  ;;  %v6255_v19 = vadd.f32 %v6254_v30, %v8018_v55  ;;  %v6262_v54 = vadd.f32 %v5439_v35, %v7900_v31  ;;  %v2920_v48 = vld [vmem:[#allocation3 + $0x88] sm:$0xff] }
 0x24f   : > { %v2822_v29 = vsel %vm7214_vm5, %v2711_v63, %v2821_v50  ;;  %v2918_v39 = vsel %vm7432_vm7, %v2867_v1, %v2917_v0  ;;  %v3105_v37 = vld [vmem:[#allocation3 + $0x40] sm:$0xff]  ;;  %v2824_v9 = vld [vmem:[#allocation3 + $0x78] sm:$0xff] }
 0x250   : > { %2823 = vst [vmem:[#allocation3 + $0x60] sm:$0xff] %v2822_v29  ;;  %2919 = vst [vmem:[#allocation3 + $0x70] sm:$0xff] %v2918_v39  ;;  %v2713_v55 = vshrl.u32 %v2600_v52, 16  ;;  %v2716_v38 = vshll.u32 %v2600_v52, 16  ;;  %v2542_v31 = vadd.f32 %v6255_v19, %v8012_v46  ;;  %v6263_v14 = vadd.f32 %v6262_v54, %v8023_v28  ;;  %v5440_v56 = vpop.f32.mrb[120].mxu0  ;;  %6093 = vmatmul.mubr.bf16.vlgmr.msra.gmra.mrb[96].mxu1 %v3105_v37  ;;  %v6726_v28 = vld [vmem:[#allocation9 + $0x90] sm:$0xff]  }
 0x251   : > { %2624 = vst [vmem:[#allocation3 + $0x80] sm:$0xff] %v2600_v52  ;;  %3398 = vmatmul.mubr.bf16.gmra.mrb[172].mxu0 %v2822_v29  ;;  %v5441_v4 = vpop.f32.mrb[121].mxu0  ;;  %6125 = vmatpush3.bf16.msra.mxu1 %v7999_v59 }
 0x252   : > { %v8088_v25 = vpop.f32.mrb[88].mxu1  ;;  %3405 = vmatprep.mubr.bf16.mxu0 %v2600_v52  ;;  %v2868_v60 = vrot.slane %v2716_v38, 1  ;;  %v2543_v23 = vadd.f32 %v6263_v14, %v8012_v46  ;;  %v5443_v50 = vpop.f32.mrb[122].mxu0  ;;  %6126 = vmatprep.subr.bf16.mxu1 %v6725_v57  ;;  %v2574_v30 = vmax.f32 %v2542_v31, 0.0  ;;  %v5442_v35 = vadd.f32 %v5441_v4, %v5440_v56  ;;  %v6729_v14 = vld [vmem:[#allocation9 + $0x98] sm:$0xff]  }
 0x253   : > { %v8090_v51 = vpop.f32.mrb[89].mxu1  ;;  %5673 = vmatpush3.bf16.msra.mxu0 %v6743_v26  ;;  %v5444_v63 = vpop.f32.mrb[123].mxu0 }
 0x254   : > { %v8093_v62 = vpop.f32.mrb[90].mxu1  ;;  %5674 = vmatprep.subr.bf16.mxu0 %v6745_v20  ;;  %v2869_v52 = vor.u32 %v2868_v60, %v2713_v55  ;;  %v2575_v19 = vmax.f32 %v2543_v23, 0.0  ;;  %v5445_v54 = vadd.f32 %v5444_v63, %v5443_v50  ;;  %v6274_v29 = vadd.f32 %v5442_v35, %v7914_v21  ;;  %v2827_v35 = vld [vmem:[#allocation3 + $0x90] sm:$0xff]  ;;  %v2923_v63 = vld [vmem:[#allocation3 + $0xa0] sm:$0xff] }
 0x255   : > { %8965 = vst [vmem:[#allocation19_spill] sm:$0xff] %v8093_v62  ;;  %v8095_v42 = vpop.f32.mrb[91].mxu1  ;;  %v2963_v62 = vsel %vm7515_vm10, 0, %v2962_v15  ;;  %v6746_v15 = vld [vmem:[#allocation9 + $0x38] sm:$0xff]   ;;  %6127 = vmatpush3.bf16.msra.mxu1 %v6725_v57 }
 0x256   : > { %2964 = vst [vmem:[#allocation3 + $0x58] sm:$0x80] %v2963_v62  ;;  %v2715_v62 = vrot.slane %v2713_v55, 7  ;;  %v2921_v26 = vsel %vm7432_vm7, %v2869_v52, %v2920_v48  ;;  %v2601_v37 = vpack.c.bf16 %v2575_v19, %v2574_v30  ;;  %v6282_v31 = vadd.f32 %v5445_v54, %v7921_v27  ;;  %6128 = vmatprep.subr.bf16.mxu1 %v6726_v28  ;;  %v6734_v30 = vld [vmem:[#allocation9 + $0xa0] sm:$0xff]  }
 0x257   : > { %v2965_v20 = vld [vmem:[#allocation3 + $0x70] sm:$0x80]  ;;  %2922 = vst [vmem:[#allocation3 + $0x88] sm:$0xff] %v2921_v26  ;;  %v6275_v55 = vadd.f32 %v6274_v29, %v8032_v53  ;;  %5675 = vmatpush3.bf16.msra.mxu0 %v6746_v15 }
 0x258   : > { %v2718_v59 = vor.u32 %v2716_v38, %v2715_v62  ;;  %v2966_v21 = vsel %vm7515_vm10, 0, %v2965_v20  ;;  %2625 = vst [vmem:[#allocation3 + $0x98] sm:$0xff] %v2601_v37  ;;  %v2720_v57 = vshrl.u32 %v2601_v37, 16  ;;  %v2723_v56 = vshll.u32 %v2601_v37, 16  ;;  %v5446_v62 = vpop.f32.mrb[124].mxu0 }
 0x259   : > { %v6283_v4 = vadd.f32 %v6282_v31, %v8037_v61  ;;  %2967 = vst [vmem:[#allocation3 + $0x70] sm:$0x80] %v2966_v21  ;;  %v2544_v27 = vadd.f32 %v6275_v55, %v8012_v46  ;;  %v5447_v60 = vpop.f32.mrb[125].mxu0  ;;  %6129 = vmatpush3.bf16.msra.mxu1 %v6726_v28  ;;  %v6739_v55 = vld [vmem:[#allocation9 + $0xa8] sm:$0xff]  }
 0x25a   : > { %v8108_v34 = vpop.f32.mrb[92].mxu1  ;;  %v2825_v39 = vsel %vm7214_vm5, %v2718_v59, %v2824_v9  ;;  %v2722_v53 = vrot.slane %v2720_v57, 7  ;;  %v2870_v23 = vrot.slane %v2723_v56, 1  ;;  %v5448_v9 = vadd.f32 %v5447_v60, %v5446_v62  ;;  %v5449_v48 = vpop.f32.mrb[126].mxu0  ;;  %6130 = vmatprep.subr.bf16.mxu1 %v6729_v14 }
 0x25b   : > { %v8110_v16 = vpop.f32.mrb[93].mxu1  ;;  %2826 = vst [vmem:[#allocation3 + $0x78] sm:$0xff] %v2825_v39  ;;  %3406 = vmatmul.mubr.bf16.gmra.mrb[176].mxu0 %v2825_v39  ;;  %v2545_v50 = vadd.f32 %v6283_v4, %v8012_v46  ;;  %v2576_v61 = vmax.f32 %v2544_v27, 0.0  ;;  %v5450_v15 = vpop.f32.mrb[127].mxu0 }
 0x25c   : > { %v8114_v0 = vpop.f32.mrb[94].mxu1  ;;  %3413 = vmatprep.mubr.bf16.mxu0 %v2601_v37  ;;  %v2725_v59 = vor.u32 %v2723_v56, %v2722_v53  ;;  %v2871_v52 = vor.u32 %v2870_v23, %v2720_v57  ;;  %v6270_v54 = vadd.f32 %v5448_v9, %v7910_v58  ;;  %v5451_v29 = vadd.f32 %v5450_v15, %v5449_v48  ;;  %v2830_v53 = vld [vmem:[#allocation3 + $0xa8] sm:$0xff]  ;;  %v2926_v23 = vld [vmem:[#allocation3 + $0xb8] sm:$0xff]  ;;  %v6744_v48 = vld [vmem:[#allocation9 + $0xb0] sm:$0xff]  }
 0x25d   : > { %v8116_v1 = vpop.f32.mrb[95].mxu1  ;;  %v3108_v38 = vld [vmem:[#allocation3 + $0x58] sm:$0xff]  ;;  %v2577_v19 = vmax.f32 %v2545_v50, 0.0  ;;  %6131 = vmatpush3.bf16.msra.mxu1 %v6729_v14 }
 0x25e   : > { %6096 = vmatprep.mubr.bf16.mxu1 %v3108_v38  ;;  %v2968_v28 = vld [vmem:[#allocation3 + $0x88] sm:$0x80]  ;;  %v2828_v39 = vsel %vm7214_vm5, %v2725_v59, %v2827_v35  ;;  %v2924_v26 = vsel %vm7432_vm7, %v2871_v52, %v2923_v63  ;;  %v6271_v31 = vadd.f32 %v6270_v54, %v8030_v49  ;;  %6132 = vmatprep.subr.bf16.mxu1 %v6734_v30 }
 0x25f   : > { %v2602_v37 = vpack.c.bf16 %v2577_v19, %v2576_v61  ;;  %v2969_v20 = vsel %vm7515_vm10, 0, %v2968_v28  ;;  %2829 = vst [vmem:[#allocation3 + $0x90] sm:$0xff] %v2828_v39  ;;  %2925 = vst [vmem:[#allocation3 + $0xa0] sm:$0xff] %v2924_v26  ;;  %v6278_v58 = vadd.f32 %v5451_v29, %v7918_v32  ;;  %v6747_v26 = vld [vmem:[#allocation9 + $0xb8] sm:$0xff]  }
 0x260   : > { %2970 = vst [vmem:[#allocation3 + $0x88] sm:$0x80] %v2969_v20  ;;  %v5452_v21 = vpop.f32.mrb[128].mxu0  ;;  %v8139_v57 = vld [vmem:[#allocation3 + $0x70] sm:$0xff]  ;;  %v2546_v56 = vadd.f32 %v6271_v31, %v8012_v46 }
 0x261   : > { %2626 = vst [vmem:[#allocation3 + $0xb0] sm:$0xff] %v2602_v37  ;;  %v2727_v14 = vshrl.u32 %v2602_v37, 16  ;;  %v2730_v38 = vshll.u32 %v2602_v37, 16  ;;  %v6279_v49 = vadd.f32 %v6278_v58, %v8035_v11  ;;  %6097 = vmatmul.mubr.bf16.gmra.mrb[100].mxu1 %v8139_v57  ;;  %v5453_v4 = vpop.f32.mrb[129].mxu0 }
 0x262   : > { %v5454_v32 = vadd.f32 %v5453_v4, %v5452_v21  ;;  %v5455_v60 = vpop.f32.mrb[130].mxu0  ;;  %6133 = vmatpush3.bf16.msra.mxu1 %v6734_v30  ;;  %v2578_v15 = vmax.f32 %v2546_v56, 0.0  ;;  %v6748_v4 = vld [vmem:[#allocation9 + $0x1c0] sm:$0xff]  }
 0x263   : > { %3414 = vmatmul.mubr.bf16.gmra.mrb[180].mxu0 %v2828_v39  ;;  %v2729_v62 = vrot.slane %v2727_v14, 7  ;;  %v2872_v27 = vrot.slane %v2730_v38, 1  ;;  %v2547_v50 = vadd.f32 %v6279_v49, %v8012_v46  ;;  %v5456_v9 = vpop.f32.mrb[131].mxu0  ;;  %6134 = vmatprep.subr.bf16.mxu1 %v6739_v55 }
 0x264   : > { %3421 = vmatprep.mubr.bf16.mxu0 %v2602_v37  ;;  %v6290_v11 = vadd.f32 %v5454_v32, %v7932_v33  ;;  %v5457_v61 = vadd.f32 %v5456_v9, %v5455_v60 }
 0x265   : > { %v2732_v35 = vor.u32 %v2730_v38, %v2729_v62  ;;  %v2873_v63 = vor.u32 %v2872_v27, %v2727_v14  ;;  %v2579_v59 = vmax.f32 %v2547_v50, 0.0  ;;  %v2929_v62 = vld [vmem:[#allocation3 + $0xd0] sm:$0xff] }
 0x266   : > { %v2971_v52 = vld [vmem:[#allocation3 + $0xa0] sm:$0x80]  ;;  %v6291_v54 = vadd.f32 %v6290_v11, %v8050_v12  ;;  %v6298_v29 = vadd.f32 %v5457_v61, %v7939_v41  ;;  %6135 = vmatpush3.bf16.msra.mxu1 %v6739_v55 }
 0x267   : > { %v2831_v19 = vsel %vm7214_vm5, %v2732_v35, %v2830_v53  ;;  %v2927_v30 = vsel %vm7432_vm7, %v2873_v63, %v2926_v23  ;;  %v2972_v28 = vsel %vm7515_vm10, 0, %v2971_v52  ;;  %v2603_v33 = vpack.c.bf16 %v2579_v59, %v2578_v15  ;;  %v8154_v39 = vld [vmem:[#allocation3 + $0x88] sm:$0xff]  ;;  %6136 = vmatprep.subr.bf16.mxu1 %v6744_v48 }
 0x268   : > { %2832 = vst [vmem:[#allocation3 + $0xa8] sm:$0xff] %v2831_v19  ;;  %2928 = vst [vmem:[#allocation3 + $0xb8] sm:$0xff] %v2927_v30  ;;  %v2548_v37 = vadd.f32 %v6291_v54, %v8012_v46  ;;  %v6299_v31 = vadd.f32 %v6298_v29, %v8055_v8  ;;  %v5458_v20 = vpop.f32.mrb[132].mxu0  ;;  %6100 = vmatprep.mubr.bf16.mxu1 %v8154_v39  ;;  %v2833_v8 = vld [vmem:[#allocation3 + $0xc0] sm:$0xff] }
 0x269   : > { %2973 = vst [vmem:[#allocation3 + $0xa0] sm:$0x80] %v2972_v28  ;;  %2627 = vst [vmem:[#allocation3 + $0xc8] sm:$0xff] %v2603_v33  ;;  %v2734_v41 = vshrl.u32 %v2603_v33, 16  ;;  %v2737_v12 = vshll.u32 %v2603_v33, 16  ;;  %v5459_v58 = vpop.f32.mrb[133].mxu0 }
 0x26a   : > { %v2549_v55 = vadd.f32 %v6299_v31, %v8012_v46  ;;  %v5460_v14 = vadd.f32 %v5459_v58, %v5458_v20  ;;  %v5461_v38 = vpop.f32.mrb[134].mxu0  ;;  %6137 = vmatpush3.bf16.msra.mxu1 %v6744_v48  ;;  %v2580_v27 = vmax.f32 %v2548_v37, 0.0  ;;  %v2932_v37 = vld [vmem:[#allocation3 + $0xe8] sm:$0xff] }
 0x26b   : > { %3422 = vmatmul.mubr.bf16.gmra.mrb[184].mxu0 %v2831_v19  ;;  %v2736_v21 = vrot.slane %v2734_v41, 7  ;;  %v2874_v56 = vrot.slane %v2737_v12, 1  ;;  %v5462_v49 = vpop.f32.mrb[135].mxu0  ;;  %6138 = vmatprep.subr.bf16.mxu1 %v6747_v26 }
 0x26c   : > { %3429 = vmatprep.mubr.bf16.mxu0 %v2603_v33  ;;  %v2581_v32 = vmax.f32 %v2549_v55, 0.0  ;;  %v6286_v60 = vadd.f32 %v5460_v14, %v7928_v7  ;;  %v5463_v53 = vadd.f32 %v5462_v49, %v5461_v38 }
 0x26d   : > { %v2739_v23 = vor.u32 %v2737_v12, %v2736_v21  ;;  %v2875_v50 = vor.u32 %v2874_v56, %v2734_v41 }
 0x26e   : > { %v2604_v35 = vpack.c.bf16 %v2581_v32, %v2580_v27  ;;  %v6287_v63 = vadd.f32 %v6286_v60, %v8047_v47  ;;  %v6294_v48 = vadd.f32 %v5463_v53, %v7936_v43  ;;  %6139 = vmatpush3.bf16.msra.mxu1 %v6747_v26  ;;  %v2836_v26 = vld [vmem:[#allocation3 + $0xd8] sm:$0xff] }
 0x26f   : > { %v2974_v9 = vld [vmem:[#allocation3 + $0xb8] sm:$0x80]  ;;  %v2834_v61 = vsel %vm7214_vm5, %v2739_v23, %v2833_v8  ;;  %v2930_v15 = vsel %vm7432_vm7, %v2875_v50, %v2929_v62  ;;  %5796 = vmatprep.subr.bf16.mxu1 %v6748_v4 }
 0x270   : > { %v2975_v11 = vsel %vm7515_vm10, 0, %v2974_v9  ;;  %v8169_v7 = vld [vmem:[#allocation3 + $0xa0] sm:$0xff]  ;;  %2835 = vst [vmem:[#allocation3 + $0xc0] sm:$0xff] %v2834_v61  ;;  %2931 = vst [vmem:[#allocation3 + $0xd0] sm:$0xff] %v2930_v15  ;;  %v2741_v47 = vshrl.u32 %v2604_v35, 16  ;;  %v2744_v59 = vshll.u32 %v2604_v35, 16  ;;  %v2550_v43 = vadd.f32 %v6287_v63, %v8012_v46 }
 0x271   : > { %2976 = vst [vmem:[#allocation3 + $0xb8] sm:$0x80] %v2975_v11  ;;  %2628 = vst [vmem:[#allocation3 + $0xe0] sm:$0xff] %v2604_v35  ;;  %v6295_v52 = vadd.f32 %v6294_v48, %v8053_v3  ;;  %v5464_v19 = vpop.f32.mrb[136].mxu0  ;;  %6101 = vmatmul.mubr.bf16.gmra.mrb[104].mxu1 %v8169_v7  ;;  %v2839_v48 = vld [vmem:[#allocation3 + $0xf0] sm:$0xff]  ;;  %v2935_v11 = vld [vmem:[#allocation3 + $0x100] sm:$0xff] }
 0x272   : > { %v5465_v30 = vpop.f32.mrb[137].mxu0  ;;  %v2743_v54 = vrot.slane %v2741_v47, 7  ;;  %v2876_v29 = vrot.slane %v2744_v59, 1  ;;  %v2582_v31 = vmax.f32 %v2550_v43, 0.0 }
 0x273   : > { %3430 = vmatmul.mubr.bf16.gmra.mrb[188].mxu0 %v2834_v61  ;;  %v2551_v28 = vadd.f32 %v6295_v52, %v8012_v46  ;;  %v5467_v33 = vpop.f32.mrb[138].mxu0  ;;  %v5466_v20 = vadd.f32 %v5465_v30, %v5464_v19 }
 0x274   : > { %3437 = vmatprep.mubr.bf16.mxu0 %v2604_v35  ;;  %v5468_v41 = vpop.f32.mrb[139].mxu0  ;;  %v2746_v12 = vor.u32 %v2744_v59, %v2743_v54  ;;  %v2877_v58 = vor.u32 %v2876_v29, %v2741_v47 }
 0x275   : > { %v2583_v55 = vmax.f32 %v2551_v28, 0.0  ;;  %v5469_v3 = vadd.f32 %v5468_v41, %v5467_v33  ;;  %v6306_v14 = vadd.f32 %v5466_v20, %v7950_v40 }
 0x276   : > { %v2837_v38 = vsel %vm7214_vm5, %v2746_v12, %v2836_v26  ;;  %v2933_v21 = vsel %vm7432_vm7, %v2877_v58, %v2932_v37 }
 0x277   : > { %v2605_v56 = vpack.c.bf16 %v2583_v55, %v2582_v31  ;;  %v6314_v49 = vadd.f32 %v5469_v3, %v7957_v13  ;;  %v2977_v4 = vld [vmem:[#allocation3 + $0xd0] sm:$0x80]  ;;  %2838 = vst [vmem:[#allocation3 + $0xd8] sm:$0xff] %v2837_v38  ;;  %2934 = vst [vmem:[#allocation3 + $0xe8] sm:$0xff] %v2933_v21  ;;  %v6307_v8 = vadd.f32 %v6306_v14, %v8070_v22  ;;  %v2842_v14 = vld [vmem:[#allocation3 + $0x108] sm:$0xff] }
 0x278   : > { %v8182_v62 = vld [vmem:[#allocation3 + $0xb8] sm:$0xff]  ;;  %v2978_v27 = vsel %vm7515_vm10, 0, %v2977_v4  ;;  %v5470_v53 = vpop.f32.mrb[140].mxu0 }
 0x279   : > { %2629 = vst [vmem:[#allocation3 + $0xf8] sm:$0xff] %v2605_v56  ;;  %v2748_v40 = vshrl.u32 %v2605_v56, 16  ;;  %v2751_v32 = vshll.u32 %v2605_v56, 16  ;;  %v6315_v60 = vadd.f32 %v6314_v49, %v8075_v2  ;;  %6104 = vmatprep.mubr.bf16.mxu1 %v8182_v62  ;;  %2979 = vst [vmem:[#allocation3 + $0xd0] sm:$0x80] %v2978_v27  ;;  %v2552_v13 = vadd.f32 %v6307_v8, %v8012_v46  ;;  %v5471_v23 = vpop.f32.mrb[141].mxu0 }
 0x27a   : > { %v5472_v35 = vadd.f32 %v5471_v23, %v5470_v53  ;;  %v5473_v63 = vpop.f32.mrb[142].mxu0 }
 0x27b   : > { %3438 = vmatmul.mubr.bf16.gmra.mrb[192].mxu0 %v2837_v38  ;;  %v2750_v22 = vrot.slane %v2748_v40, 7  ;;  %v2878_v50 = vrot.slane %v2751_v32, 1  ;;  %v2553_v9 = vadd.f32 %v6315_v60, %v8012_v46  ;;  %v2584_v61 = vmax.f32 %v2552_v13, 0.0  ;;  %v5474_v15 = vpop.f32.mrb[143].mxu0  ;;  %v2938_v38 = vld [vmem:[#allocation3 + $0x118] sm:$0xff] }
 0x27c   : > { %3445 = vmatprep.mubr.bf16.mxu0 %v2605_v56  ;;  %v6302_v43 = vadd.f32 %v5472_v35, %v7946_v5  ;;  %v5475_v52 = vadd.f32 %v5474_v15, %v5473_v63 }
 0x27d   : > { %v2753_v2 = vor.u32 %v2751_v32, %v2750_v22  ;;  %v2879_v47 = vor.u32 %v2878_v50, %v2748_v40  ;;  %v2585_v59 = vmax.f32 %v2553_v9, 0.0 }
 0x27e   : > { %v2980_v19 = vld [vmem:[#allocation3 + $0xe8] sm:$0x80]  ;;  %v6303_v28 = vadd.f32 %v6302_v43, %v8066_v18  ;;  %v6310_v26 = vadd.f32 %v5475_v52, %v7954_v45  ;;  %v2941_v43 = vld [vmem:[#allocation3 + $0x130] sm:$0xff] }
 0x27f   : > { %v2840_v30 = vsel %vm7214_vm5, %v2753_v2, %v2839_v48  ;;  %v2936_v54 = vsel %vm7432_vm7, %v2879_v47, %v2935_v11  ;;  %v8195_v29 = vpack.c.bf16 %v2585_v59, %v2584_v61  ;;  %v2981_v33 = vsel %vm7515_vm10, 0, %v2980_v19  ;;  %v2845_v59 = vld [vmem:[#allocation3 + $0x120] sm:$0xff] }
 0x280   : > { %2841 = vst [vmem:[#allocation3 + $0xf0] sm:$0xff] %v2840_v30  ;;  %2937 = vst [vmem:[#allocation3 + $0x100] sm:$0xff] %v2936_v54  ;;  %v5476_v31 = vpop.f32.mrb[144].mxu0  ;;  %v8204_v20 = vld [vmem:[#allocation3 + $0xd0] sm:$0xff]  ;;  %v2554_v18 = vadd.f32 %v6303_v28, %v8012_v46  ;;  %v6311_v41 = vadd.f32 %v6310_v26, %v8072_v6 }
 0x281   : > { %2982 = vst [vmem:[#allocation3 + $0xe8] sm:$0x80] %v2981_v33  ;;  %2630 = vst [vmem:[#allocation3 + $0x110] sm:$0xff] %v8195_v29  ;;  %v2755_v5 = vshrl.u32 %v8195_v29, 16  ;;  %v2758_v37 = vshll.u32 %v8195_v29, 16  ;;  %6105 = vmatmul.mubr.bf16.gmra.mrb[108].mxu1 %v8204_v20  ;;  %v5477_v12 = vpop.f32.mrb[145].mxu0 }
 0x282   : > { %v5478_v55 = vadd.f32 %v5477_v12, %v5476_v31  ;;  %v5479_v3 = vpop.f32.mrb[146].mxu0  ;;  %v2555_v21 = vadd.f32 %v6311_v41, %v8012_v46  ;;  %v2586_v6 = vmax.f32 %v2554_v18, 0.0 }
 0x283   : > { %3446 = vmatmul.mubr.bf16.gmra.mrb[196].mxu0 %v2840_v30  ;;  %v2757_v45 = vrot.slane %v2755_v5, 7  ;;  %v2880_v58 = vrot.slane %v2758_v37, 1  ;;  %v5480_v56 = vpop.f32.mrb[147].mxu0  ;;  %v8966_v30 = vld [vmem:[#allocation18_spill] sm:$0xff] }
 0x284   : > { %3453 = vmatprep.mubr.bf16.mxu0 %v8195_v29  ;;  %v6322_v8 = vadd.f32 %v5478_v55, %v7968_v44  ;;  %v5481_v27 = vadd.f32 %v5480_v56, %v5479_v3  ;;  %v2587_v40 = vmax.f32 %v2555_v21, 0.0  ;;  %v8258_v3 = vld [vmem:[%s8886_s2] ss:$0 sm:$0xff] }
 0x285   : > { %v2760_v49 = vor.u32 %v2758_v37, %v2757_v45  ;;  %v2881_v4 = vor.u32 %v2880_v58, %v2755_v5 }
 0x286   : > { %v6323_v13 = vadd.f32 %v6322_v8, %v8090_v51  ;;  %v6330_v23 = vadd.f32 %v5481_v27, %v7975_v17  ;;  %v8223_v44 = vpack.c.bf16 %v2587_v40, %v2586_v6  ;;  %v2848_v40 = vld [vmem:[#allocation3 + $0x138] sm:$0xff] }
 0x287   : > { %v2983_v32 = vld [vmem:[#allocation3 + $0x100] sm:$0x80]  ;;  %v8214_v60 = vsel %vm7214_vm5, %v2760_v49, %v2842_v14  ;;  %v2939_v53 = vsel %vm7432_vm7, %v2881_v4, %v2938_v38  ;;  %v8968_v38 = vld [vmem:[#allocation19_spill] sm:$0xff] }
 0x288   : > { %v2984_v22 = vsel %vm7515_vm10, 0, %v2983_v32  ;;  %2844 = vst [vmem:[#allocation3 + $0x108] sm:$0xff] %v8214_v60  ;;  %2940 = vst [vmem:[#allocation3 + $0x118] sm:$0xff] %v2939_v53  ;;  %v8225_v50 = vld [vmem:[#allocation3 + $0xe8] sm:$0xff]  ;;  %v2556_v9 = vadd.f32 %v6323_v13, %v8012_v46  ;;  %v6331_v35 = vadd.f32 %v6330_v23, %v8095_v42  ;;  %v5482_v63 = vpop.f32.mrb[148].mxu0  ;;  %v2762_v17 = vshrl.u32 %v8223_v44, 16 }
 0x289   : > { %2985 = vst [vmem:[#allocation3 + $0x100] sm:$0x80] %v2984_v22  ;;  %6108 = vmatprep.mubr.bf16.mxu1 %v8225_v50  ;;  %2631 = vst [vmem:[#allocation3 + $0x128] sm:$0xff] %v8223_v44  ;;  %v2765_v51 = vshll.u32 %v8223_v44, 16  ;;  %v5483_v48 = vpop.f32.mrb[149].mxu0  ;;  %v2944_v32 = vld [vmem:[#allocation3 + $0x148] sm:$0xff] }
 0x28a   : > { %v2557_v11 = vadd.f32 %v6331_v35, %v8012_v46  ;;  %v5484_v61 = vadd.f32 %v5483_v48, %v5482_v63  ;;  %v5485_v15 = vpop.f32.mrb[150].mxu0  ;;  %v2764_v2 = vrot.slane %v2762_v17, 7  ;;  %v2588_v52 = vmax.f32 %v2556_v9, 0.0  ;;  %v8967_v46 = vld [vmem:[#allocation17_spill] sm:$0xff] }
 0x28b   : > { %3454 = vmatmul.mubr.bf16.gmra.mrb[200].mxu0 %v8214_v60  ;;  %v2882_v42 = vrot.slane %v2765_v51, 1  ;;  %v5486_v47 = vpop.f32.mrb[151].mxu0 }
 0x28c   : > { %3461 = vmatprep.mubr.bf16.mxu0 %v8223_v44  ;;  %v2589_v19 = vmax.f32 %v2557_v11, 0.0  ;;  %v6318_v54 = vadd.f32 %v5484_v61, %v8966_v30  ;;  %v5487_v28 = vadd.f32 %v5486_v47, %v5485_v15  ;;  %v2767_v33 = vor.u32 %v2765_v51, %v2764_v2  ;;  %v8970_v15 = vld [vmem:[#allocation27_spill] sm:$0xff] }
 0x28d   : > { %v2883_v26 = vor.u32 %v2882_v42, %v2762_v17  ;;  %v8969_v17 = vld [vmem:[#allocation21_spill] sm:$0xff] }
 0x28e   : > { %v8237_v37 = vpack.c.bf16 %v2589_v19, %v2588_v52  ;;  %v6319_v31 = vadd.f32 %v6318_v54, %v8088_v25  ;;  %v6326_v18 = vadd.f32 %v5487_v28, %v8967_v46  ;;  %v8245_v12 = vsel %vm7214_vm5, %v2767_v33, %v2845_v59 }
 0x28f   : > { %v2986_v5 = vld [vmem:[#allocation3 + $0x118] sm:$0x80]  ;;  %v2942_v45 = vsel %vm7432_vm7, %v2883_v26, %v2941_v43  ;;  %2847 = vst [vmem:[#allocation3 + $0x120] sm:$0xff] %v8245_v12 }
 0x290   : > { %v2987_v41 = vsel %vm7515_vm10, 0, %v2986_v5  ;;  %v8249_v58 = vld [vmem:[#allocation3 + $0x100] sm:$0xff]  ;;  %2943 = vst [vmem:[#allocation3 + $0x130] sm:$0xff] %v2942_v45  ;;  %2632 = vst [vmem:[#allocation3 + $0x140] sm:$0xff] %v8237_v37  ;;  %v2769_v25 = vshrl.u32 %v8237_v37, 16  ;;  %v2772_v55 = vshll.u32 %v8237_v37, 16  ;;  %v2558_v14 = vadd.f32 %v8258_v3, %v6319_v31 }
 0x291   : > { %2988 = vst [vmem:[#allocation3 + $0x118] sm:$0x80] %v2987_v41  ;;  %v6327_v21 = vadd.f32 %v6326_v18, %v8968_v38  ;;  %v5488_v56 = vpop.f32.mrb[152].mxu0  ;;  %6109 = vmatmul.mubr.bf16.gmra.mrb[112].mxu1 %v8249_v58  ;;  %v2851_v18 = vld [vmem:[#allocation3 + $0x150] sm:$0xff]  ;;  %v2947_v41 = vld [vmem:[#allocation3 + $0x160] sm:$0xff]  ;;  %v8971_v38 = vld [vmem:[#allocation25_spill] sm:$0xff] }
 0x292   : > { %v5489_v49 = vpop.f32.mrb[153].mxu0  ;;  %v2771_v4 = vrot.slane %v2769_v25, 7  ;;  %v2884_v8 = vrot.slane %v2772_v55, 1  ;;  %v2590_v53 = vmax.f32 %v2558_v14, 0.0 }
 0x293   : > { %3462 = vmatmul.mubr.bf16.gmra.mrb[204].mxu0 %v8245_v12  ;;  %v2559_v27 = vadd.f32 %v8258_v3, %v6327_v21  ;;  %v5491_v6 = vpop.f32.mrb[154].mxu0  ;;  %v5490_v13 = vadd.f32 %v5489_v49, %v5488_v56 }
 0x294   : > { %3469 = vmatprep.mubr.bf16.mxu0 %v8237_v37  ;;  %v5492_v23 = vpop.f32.mrb[155].mxu0  ;;  %v2774_v22 = vor.u32 %v2772_v55, %v2771_v4  ;;  %v2885_v9 = vor.u32 %v2884_v8, %v2769_v25 }
 0x295   : > { %v2591_v35 = vmax.f32 %v2559_v27, 0.0  ;;  %v5493_v63 = vadd.f32 %v5492_v23, %v5491_v6  ;;  %v6338_v51 = vadd.f32 %v5490_v13, %v8969_v17  ;;  %v2854_v17 = vld [vmem:[#allocation3 + $0x168] sm:$0xff] }
 0x296   : > { %v8269_v48 = vsel %vm7214_vm5, %v2774_v22, %v2848_v40  ;;  %v2945_v11 = vsel %vm7432_vm7, %v2885_v9, %v2944_v32  ;;  %v8972_v32 = vld [vmem:[#allocation22_spill] sm:$0xff] }
 0x297   : > { %v8273_v61 = vpack.c.bf16 %v2591_v35, %v2590_v53  ;;  %v6346_v2 = vadd.f32 %v5493_v63, %v8970_v15  ;;  %v2989_v42 = vld [vmem:[#allocation3 + $0x130] sm:$0x80]  ;;  %2850 = vst [vmem:[#allocation3 + $0x138] sm:$0xff] %v8269_v48  ;;  %2946 = vst [vmem:[#allocation3 + $0x148] sm:$0xff] %v2945_v11  ;;  %v6339_v47 = vadd.f32 %v6338_v51, %v8110_v16  ;;  %v2950_v51 = vld [vmem:[#allocation3 + $0x178] sm:$0xff] }
 0x298   : > { %v8278_v59 = vld [vmem:[#allocation3 + $0x118] sm:$0xff]  ;;  %v2990_v43 = vsel %vm7515_vm10, 0, %v2989_v42  ;;  %v5494_v54 = vpop.f32.mrb[156].mxu0 }
 0x299   : > { %2633 = vst [vmem:[#allocation3 + $0x158] sm:$0xff] %v8273_v61  ;;  %v2776_v52 = vshrl.u32 %v8273_v61, 16  ;;  %v2779_v19 = vshll.u32 %v8273_v61, 16  ;;  %v6347_v30 = vadd.f32 %v6346_v2, %v8116_v1  ;;  %6112 = vmatprep.mubr.bf16.mxu1 %v8278_v59  ;;  %2991 = vst [vmem:[#allocation3 + $0x130] sm:$0x80] %v2990_v43  ;;  %v2560_v16 = vadd.f32 %v8258_v3, %v6339_v47  ;;  %v5495_v28 = vpop.f32.mrb[157].mxu0 }
 0x29a   : > { %v5496_v31 = vadd.f32 %v5495_v28, %v5494_v54  ;;  %v5497_v46 = vpop.f32.mrb[158].mxu0 }
 0x29b   : > { %3470 = vmatmul.mubr.bf16.gmra.mrb[208].mxu0 %v8269_v48  ;;  %v2778_v33 = vrot.slane %v2776_v52, 7  ;;  %v2886_v26 = vrot.slane %v2779_v19, 1  ;;  %v2561_v5 = vadd.f32 %v8258_v3, %v6347_v30  ;;  %v2592_v1 = vmax.f32 %v2560_v16, 0.0  ;;  %v5498_v45 = vpop.f32.mrb[159].mxu0 }
 0x29c   : > { %3477 = vmatprep.mubr.bf16.mxu0 %v8273_v61  ;;  %v6334_v21 = vadd.f32 %v5496_v31, %v8971_v38  ;;  %v5499_v56 = vadd.f32 %v5498_v45, %v5497_v46  ;;  %v3008_v38 = vld [vmem:[#allocation3 + $0x20] sm:$0xff] }
 0x29d   : > { %v2781_v25 = vor.u32 %v2779_v19, %v2778_v33  ;;  %v2887_v55 = vor.u32 %v2886_v26, %v2776_v52  ;;  %v2593_v14 = vmax.f32 %v2561_v5, 0.0  ;;  %v2857_v26 = vld [vmem:[#allocation3 + $0x180] sm:$0xff]  ;;  %v2953_v5 = vld [vmem:[#allocation3 + $0x190] sm:$0xff] }
 0x29e   : > { %v2992_v49 = vld [vmem:[#allocation3 + $0x148] sm:$0x80]  ;;  %v6335_v6 = vadd.f32 %v6334_v21, %v8108_v34  ;;  %v6342_v53 = vadd.f32 %v5499_v56, %v8972_v32  ;;  %v3007_v21 = vld [vmem:[#allocation3 + $0x18] sm:$0xff]  ;;  %v8365_v32 = vld [vmem:[#allocation3 + $0x50] sm:$0xff] }
 0x29f   : > { %v8294_v4 = vsel %vm7214_vm5, %v2781_v25, %v2851_v18  ;;  %v2948_v8 = vsel %vm7432_vm7, %v2887_v55, %v2947_v41  ;;  %v8298_v27 = vpack.c.bf16 %v2593_v14, %v2592_v1  ;;  %v2993_v40 = vsel %vm7515_vm10, 0, %v2992_v49  ;;  %v8346_v55 = vld [vmem:[#allocation2 + $0x8] sm:$0xff] }
 0x2a0   : > { %2853 = vst [vmem:[#allocation3 + $0x150] sm:$0xff] %v8294_v4  ;;  %2949 = vst [vmem:[#allocation3 + $0x160] sm:$0xff] %v2948_v8  ;;  %v8307_v22 = vld [vmem:[#allocation3 + $0x130] sm:$0xff]  ;;  %v2562_v9 = vadd.f32 %v8258_v3, %v6335_v6  ;;  %v6343_v34 = vadd.f32 %v6342_v53, %v8114_v0  ;;  %v8357_v49 = vld [vmem:[#allocation3 + $0x38] sm:$0xff] }
 0x2a1   : > { %2994 = vst [vmem:[#allocation3 + $0x148] sm:$0x80] %v2993_v40  ;;  %v2783_v13 = vshrl.u32 %v8298_v27, 16  ;;  %v2786_v23 = vshll.u32 %v8298_v27, 16  ;;  %6113 = vmatmul.mubr.bf16.gmra.mrb[116].mxu1 %v8307_v22  ;;  %v8362_v8 = vld [vmem:[#allocation3 + $0x30] sm:$0xff]  ;;  %v6750_v6 = vld [vmem:[#allocation9 + $0x1c8] sm:$0xff]  }
 0x2a2   : > { %v2563_v11 = vadd.f32 %v8258_v3, %v6343_v34  ;;  %v2594_v42 = vmax.f32 %v2562_v9, 0.0  ;;  %v3009_v40 = vld [vmem:[#allocation3 + $0x28] sm:$0xff]  ;;  %v8367_v53 = vld [vmem:[#allocation3 + $0x40] sm:$0xff] }
 0x2a3   : > { %3478 = vmatmul.mubr.bf16.gmra.mrb[212].mxu0 %v8294_v4  ;;  %v2785_v35 = vrot.slane %v2783_v13, 7  ;;  %v2888_v63 = vrot.slane %v2786_v23, 1  ;;  %v6753_v9 = vld [vmem:[#allocation9 + $0x190] sm:$0xff]   ;;  %v8371_v34 = vld [vmem:[#allocation3 + $0x48] sm:$0xff] }
 0x2a4   : > { %3485 = vmatprep.mubr.bf16.mxu0 %v8298_v27  ;;  %v2595_v47 = vmax.f32 %v2563_v11, 0.0  ;;  %v6756_v11 = vld [vmem:[#allocation9 + $0x1e0] sm:$0xff]  }
 0x2a5   : > { %v2788_v15 = vor.u32 %v2786_v23, %v2785_v35  ;;  %v2889_v2 = vor.u32 %v2888_v63, %v2783_v13  ;;  %v6751_v13 = vld [vmem:[#allocation9 + $0x188] sm:$0xff]   ;;  %v6752_v23 = vld [vmem:[#allocation9 + $0x1d0] sm:$0xff]   ;;  %v6754_v35 = vld [vmem:[#allocation9 + $0x1d8] sm:$0xff]  }
 0x2a6   : > { %v8324_v30 = vpack.c.bf16 %v2595_v47, %v2594_v42  ;;  %v8373_v63 = vld [vmem:[#allocation3 + $0x58] sm:$0xff]  ;;  %v8384_v47 = vld [vmem:[#allocation3 + $0x80] sm:$0xff] }
 0x2a7   : > { %v2995_v43 = vld [vmem:[#allocation3 + $0x160] sm:$0x80]  ;;  %v8317_v52 = vsel %vm7214_vm5, %v2788_v15, %v2854_v17  ;;  %v2951_v0 = vsel %vm7432_vm7, %v2889_v2, %v2950_v51  ;;  %v8376_v17 = vld [vmem:[#allocation3 + $0x68] sm:$0xff]  ;;  %v6757_v15 = vld [vmem:[#allocation9 + $0x1a0] sm:$0xff]  }
 0x2a8   : > { %v2996_v19 = vsel %vm7515_vm10, 0, %v2995_v43  ;;  %2856 = vst [vmem:[#allocation3 + $0x168] sm:$0xff] %v8317_v52  ;;  %2952 = vst [vmem:[#allocation3 + $0x178] sm:$0xff] %v2951_v0  ;;  %v8326_v3 = vld [vmem:[#allocation3 + $0x148] sm:$0xff]  ;;  %v2790_v54 = vshrl.u32 %v8324_v30, 16  ;;  %v2793_v16 = vshll.u32 %v8324_v30, 16 }
 0x2a9   : > { %2997 = vst [vmem:[#allocation3 + $0x160] sm:$0x80] %v2996_v19  ;;  %6116 = vmatprep.mubr.bf16.mxu1 %v8326_v3  ;;  %v6755_v51 = vld [vmem:[#allocation9 + $0x198] sm:$0xff]   ;;  %v8381_v2 = vld [vmem:[#allocation3 + $0x60] sm:$0xff]  ;;  %v6758_v42 = vld [vmem:[#allocation9 + $0x1e8] sm:$0xff]  }
 0x2aa   : > { %v2792_v28 = vrot.slane %v2790_v54, 7  ;;  %v2890_v33 = vrot.slane %v2793_v16, 1  ;;  %v6760_v43 = vld [vmem:[#allocation9 + $0x1f0] sm:$0xff]   ;;  %v8389_v19 = vld [vmem:[#allocation3 + $0x78] sm:$0xff] }
 0x2ab   : > { %3486 = vmatmul.mubr.bf16.gmra.mrb[216].mxu0 %v8317_v52  ;;  %v6761_v0 = vld [vmem:[#allocation9 + $0x1b0] sm:$0xff]  }
 0x2ac   : > { %3493 = vmatprep.mubr.bf16.mxu0 %v8324_v30  ;;  %v2795_v31 = vor.u32 %v2793_v16, %v2792_v28  ;;  %v2891_v46 = vor.u32 %v2890_v33, %v2790_v54  ;;  %v6762_v54 = vld [vmem:[#allocation9 + $0x1f8] sm:$0xff]   ;;  %v8392_v16 = vld [vmem:[#allocation3 + $0x98] sm:$0xff]  ;;  %v8397_v28 = vld [vmem:[#allocation3 + $0x90] sm:$0xff] }
 0x2ad   : > { %v8400_v33 = vld [vmem:[#allocation3 + $0xb0] sm:$0xff] }
 0x2ae   : > { %v8337_v1 = vsel %vm7214_vm5, %v2795_v31, %v2857_v26  ;;  %v2954_v45 = vsel %vm7432_vm7, %v2891_v46, %v2953_v5  ;;  %v8413_v26 = vld [vmem:[#allocation3 + $0xc0] sm:$0xff]  ;;  %v8429_v5 = vld [vmem:[#allocation3 + $0xf0] sm:$0xff]  ;;  %v6765_v31 = vld [vmem:[#allocation9 + $0x208] sm:$0xff]  }
 0x2af   : > { %v2998_v18 = vld [vmem:[#allocation3 + $0x178] sm:$0x80]  ;;  %2859 = vst [vmem:[#allocation3 + $0x180] sm:$0xff] %v8337_v1  ;;  %2955 = vst [vmem:[#allocation3 + $0x190] sm:$0xff] %v2954_v45 }
 0x2b0   : > { %v2999_v41 = vsel %vm7515_vm10, 0, %v2998_v18  ;;  %v8341_v25 = vld [vmem:[#allocation3 + $0x160] sm:$0xff] }
 0x2b1   : > { %3000 = vst [vmem:[#allocation3 + $0x178] sm:$0x80] %v2999_v41  ;;  %6117 = vmatmul.mubr.bf16.gmra.mrb[120].mxu1 %v8341_v25  ;;  %v6766_v41 = vld [vmem:[#allocation9 + $0x210] sm:$0xff]  }
 0x2b3   : > { %3494 = vmatmul.mubr.bf16.gmra.mrb[220].mxu0 %v8337_v1 }
 0x2b4   : > { %3839 = vmatprep.mubr.bf16.mxu0 %v8346_v55 }
 0x2b6   : > { %v3001_v36 = vld [vmem:[#allocation3 + $0x190] sm:$0x80] }
 0x2b7   : > { %v3002_v24 = vsel %vm7515_vm10, 0, %v3001_v36 }
 0x2b8   : > { %v8349_v14 = vld [vmem:[#allocation3 + $0x178] sm:$0xff]  ;;  %3003 = vst [vmem:[#allocation3 + $0x190] sm:$0x80] %v3002_v24 }
 0x2b9   : > { %6120 = vmatprep.mubr.bf16.mxu1 %v8349_v14 }
 0x2bb   : > { %3840 = vmatmul.mubr.bf16.vlgmr.msra.gmra.mrb[224].mxu0 %v8346_v55 }
 0x2bc   : > { %3847 = vmatprep.mubr.bf16.mxu0 %v3008_v38 }
 0x2bf   : > { %v8355_v56 = vld [vmem:[#allocation3 + $0x190] sm:$0xff] }
 0x2c0   : > { %6121 = vmatmul.mubr.bf16.gmra.mrb[124].mxu1 %v8355_v56 }
 0x2c1   : > { %6140 = vmatprep.mubr.bf16.mxu1 %v8346_v55 }
 0x2c3   : > { %3848 = vmatmul.mubr.bf16.gmra.mrb[228].mxu0 %v3007_v21  ;;  %v6767_v21 = vld [vmem:[#allocation9 + $0x218] sm:$0xff]  }
 0x2c4   : > { %3855 = vmatprep.mubr.bf16.mxu0 %v8357_v49 }
 0x2c8   : > { %6141 = vmatmul.mubr.bf16.vlgmr.msra.gmra.mrb[96].mxu1 %v3009_v40 }
 0x2c9   : > { %6144 = vmatprep.mubr.bf16.mxu1 %v8367_v53  ;;  %5797 = vmatpush3.bf16.msra.mxu1 %v6749_v10  ;;  %v6768_v10 = vld [vmem:[#allocation9 + $0x220] sm:$0xff]  }
 0x2ca   : > { %5798 = vmatprep.subr.bf16.mxu1 %v6750_v6 }
 0x2cb   : > { %3856 = vmatmul.mubr.bf16.gmra.mrb[232].mxu0 %v8362_v8 }
 0x2cc   : > { %3863 = vmatprep.mubr.bf16.mxu0 %v8365_v32 }
 0x2cd   : > { %5799 = vmatpush3.bf16.msra.mxu1 %v6751_v13 }
 0x2ce   : > { %5800 = vmatprep.subr.bf16.mxu1 %v6752_v23  ;;  %v6770_v23 = vld [vmem:[#allocation9 + $0x230] sm:$0xff]  }
 0x2d0   : > { %6145 = vmatmul.mubr.bf16.gmra.mrb[100].mxu1 %v8373_v63 }
 0x2d1   : > { %6148 = vmatprep.mubr.bf16.mxu1 %v8139_v57  ;;  %5801 = vmatpush3.bf16.msra.mxu1 %v6753_v9  ;;  %v6759_v57 = vld [vmem:[#allocation9 + $0x1a8] sm:$0xff]  }
 0x2d2   : > { %5802 = vmatprep.subr.bf16.mxu1 %v6754_v35 }
 0x2d3   : > { %3864 = vmatmul.mubr.bf16.gmra.mrb[236].mxu0 %v8371_v34 }
 0x2d4   : > { %3871 = vmatprep.mubr.bf16.mxu0 %v8376_v17 }
 0x2d5   : > { %5803 = vmatpush3.bf16.msra.mxu1 %v6755_v51 }
 0x2d6   : > { %5804 = vmatprep.subr.bf16.mxu1 %v6756_v11 }
 0x2d8   : > { %6149 = vmatmul.mubr.bf16.gmra.mrb[104].mxu1 %v8154_v39  ;;  %v6763_v39 = vld [vmem:[#allocation9 + $0x1b8] sm:$0xff]  }
 0x2d9   : > { %6152 = vmatprep.mubr.bf16.mxu1 %v8169_v7  ;;  %5805 = vmatpush3.bf16.msra.mxu1 %v6757_v15  ;;  %v6764_v7 = vld [vmem:[#allocation9 + $0x200] sm:$0xff]  }
 0x2da   : > { %5806 = vmatprep.subr.bf16.mxu1 %v6758_v42 }
 0x2db   : > { %3872 = vmatmul.mubr.bf16.gmra.mrb[240].mxu0 %v8381_v2 }
 0x2dc   : > { %3879 = vmatprep.mubr.bf16.mxu0 %v8384_v47 }
 0x2dd   : > { %5807 = vmatpush3.bf16.msra.mxu1 %v6759_v57 }
 0x2de   : > { %5808 = vmatprep.subr.bf16.mxu1 %v6760_v43 }
 0x2e0   : > { %6153 = vmatmul.mubr.bf16.gmra.mrb[108].mxu1 %v8182_v62  ;;  %v8405_v62 = vld [vmem:[#allocation3 + $0xa8] sm:$0xff] }
 0x2e1   : > { %6156 = vmatprep.mubr.bf16.mxu1 %v8204_v20  ;;  %5809 = vmatpush3.bf16.msra.mxu1 %v6761_v0  ;;  %v8408_v20 = vld [vmem:[#allocation3 + $0xc8] sm:$0xff] }
 0x2e2   : > { %5810 = vmatprep.subr.bf16.mxu1 %v6762_v54 }
 0x2e3   : > { %3880 = vmatmul.mubr.bf16.gmra.mrb[244].mxu0 %v8389_v19 }
 0x2e4   : > { %3887 = vmatprep.mubr.bf16.mxu0 %v8392_v16 }
 0x2e5   : > { %5811 = vmatpush3.bf16.msra.mxu1 %v6763_v39 }
 0x2e6   : > { %6172 = vmatprep.subr.bf16.mxu1 %v6764_v7 }
 0x2e8   : > { %6157 = vmatmul.mubr.bf16.gmra.mrb[112].mxu1 %v8225_v50  ;;  %v8416_v50 = vld [vmem:[#allocation3 + $0xe0] sm:$0xff] }
 0x2e9   : > { %6160 = vmatprep.mubr.bf16.mxu1 %v8249_v58  ;;  %v8421_v58 = vld [vmem:[#allocation3 + $0xd8] sm:$0xff] }
 0x2eb   : > { %3888 = vmatmul.mubr.bf16.gmra.mrb[248].mxu0 %v8397_v28 }
 0x2ec   : > { %3895 = vmatprep.mubr.bf16.mxu0 %v8400_v33 }
 0x2f0   : > { %6161 = vmatmul.mubr.bf16.gmra.mrb[116].mxu1 %v8278_v59  ;;  %v8424_v59 = vld [vmem:[#allocation3 + $0xf8] sm:$0xff] }
 0x2f1   : > { %6164 = vmatprep.mubr.bf16.mxu1 %v8307_v22 }
 0x2f3   : > { %3896 = vmatmul.mubr.bf16.gmra.mrb[252].mxu0 %v8405_v62 }
 0x2f4   : > { %3903 = vmatprep.mubr.bf16.mxu0 %v8408_v20 }
 0x2f8   : > { %6165 = vmatmul.mubr.bf16.gmra.mrb[120].mxu1 %v8326_v3 }
 0x2f9   : > { %6168 = vmatprep.mubr.bf16.mxu1 %v8341_v25 }
 0x2fb   : > { %3904 = vmatmul.mubr.bf16.gmra.mrb[0].mxu0 %v8413_v26 }
 0x2fc   : > { %3911 = vmatprep.mubr.bf16.mxu0 %v8416_v50 }
 0x300   : > { %6169 = vmatmul.mubr.bf16.gmra.mrb[124].mxu1 %v8349_v14 }
 0x301   : > { %4403 = vmatprep.mubr.bf16.mxu1 %v8357_v49 }
 0x303   : > { %3912 = vmatmul.mubr.bf16.gmra.mrb[4].mxu0 %v8421_v58 }
 0x304   : > { %3919 = vmatprep.mubr.bf16.mxu0 %v8424_v59 }
 0x308   : > { %4404 = vmatmul.mubr.bf16.vlgmr.msra.gmra.mrb[128].mxu1 %v8362_v8 }
 0x309   : > { %4411 = vmatprep.mubr.bf16.mxu1 %v8365_v32  ;;  %6173 = vmatpush3.bf16.msra.mxu1 %v6764_v7 }
 0x30a   : > { %v5540_v46 = vpop.f32.mrb[160].mxu0  ;;  %6174 = vmatprep.subr.bf16.mxu1 %v6765_v31 }
 0x30b   : > { %3920 = vmatmul.mubr.bf16.gmra.mrb[8].mxu0 %v8429_v5  ;;  %v5541_v18 = vpop.f32.mrb[161].mxu0 }
 0x30c   : > { %3927 = vmatprep.mubr.bf16.mxu0 %v8195_v29  ;;  %v8435_v45 = vadd.f32 %v5541_v18, %v5540_v46  ;;  %v5543_v36 = vpop.f32.mrb[162].mxu0 }
 0x30d   : > { %v5544_v24 = vpop.f32.mrb[163].mxu0  ;;  %6175 = vmatpush3.bf16.msra.mxu1 %v6765_v31 }
 0x30e   : > { %v8437_v38 = vadd.f32 %v5544_v24, %v5543_v36  ;;  %6176 = vmatprep.subr.bf16.mxu1 %v6766_v41 }
 0x310   : > { %4412 = vmatmul.mubr.bf16.gmra.mrb[132].mxu1 %v8371_v34 }
 0x311   : > { %4419 = vmatprep.mubr.bf16.mxu1 %v8376_v17  ;;  %6177 = vmatpush3.bf16.msra.mxu1 %v6766_v41 }
 0x312   : > { %v5546_v29 = vpop.f32.mrb[164].mxu0  ;;  %6178 = vmatprep.subr.bf16.mxu1 %v6767_v21 }
 0x313   : > { %3928 = vmatmul.mubr.bf16.gmra.mrb[12].mxu0 %v8214_v60  ;;  %v5547_v49 = vpop.f32.mrb[165].mxu0  ;;  %v6769_v60 = vld [vmem:[#allocation9 + $0x228] sm:$0xff]  }
 0x314   : > { %3935 = vmatprep.mubr.bf16.mxu0 %v8223_v44  ;;  %v8443_v8 = vadd.f32 %v5547_v49, %v5546_v29  ;;  %v5549_v6 = vpop.f32.mrb[166].mxu0 }
 0x315   : > { %v5550_v40 = vpop.f32.mrb[167].mxu0  ;;  %6179 = vmatpush3.bf16.msra.mxu1 %v6767_v21 }
 0x316   : > { %v8445_v32 = vadd.f32 %v5550_v40, %v5549_v6  ;;  %6180 = vmatprep.subr.bf16.mxu1 %v6768_v10 }
 0x318   : > { %4420 = vmatmul.mubr.bf16.gmra.mrb[136].mxu1 %v8381_v2 }
 0x319   : > { %4427 = vmatprep.mubr.bf16.mxu1 %v8384_v47  ;;  %6181 = vmatpush3.bf16.msra.mxu1 %v6768_v10 }
 0x31a   : > { %v5552_v44 = vpop.f32.mrb[168].mxu0  ;;  %6182 = vmatprep.subr.bf16.mxu1 %v6769_v60 }
 0x31b   : > { %3936 = vmatmul.mubr.bf16.gmra.mrb[16].mxu0 %v8245_v12  ;;  %v5553_v13 = vpop.f32.mrb[169].mxu0  ;;  %v6771_v12 = vld [vmem:[#allocation9 + $0x238] sm:$0xff]  }
 0x31c   : > { %3943 = vmatprep.mubr.bf16.mxu0 %v8237_v37  ;;  %v8451_v9 = vadd.f32 %v5553_v13, %v5552_v44  ;;  %v5555_v34 = vpop.f32.mrb[170].mxu0 }
 0x31d   : > { %v5556_v35 = vpop.f32.mrb[171].mxu0  ;;  %6183 = vmatpush3.bf16.msra.mxu1 %v6769_v60  ;;  %v4161_v60 = vld [vmem:[#allocation3 + $0x128] sm:$0xff] }
 0x31e   : > { %v8453_v17 = vadd.f32 %v5556_v35, %v5555_v34  ;;  %6184 = vmatprep.subr.bf16.mxu1 %v6770_v23 }
 0x320   : > { %4428 = vmatmul.mubr.bf16.gmra.mrb[140].mxu1 %v8389_v19 }
 0x321   : > { %4435 = vmatprep.mubr.bf16.mxu1 %v8392_v16  ;;  %6185 = vmatpush3.bf16.msra.mxu1 %v6770_v23 }
 0x322   : > { %6186 = vmatprep.subr.bf16.mxu1 %v6771_v12 }
 0x323   : > { %3944 = vmatmul.mubr.bf16.gmra.mrb[20].mxu0 %v8269_v48 }
 0x324   : > { %3951 = vmatprep.mubr.bf16.mxu0 %v8273_v61  ;;  %v5558_v37 = vpop.f32.mrb[172].mxu0 }
 0x325   : > { %v5559_v51 = vpop.f32.mrb[173].mxu0  ;;  %6187 = vmatpush3.bf16.msra.mxu1 %v6771_v12  ;;  %v4160_v12 = vld [vmem:[#allocation3 + $0x120] sm:$0xff] }
 0x326   : > { %v8459_v11 = vadd.f32 %v5559_v51, %v5558_v37  ;;  %v5561_v15 = vpop.f32.mrb[174].mxu0  ;;  %v4164_v37 = vld [vmem:[#allocation3 + $0x140] sm:$0xff] }
 0x327   : > { %v5562_v2 = vpop.f32.mrb[175].mxu0 }
 0x328   : > { %v8461_v42 = vadd.f32 %v5562_v2, %v5561_v15  ;;  %4436 = vmatmul.mubr.bf16.gmra.mrb[144].mxu1 %v8397_v28 }
 0x329   : > { %4443 = vmatprep.mubr.bf16.mxu1 %v8400_v33 }
 0x32b   : > { %3952 = vmatmul.mubr.bf16.gmra.mrb[24].mxu0 %v8294_v4 }
 0x32c   : > { %3959 = vmatprep.mubr.bf16.mxu0 %v8298_v27 }
 0x32e   : > { %v5564_v48 = vpop.f32.mrb[176].mxu0 }
 0x32f   : > { %v5565_v61 = vpop.f32.mrb[177].mxu0 }
 0x330   : > { %v8467_v47 = vadd.f32 %v5565_v61, %v5564_v48  ;;  %v5567_v57 = vpop.f32.mrb[178].mxu0  ;;  %4444 = vmatmul.mubr.bf16.gmra.mrb[148].mxu1 %v8405_v62 }
 0x331   : > { %v5568_v43 = vpop.f32.mrb[179].mxu0  ;;  %4451 = vmatprep.mubr.bf16.mxu1 %v8408_v20 }
 0x332   : > { %v8469_v0 = vadd.f32 %v5568_v43, %v5567_v57  ;;  %v4163_v43 = vld [vmem:[#allocation3 + $0x138] sm:$0xff] }
 0x333   : > { %3960 = vmatmul.mubr.bf16.gmra.mrb[28].mxu0 %v8317_v52 }
 0x336   : > { %v5570_v4 = vpop.f32.mrb[180].mxu0 }
 0x337   : > { %v5571_v19 = vpop.f32.mrb[181].mxu0 }
 0x338   : > { %v8474_v54 = vadd.f32 %v5571_v19, %v5570_v4  ;;  %v5573_v16 = vpop.f32.mrb[182].mxu0  ;;  %4452 = vmatmul.mubr.bf16.gmra.mrb[152].mxu1 %v8413_v26  ;;  %v4167_v4 = vld [vmem:[#allocation3 + $0x158] sm:$0xff] }
 0x339   : > { %v5574_v39 = vpop.f32.mrb[183].mxu0  ;;  %4459 = vmatprep.mubr.bf16.mxu1 %v8416_v50  ;;  %v4158_v50 = vld [vmem:[#allocation3 + $0x110] sm:$0xff] }
 0x33a   : > { %v8476_v7 = vadd.f32 %v5574_v39, %v5573_v16 }
 0x33e   : > { %v5576_v28 = vpop.f32.mrb[184].mxu0 }
 0x33f   : > { %v5577_v33 = vpop.f32.mrb[185].mxu0 }
 0x340   : > { %v8480_v31 = vadd.f32 %v5577_v33, %v5576_v28  ;;  %v5579_v46 = vpop.f32.mrb[186].mxu0  ;;  %4460 = vmatmul.mubr.bf16.gmra.mrb[156].mxu1 %v8421_v58 }
 0x341   : > { %v5580_v62 = vpop.f32.mrb[187].mxu0  ;;  %4467 = vmatprep.mubr.bf16.mxu1 %v8424_v59  ;;  %v4157_v59 = vld [vmem:[#allocation3 + $0x108] sm:$0xff] }
 0x342   : > { %v8482_v18 = vadd.f32 %v5580_v62, %v5579_v46  ;;  %v4166_v62 = vld [vmem:[#allocation3 + $0x150] sm:$0xff] }
 0x346   : > { %v5582_v20 = vpop.f32.mrb[188].mxu0 }
 0x347   : > { %v5583_v41 = vpop.f32.mrb[189].mxu0 }
 0x348   : > { %v8486_v36 = vadd.f32 %v5583_v41, %v5582_v20  ;;  %v5585_v24 = vpop.f32.mrb[190].mxu0  ;;  %4468 = vmatmul.mubr.bf16.gmra.mrb[160].mxu1 %v8429_v5 }
 0x349   : > { %v5586_v26 = vpop.f32.mrb[191].mxu0  ;;  %4475 = vmatprep.mubr.bf16.mxu1 %v4158_v50 }
 0x34a   : > { %v8488_v21 = vadd.f32 %v5586_v26, %v5585_v24 }
 0x34e   : > { %v5588_v29 = vpop.f32.mrb[192].mxu0 }
 0x34f   : > { %v5589_v49 = vpop.f32.mrb[193].mxu0 }
 0x350   : > { %v8491_v10 = vadd.f32 %v5589_v49, %v5588_v29  ;;  %v5591_v6 = vpop.f32.mrb[194].mxu0  ;;  %4476 = vmatmul.mubr.bf16.gmra.mrb[164].mxu1 %v4157_v59 }
 0x351   : > { %v5592_v58 = vpop.f32.mrb[195].mxu0  ;;  %4483 = vmatprep.mubr.bf16.mxu1 %v4161_v60 }
 0x352   : > { %v8493_v40 = vadd.f32 %v5592_v58, %v5591_v6 }
 0x356   : > { %v5594_v44 = vpop.f32.mrb[196].mxu0 }
 0x357   : > { %v5595_v13 = vpop.f32.mrb[197].mxu0 }
 0x358   : > { %v8495_v23 = vadd.f32 %v5595_v13, %v5594_v44  ;;  %v5597_v34 = vpop.f32.mrb[198].mxu0  ;;  %4484 = vmatmul.mubr.bf16.gmra.mrb[168].mxu1 %v4160_v12 }
 0x359   : > { %v5598_v5 = vpop.f32.mrb[199].mxu0  ;;  %4491 = vmatprep.mubr.bf16.mxu1 %v4164_v37 }
 0x35a   : > { %v8497_v35 = vadd.f32 %v5598_v5, %v5597_v34 }
 0x35e   : > { %v5600_v51 = vpop.f32.mrb[200].mxu0 }
 0x35f   : > { %v5601_v15 = vpop.f32.mrb[201].mxu0 }
 0x360   : > { %v8499_v2 = vadd.f32 %v5601_v15, %v5600_v51  ;;  %v5603_v48 = vpop.f32.mrb[202].mxu0  ;;  %4492 = vmatmul.mubr.bf16.gmra.mrb[172].mxu1 %v4163_v43 }
 0x361   : > { %v5604_v61 = vpop.f32.mrb[203].mxu0  ;;  %4499 = vmatprep.mubr.bf16.mxu1 %v4167_v4 }
 0x362   : > { %v8501_v57 = vadd.f32 %v5604_v61, %v5603_v48  ;;  %v4138_v61 = vld [vmem:[#allocation3 + $0x70] sm:$0xff] }
 0x366   : > { %v5606_v19 = vpop.f32.mrb[204].mxu0 }
 0x367   : > { %v5607_v16 = vpop.f32.mrb[205].mxu0 }
 0x368   : > { %v8503_v39 = vadd.f32 %v5607_v16, %v5606_v19  ;;  %v5609_v28 = vpop.f32.mrb[206].mxu0  ;;  %4500 = vmatmul.mubr.bf16.gmra.mrb[176].mxu1 %v4166_v62  ;;  %v4141_v62 = vld [vmem:[#allocation3 + $0x88] sm:$0xff] }
 0x369   : > { %v5610_v33 = vpop.f32.mrb[207].mxu0  ;;  %4507 = vmatprep.mubr.bf16.mxu1 %v8298_v27 }
 0x36a   : > { %v8505_v46 = vadd.f32 %v5610_v33, %v5609_v28 }
 0x36e   : > { %v5612_v20 = vpop.f32.mrb[208].mxu0 }
 0x36f   : > { %v5613_v41 = vpop.f32.mrb[209].mxu0 }
 0x370   : > { %v8508_v24 = vadd.f32 %v5613_v41, %v5612_v20  ;;  %v5615_v26 = vpop.f32.mrb[210].mxu0  ;;  %4508 = vmatmul.mubr.bf16.gmra.mrb[180].mxu1 %v8317_v52  ;;  %v4144_v20 = vld [vmem:[#allocation3 + $0xa0] sm:$0xff] }
 0x371   : > { %v5616_v50 = vpop.f32.mrb[211].mxu0  ;;  %4515 = vmatprep.mubr.bf16.mxu1 %v8324_v30 }
 0x372   : > { %v8510_v29 = vadd.f32 %v5616_v50, %v5615_v26 }
 0x376   : > { %v5618_v49 = vpop.f32.mrb[212].mxu0 }
 0x377   : > { %v5619_v6 = vpop.f32.mrb[213].mxu0 }
 0x378   : > { %v8514_v58 = vadd.f32 %v5619_v6, %v5618_v49  ;;  %v5621_v59 = vpop.f32.mrb[214].mxu0  ;;  %4516 = vmatmul.mubr.bf16.gmra.mrb[184].mxu1 %v8337_v1 }
 0x379   : > { %v5622_v60 = vpop.f32.mrb[215].mxu0  ;;  %4523 = vmatprep.mubr.bf16.mxu1 %v8346_v55 }
 0x37a   : > { %v8516_v44 = vadd.f32 %v5622_v60, %v5621_v59 }
 0x37e   : > { %v5624_v27 = vpop.f32.mrb[216].mxu0 }
 0x37f   : > { %v5625_v13 = vpop.f32.mrb[217].mxu0 }
 0x380   : > { %v8520_v34 = vadd.f32 %v5625_v13, %v5624_v27  ;;  %v5627_v5 = vpop.f32.mrb[218].mxu0  ;;  %4524 = vmatmul.mubr.bf16.gmra.mrb[188].mxu1 %v8346_v55  ;;  %v4147_v27 = vld [vmem:[#allocation3 + $0xb8] sm:$0xff] }
 0x381   : > { %v5628_v52 = vpop.f32.mrb[219].mxu0  ;;  %6188 = vmatprep.mubr.bf16.mxu1 %v8367_v53 }
 0x382   : > { %v8522_v12 = vadd.f32 %v5628_v52, %v5627_v5 }
 0x386   : > { %v5630_v30 = vpop.f32.mrb[220].mxu0 }
 0x387   : > { %v5631_v37 = vpop.f32.mrb[221].mxu0 }
 0x388   : > { %v8526_v51 = vadd.f32 %v5631_v37, %v5630_v30  ;;  %v5633_v15 = vpop.f32.mrb[222].mxu0  ;;  %6189 = vmatmul.mubr.bf16.vlgmr.msra.gmra.mrb[96].mxu1 %v8373_v63 }
 0x389   : > { %v5634_v1 = vpop.f32.mrb[223].mxu0  ;;  %6192 = vmatprep.mubr.bf16.mxu1 %v4138_v61  ;;  %v4153_v61 = vld [vmem:[#allocation3 + $0xe8] sm:$0xff] }
 0x38a   : > { %v8528_v48 = vadd.f32 %v5634_v1, %v5633_v15 }
 0x38e   : > { %v5676_v43 = vpop.f32.mrb[224].mxu0 }
 0x38f   : > { %v5677_v4 = vpop.f32.mrb[225].mxu0 }
 0x390   : > { %v5678_v19 = vadd.f32 %v5677_v4, %v5676_v43  ;;  %v5679_v16 = vpop.f32.mrb[226].mxu0  ;;  %6193 = vmatmul.mubr.bf16.gmra.mrb[100].mxu1 %v4141_v62 }
 0x391   : > { %v5680_v28 = vpop.f32.mrb[227].mxu0  ;;  %6196 = vmatprep.mubr.bf16.mxu1 %v4144_v20  ;;  %v4159_v20 = vld [vmem:[#allocation3 + $0x118] sm:$0xff] }
 0x392   : > { %v8532_v33 = vadd.f32 %v5678_v19, %v8435_v45  ;;  %v5681_v53 = vadd.f32 %v5680_v28, %v5679_v16  ;;  %v4150_v45 = vld [vmem:[#allocation3 + $0xd0] sm:$0xff] }
 0x394   : > { %v8535_v41 = vadd.f32 %v5681_v53, %v8437_v38 }
 0x396   : > { %v5682_v26 = vpop.f32.mrb[228].mxu0 }
 0x397   : > { %v5683_v63 = vpop.f32.mrb[229].mxu0 }
 0x398   : > { %v5684_v50 = vadd.f32 %v5683_v63, %v5682_v26  ;;  %v5685_v49 = vpop.f32.mrb[230].mxu0  ;;  %6197 = vmatmul.mubr.bf16.gmra.mrb[104].mxu1 %v4147_v27 }
 0x399   : > { %v5686_v6 = vpop.f32.mrb[231].mxu0  ;;  %6200 = vmatprep.mubr.bf16.mxu1 %v4150_v45 }
 0x39a   : > { %v8538_v59 = vadd.f32 %v5684_v50, %v8443_v8  ;;  %v5687_v60 = vadd.f32 %v5686_v6, %v5685_v49  ;;  %v4156_v8 = vld [vmem:[#allocation3 + $0x100] sm:$0xff] }
 0x39c   : > { %v8541_v13 = vadd.f32 %v5687_v60, %v8445_v32 }
 0x39e   : > { %v5688_v5 = vpop.f32.mrb[232].mxu0 }
 0x39f   : > { %v5689_v38 = vpop.f32.mrb[233].mxu0 }
 0x3a0   : > { %v5690_v52 = vadd.f32 %v5689_v38, %v5688_v5  ;;  %v5691_v30 = vpop.f32.mrb[234].mxu0  ;;  %6201 = vmatmul.mubr.bf16.gmra.mrb[108].mxu1 %v4153_v61 }
 0x3a1   : > { %v5692_v37 = vpop.f32.mrb[235].mxu0  ;;  %6204 = vmatprep.mubr.bf16.mxu1 %v4156_v8 }
 0x3a2   : > { %v8544_v15 = vadd.f32 %v5690_v52, %v8451_v9  ;;  %v5693_v1 = vadd.f32 %v5692_v37, %v5691_v30 }
 0x3a4   : > { %v8547_v43 = vadd.f32 %v5693_v1, %v8453_v17 }
 0x3a6   : > { %v5694_v4 = vpop.f32.mrb[236].mxu0 }
 0x3a7   : > { %v5695_v32 = vpop.f32.mrb[237].mxu0 }
 0x3a8   : > { %v5696_v19 = vadd.f32 %v5695_v32, %v5694_v4  ;;  %v5697_v16 = vpop.f32.mrb[238].mxu0  ;;  %6205 = vmatmul.mubr.bf16.gmra.mrb[112].mxu1 %v4159_v20 }
 0x3a9   : > { %v5698_v28 = vpop.f32.mrb[239].mxu0  ;;  %6208 = vmatprep.mubr.bf16.mxu1 %v8307_v22 }
 0x3aa   : > { %v8550_v53 = vadd.f32 %v5696_v19, %v8459_v11  ;;  %v5699_v62 = vadd.f32 %v5698_v28, %v5697_v16 }
 0x3ac   : > { %v8553_v9 = vadd.f32 %v5699_v62, %v8461_v42 }
 0x3ae   : > { %v5700_v26 = vpop.f32.mrb[240].mxu0 }
 0x3af   : > { %v5701_v17 = vpop.f32.mrb[241].mxu0 }
 0x3b0   : > { %v5702_v63 = vadd.f32 %v5701_v17, %v5700_v26  ;;  %v5703_v50 = vpop.f32.mrb[242].mxu0  ;;  %6209 = vmatmul.mubr.bf16.gmra.mrb[116].mxu1 %v8326_v3 }
 0x3b1   : > { %v5704_v49 = vpop.f32.mrb[243].mxu0  ;;  %6212 = vmatprep.mubr.bf16.mxu1 %v8341_v25 }
 0x3b2   : > { %v8557_v6 = vadd.f32 %v5702_v63, %v8467_v47  ;;  %v5705_v60 = vadd.f32 %v5704_v49, %v5703_v50 }
 0x3b4   : > { %v8561_v11 = vadd.f32 %v5705_v60, %v8469_v0 }
 0x3b6   : > { %v5706_v42 = vpop.f32.mrb[244].mxu0 }
 0x3b7   : > { %v5707_v27 = vpop.f32.mrb[245].mxu0 }
 0x3b8   : > { %v5708_v45 = vadd.f32 %v5707_v27, %v5706_v42  ;;  %v5709_v22 = vpop.f32.mrb[246].mxu0  ;;  %6213 = vmatmul.mubr.bf16.gmra.mrb[120].mxu1 %v8349_v14 }
 0x3b9   : > { %v5710_v5 = vpop.f32.mrb[247].mxu0  ;;  %6216 = vmatprep.mubr.bf16.mxu1 %v8355_v56 }
 0x3ba   : > { %v8565_v38 = vadd.f32 %v5708_v45, %v8474_v54  ;;  %v5711_v52 = vadd.f32 %v5710_v5, %v5709_v22 }
 0x3bc   : > { %v8569_v47 = vadd.f32 %v5711_v52, %v8476_v7 }
 0x3be   : > { %v5712_v3 = vpop.f32.mrb[248].mxu0 }
 0x3bf   : > { %v5713_v0 = vpop.f32.mrb[249].mxu0 }
 0x3c0   : > { %v5714_v30 = vadd.f32 %v5713_v0, %v5712_v3  ;;  %v5715_v25 = vpop.f32.mrb[250].mxu0  ;;  %6217 = vmatmul.mubr.bf16.gmra.mrb[124].mxu1 %v8346_v55 }
 0x3c1   : > { %v5716_v37 = vpop.f32.mrb[251].mxu0 }
 0x3c2   : > { %v8573_v1 = vadd.f32 %v5714_v30, %v8480_v31  ;;  %v5717_v61 = vadd.f32 %v5716_v37, %v5715_v25 }
 0x3c4   : > { %v8577_v54 = vadd.f32 %v5717_v61, %v8482_v18 }
 0x3c6   : > { %v5718_v14 = vpop.f32.mrb[252].mxu0 }
 0x3c7   : > { %v5719_v8 = vpop.f32.mrb[253].mxu0 }
 0x3c8   : > { %v5720_v7 = vadd.f32 %v5719_v8, %v5718_v14  ;;  %v5721_v4 = vpop.f32.mrb[254].mxu0 }
 0x3c9   : > { %v5722_v32 = vpop.f32.mrb[255].mxu0 }
 0x3ca   : > { %v8580_v56 = vadd.f32 %v5720_v7, %v8486_v36  ;;  %v5723_v19 = vadd.f32 %v5722_v32, %v5721_v4 }
 0x3cc   : > { %v8583_v16 = vadd.f32 %v5723_v19, %v8488_v21 }
 0x3ce   : > { %v5724_v31 = vpop.f32.mrb[0].mxu0 }
 0x3cf   : > { %v5725_v28 = vpop.f32.mrb[1].mxu0 }
 0x3d0   : > { %v5726_v62 = vadd.f32 %v5725_v28, %v5724_v31  ;;  %v5727_v20 = vpop.f32.mrb[2].mxu0 }
 0x3d1   : > { %v5728_v55 = vpop.f32.mrb[3].mxu0 }
 0x3d2   : > { %v8586_v18 = vadd.f32 %v5726_v62, %v8491_v10  ;;  %v5729_v26 = vadd.f32 %v5728_v55, %v5727_v20 }
 0x3d4   : > { %v8589_v17 = vadd.f32 %v5729_v26, %v8493_v40 }
 0x3d6   : > { %v5730_v63 = vpop.f32.mrb[4].mxu0 }
 0x3d7   : > { %v5731_v50 = vpop.f32.mrb[5].mxu0 }
 0x3d8   : > { %v5732_v36 = vadd.f32 %v5731_v50, %v5730_v63  ;;  %v5733_v49 = vpop.f32.mrb[6].mxu0 }
 0x3d9   : > { %v5734_v60 = vpop.f32.mrb[7].mxu0 }
 0x3da   : > { %v8592_v21 = vadd.f32 %v5732_v36, %v8495_v23  ;;  %v5735_v42 = vadd.f32 %v5734_v60, %v5733_v49 }
 0x3db   : > { %v5812_v22 = vpop.f32.mrb[128].mxu1 }
 0x3dc   : > { %v8595_v27 = vadd.f32 %v5735_v42, %v8497_v35  ;;  %v5813_v5 = vpop.f32.mrb[129].mxu1 }
 0x3dd   : > { %v5814_v40 = vadd.f32 %v5813_v5, %v5812_v22  ;;  %v5815_v0 = vpop.f32.mrb[130].mxu1 }
 0x3de   : > { %v5736_v45 = vpop.f32.mrb[8].mxu0  ;;  %v5816_v25 = vpop.f32.mrb[131].mxu1 }
 0x3df   : > { %v5737_v10 = vpop.f32.mrb[9].mxu0  ;;  %v5817_v23 = vadd.f32 %v5816_v25, %v5815_v0  ;;  %v8601_v14 = vadd.f32 %v8532_v33, %v5814_v40 }
 0x3e0   : > { %v5738_v52 = vadd.f32 %v5737_v10, %v5736_v45  ;;  %v5739_v3 = vpop.f32.mrb[10].mxu0 }
 0x3e1   : > { %v5740_v30 = vpop.f32.mrb[11].mxu0  ;;  %v8607_v8 = vadd.f32 %v8535_v41, %v5817_v23 }
 0x3e2   : > { %v8598_v37 = vadd.f32 %v5738_v52, %v8499_v2  ;;  %v5741_v61 = vadd.f32 %v5740_v30, %v5739_v3 }
 0x3e3   : > { %v5818_v4 = vpop.f32.mrb[132].mxu1 }
 0x3e4   : > { %v8604_v35 = vadd.f32 %v5741_v61, %v8501_v57  ;;  %v5819_v19 = vpop.f32.mrb[133].mxu1 }
 0x3e5   : > { %v5820_v62 = vadd.f32 %v5819_v19, %v5818_v4  ;;  %v5821_v2 = vpop.f32.mrb[134].mxu1 }
 0x3e6   : > { %v5742_v7 = vpop.f32.mrb[12].mxu0  ;;  %v5822_v55 = vpop.f32.mrb[135].mxu1 }
 0x3e7   : > { %v5743_v32 = vpop.f32.mrb[13].mxu0  ;;  %v5823_v63 = vadd.f32 %v5822_v55, %v5821_v2  ;;  %v8613_v57 = vadd.f32 %v8538_v59, %v5820_v62 }
 0x3e8   : > { %v5744_v31 = vadd.f32 %v5743_v32, %v5742_v7  ;;  %v5745_v28 = vpop.f32.mrb[14].mxu0 }
 0x3e9   : > { %v5746_v20 = vpop.f32.mrb[15].mxu0  ;;  %v8619_v50 = vadd.f32 %v8541_v13, %v5823_v63 }
 0x3ea   : > { %v8610_v26 = vadd.f32 %v5744_v31, %v8503_v39  ;;  %v5747_v33 = vadd.f32 %v5746_v20, %v5745_v28 }
 0x3eb   : > { %v5824_v49 = vpop.f32.mrb[136].mxu1 }
 0x3ec   : > { %v8616_v41 = vadd.f32 %v5747_v33, %v8505_v46  ;;  %v5825_v42 = vpop.f32.mrb[137].mxu1 }
 0x3ed   : > { %v5826_v10 = vadd.f32 %v5825_v42, %v5824_v49  ;;  %v5827_v39 = vpop.f32.mrb[138].mxu1 }
 0x3ee   : > { %v5748_v36 = vpop.f32.mrb[16].mxu0  ;;  %v5828_v52 = vpop.f32.mrb[139].mxu1 }
 0x3ef   : > { %v5749_v60 = vpop.f32.mrb[17].mxu0  ;;  %v5829_v40 = vadd.f32 %v5828_v52, %v5827_v39  ;;  %v8625_v46 = vadd.f32 %v8544_v15, %v5826_v10 }
 0x3f0   : > { %v5750_v45 = vadd.f32 %v5749_v60, %v5748_v36  ;;  %v5751_v22 = vpop.f32.mrb[18].mxu0 }
 0x3f1   : > { %v5752_v5 = vpop.f32.mrb[19].mxu0  ;;  %v8631_v0 = vadd.f32 %v8547_v43, %v5829_v40 }
 0x3f2   : > { %v8622_v3 = vadd.f32 %v5750_v45, %v8508_v24  ;;  %v5753_v59 = vadd.f32 %v5752_v5, %v5751_v22 }
 0x3f3   : > { %v5830_v25 = vpop.f32.mrb[140].mxu1 }
 0x3f4   : > { %v8628_v13 = vadd.f32 %v5753_v59, %v8510_v29  ;;  %v5831_v23 = vpop.f32.mrb[141].mxu1 }
 0x3f5   : > { %v5832_v32 = vadd.f32 %v5831_v23, %v5830_v25  ;;  %v5833_v24 = vpop.f32.mrb[142].mxu1 }
 0x3f6   : > { %v5754_v30 = vpop.f32.mrb[20].mxu0  ;;  %v5834_v31 = vpop.f32.mrb[143].mxu1 }
 0x3f7   : > { %v5755_v61 = vpop.f32.mrb[21].mxu0  ;;  %v5835_v62 = vadd.f32 %v5834_v31, %v5833_v24  ;;  %v8637_v29 = vadd.f32 %v8550_v53, %v5832_v32 }
 0x3f8   : > { %v5756_v7 = vadd.f32 %v5755_v61, %v5754_v30  ;;  %v5757_v4 = vpop.f32.mrb[22].mxu0 }
 0x3f9   : > { %v5758_v19 = vpop.f32.mrb[23].mxu0  ;;  %v8643_v2 = vadd.f32 %v8553_v9, %v5835_v62 }
 0x3fa   : > { %v8634_v28 = vadd.f32 %v5756_v7, %v8514_v58  ;;  %v5759_v15 = vadd.f32 %v5758_v19, %v5757_v4 }
 0x3fb   : > { %v5836_v55 = vpop.f32.mrb[144].mxu1 }
 0x3fc   : > { %v8640_v43 = vadd.f32 %v5759_v15, %v8516_v44  ;;  %v5837_v63 = vpop.f32.mrb[145].mxu1 }
 0x3fd   : > { %v5838_v60 = vadd.f32 %v5837_v63, %v5836_v55  ;;  %v5839_v58 = vpop.f32.mrb[146].mxu1 }
 0x3fe   : > { %v5760_v20 = vpop.f32.mrb[24].mxu0  ;;  %v5840_v45 = vpop.f32.mrb[147].mxu1 }
 0x3ff   : > { %v5761_v33 = vpop.f32.mrb[25].mxu0  ;;  %v5841_v10 = vadd.f32 %v5840_v45, %v5839_v58  ;;  %v8649_v44 = vadd.f32 %v8557_v6, %v5838_v60 }
 0x400   : > { %v5762_v36 = vadd.f32 %v5761_v33, %v5760_v20  ;;  %v5763_v49 = vpop.f32.mrb[26].mxu0 }
 0x401   : > { %v5764_v42 = vpop.f32.mrb[27].mxu0  ;;  %v8655_v39 = vadd.f32 %v8561_v11, %v5841_v10 }
 0x402   : > { %v8646_v22 = vadd.f32 %v5762_v36, %v8520_v34  ;;  %v5765_v53 = vadd.f32 %v5764_v42, %v5763_v49 }
 0x403   : > { %v5842_v52 = vpop.f32.mrb[148].mxu1 }
 0x404   : > { %v8652_v9 = vadd.f32 %v5765_v53, %v8522_v12  ;;  %v5843_v40 = vpop.f32.mrb[149].mxu1 }
 0x405   : > { %v5844_v61 = vadd.f32 %v5843_v40, %v5842_v52  ;;  %v5845_v34 = vpop.f32.mrb[150].mxu1 }
 0x406   : > { %v5766_v5 = vpop.f32.mrb[28].mxu0  ;;  %v5846_v7 = vpop.f32.mrb[151].mxu1 }
 0x407   : > { %v5767_v59 = vpop.f32.mrb[29].mxu0  ;;  %v5847_v32 = vadd.f32 %v5846_v7, %v5845_v34  ;;  %v8661_v12 = vadd.f32 %v8565_v38, %v5844_v61 }
 0x408   : > { %v5768_v30 = vadd.f32 %v5767_v59, %v5766_v5  ;;  %v5769_v25 = vpop.f32.mrb[30].mxu0 }
 0x409   : > { %v5770_v23 = vpop.f32.mrb[31].mxu0  ;;  %v8667_v24 = vadd.f32 %v8569_v47, %v5847_v32 }
 0x40a   : > { %v8658_v4 = vadd.f32 %v5768_v30, %v8526_v51  ;;  %v5771_v6 = vadd.f32 %v5770_v23, %v5769_v25 }
 0x40b   : > { %v5848_v19 = vpop.f32.mrb[152].mxu1 }
 0x40c   : > { %v8664_v11 = vadd.f32 %v5771_v6, %v8528_v48  ;;  %v5849_v31 = vpop.f32.mrb[153].mxu1 }
 0x40d   : > { %v5850_v15 = vadd.f32 %v5849_v31, %v5848_v19  ;;  %v5851_v62 = vpop.f32.mrb[154].mxu1 }
 0x40e   : > { %v5852_v20 = vpop.f32.mrb[155].mxu1 }
 0x40f   : > { %v5853_v55 = vadd.f32 %v5852_v20, %v5851_v62  ;;  %v8670_v51 = vadd.f32 %v8573_v1, %v5850_v15 }
 0x411   : > { %v8673_v33 = vadd.f32 %v8577_v54, %v5853_v55 }
 0x413   : > { %v5854_v38 = vpop.f32.mrb[156].mxu1 }
 0x414   : > { %v5855_v63 = vpop.f32.mrb[157].mxu1 }
 0x415   : > { %v5856_v36 = vadd.f32 %v5855_v63, %v5854_v38  ;;  %v5857_v48 = vpop.f32.mrb[158].mxu1 }
 0x416   : > { %v5858_v49 = vpop.f32.mrb[159].mxu1 }
 0x417   : > { %v5859_v60 = vadd.f32 %v5858_v49, %v5857_v48  ;;  %v8676_v47 = vadd.f32 %v8580_v56, %v5856_v36 }
 0x419   : > { %v8679_v58 = vadd.f32 %v8583_v16, %v5859_v60 }
 0x41b   : > { %v5860_v42 = vpop.f32.mrb[160].mxu1 }
 0x41c   : > { %v5861_v45 = vpop.f32.mrb[161].mxu1 }
 0x41d   : > { %v5862_v53 = vadd.f32 %v5861_v45, %v5860_v42  ;;  %v5863_v1 = vpop.f32.mrb[162].mxu1 }
 0x41e   : > { %v5864_v10 = vpop.f32.mrb[163].mxu1 }
 0x41f   : > { %v5865_v5 = vadd.f32 %v5864_v10, %v5863_v1  ;;  %v8682_v54 = vadd.f32 %v8586_v18, %v5862_v53 }
 0x421   : > { %v8685_v52 = vadd.f32 %v8589_v17, %v5865_v5 }
 0x423   : > { %v5866_v59 = vpop.f32.mrb[164].mxu1 }
 0x424   : > { %v5867_v40 = vpop.f32.mrb[165].mxu1 }
 0x425   : > { %v5868_v30 = vadd.f32 %v5867_v40, %v5866_v59  ;;  %v5869_v56 = vpop.f32.mrb[166].mxu1 }
 0x426   : > { %v5870_v25 = vpop.f32.mrb[167].mxu1 }
 0x427   : > { %v5871_v61 = vadd.f32 %v5870_v25, %v5869_v56  ;;  %v8688_v16 = vadd.f32 %v8592_v21, %v5868_v30 }
 0x429   : > { %v8691_v34 = vadd.f32 %v8595_v27, %v5871_v61 }
 0x42b   : > { %v5872_v23 = vpop.f32.mrb[168].mxu1 }
 0x42c   : > { %v5873_v7 = vpop.f32.mrb[169].mxu1 }
 0x42d   : > { %v5874_v6 = vadd.f32 %v5873_v7, %v5872_v23  ;;  %v5875_v18 = vpop.f32.mrb[170].mxu1 }
 0x42e   : > { %v5876_v32 = vpop.f32.mrb[171].mxu1 }
 0x42f   : > { %v5877_v19 = vadd.f32 %v5876_v32, %v5875_v18  ;;  %v8694_v17 = vadd.f32 %v8598_v37, %v5874_v6 }
 0x431   : > { %v8697_v31 = vadd.f32 %v8604_v35, %v5877_v19 }
 0x433   : > { %v5878_v15 = vpop.f32.mrb[172].mxu1 }
 0x434   : > { %v5879_v62 = vpop.f32.mrb[173].mxu1 }
 0x435   : > { %v5880_v20 = vadd.f32 %v5879_v62, %v5878_v15  ;;  %v5881_v21 = vpop.f32.mrb[174].mxu1 }
 0x436   : > { %v5882_v55 = vpop.f32.mrb[175].mxu1 }
 0x437   : > { %v5883_v38 = vadd.f32 %v5882_v55, %v5881_v21  ;;  %v8700_v27 = vadd.f32 %v8610_v26, %v5880_v20 }
 0x439   : > { %v8703_v63 = vadd.f32 %v8616_v41, %v5883_v38 }
 0x43b   : > { %v5884_v36 = vpop.f32.mrb[176].mxu1 }
 0x43c   : > { %v5885_v48 = vpop.f32.mrb[177].mxu1 }
 0x43d   : > { %v5886_v49 = vadd.f32 %v5885_v48, %v5884_v36  ;;  %v5887_v37 = vpop.f32.mrb[178].mxu1 }
 0x43e   : > { %v5888_v60 = vpop.f32.mrb[179].mxu1 }
 0x43f   : > { %v5889_v42 = vadd.f32 %v5888_v60, %v5887_v37  ;;  %v8706_v35 = vadd.f32 %v8622_v3, %v5886_v49 }
 0x441   : > { %v8709_v45 = vadd.f32 %v8628_v13, %v5889_v42 }
 0x443   : > { %v5890_v53 = vpop.f32.mrb[180].mxu1 }
 0x444   : > { %v5891_v1 = vpop.f32.mrb[181].mxu1 }
 0x445   : > { %v5892_v10 = vadd.f32 %v5891_v1, %v5890_v53  ;;  %v5893_v26 = vpop.f32.mrb[182].mxu1 }
 0x446   : > { %v5894_v5 = vpop.f32.mrb[183].mxu1 }
 0x447   : > { %v5895_v59 = vadd.f32 %v5894_v5, %v5893_v26  ;;  %v8712_v41 = vadd.f32 %v8634_v28, %v5892_v10 }
 0x449   : > { %v8715_v40 = vadd.f32 %v8640_v43, %v5895_v59 }
 0x44b   : > { %v5896_v30 = vpop.f32.mrb[184].mxu1 }
 0x44c   : > { %v5897_v56 = vpop.f32.mrb[185].mxu1 }
 0x44d   : > { %v5898_v25 = vadd.f32 %v5897_v56, %v5896_v30  ;;  %v5899_v3 = vpop.f32.mrb[186].mxu1 }
 0x44e   : > { %v5900_v61 = vpop.f32.mrb[187].mxu1 }
 0x44f   : > { %v5901_v13 = vadd.f32 %v5900_v61, %v5899_v3  ;;  %v8718_v23 = vadd.f32 %v8646_v22, %v5898_v25  ;;  %v8732_v22 = vld [vmem:[%s8888_s4] ss:$0 sm:$0xff] }
 0x451   : > { %v8721_v7 = vadd.f32 %v8652_v9, %v5901_v13 }
 0x453   : > { %v5902_v6 = vpop.f32.mrb[188].mxu1 }
 0x454   : > { %v5903_v18 = vpop.f32.mrb[189].mxu1 }
 0x455   : > { %v5904_v28 = vadd.f32 %v5903_v18, %v5902_v6  ;;  %v5905_v32 = vpop.f32.mrb[190].mxu1 }
 0x456   : > { %v5906_v19 = vpop.f32.mrb[191].mxu1 }
 0x457   : > { %v5907_v43 = vadd.f32 %v5906_v19, %v5905_v32  ;;  %v8724_v15 = vadd.f32 %v8658_v4, %v5904_v28 }
 0x459   : > { %v8727_v62 = vadd.f32 %v8664_v11, %v5907_v43 }
 0x45b   : > { %v6190_v20 = vpop.f32.mrb[96].mxu1 }
 0x45c   : > { %v6350_v9 = vadd.f32 %v8613_v57, %v6190_v20  ;;  %v4566_v21 = vpop.f32.mrb[97].mxu1 }
 0x45d   : > { %v6353_v55 = vadd.f32 %v8601_v14, %v4566_v21  ;;  %v6191_v38 = vpop.f32.mrb[98].mxu1 }
 0x45e   : > { %v4734_v36 = vadd.f32 %v6350_v9, %v8732_v22  ;;  %v6356_v4 = vadd.f32 %v8619_v50, %v6191_v38  ;;  %v4569_v48 = vpop.f32.mrb[99].mxu1 }
 0x45f   : > { %v4732_v11 = vadd.f32 %v6353_v55, %v8732_v22  ;;  %v6359_v49 = vadd.f32 %v8607_v8, %v4569_v48 }
 0x460   : > { %v4766_v37 = vmax.f32 %v4734_v36, 0.0  ;;  %v4735_v60 = vadd.f32 %v6356_v4, %v8732_v22 }
 0x461   : > { %v4764_v42 = vmax.f32 %v4732_v11, 0.0  ;;  %v4733_v53 = vadd.f32 %v6359_v49, %v8732_v22 }
 0x462   : > { %4798 = vst [vmem:[%s8743_s13 + $0x10] sm:$0xff] %v4766_v37  ;;  %v4767_v14 = vmax.f32 %v4735_v60, 0.0 }
 0x463   : > { %4796 = vst [vmem:[%s8743_s13] sm:$0xff] %v4764_v42  ;;  %v4765_v57 = vmax.f32 %v4733_v53, 0.0  ;;  %v6194_v50 = vpop.f32.mrb[100].mxu1 }
 0x464   : > { %4799 = vst [vmem:[%s8743_s13 + $0x18] sm:$0xff] %v4767_v14  ;;  %v6362_v8 = vadd.f32 %v8637_v29, %v6194_v50  ;;  %v4582_v1 = vpop.f32.mrb[101].mxu1 }
 0x465   : > { %4797 = vst [vmem:[%s8743_s13 + $0x8] sm:$0xff] %v4765_v57  ;;  %v6365_v10 = vadd.f32 %v8625_v46, %v4582_v1  ;;  %v6195_v26 = vpop.f32.mrb[102].mxu1 }
 0x466   : > { %v4738_v5 = vadd.f32 %v6362_v8, %v8732_v22  ;;  %v6368_v59 = vadd.f32 %v8643_v2, %v6195_v26  ;;  %v4585_v30 = vpop.f32.mrb[103].mxu1 }
 0x467   : > { %v4736_v56 = vadd.f32 %v6365_v10, %v8732_v22  ;;  %v6371_v25 = vadd.f32 %v8631_v0, %v4585_v30 }
 0x468   : > { %v4770_v3 = vmax.f32 %v4738_v5, 0.0  ;;  %v4739_v29 = vadd.f32 %v6368_v59, %v8732_v22 }
 0x469   : > { %v4768_v61 = vmax.f32 %v4736_v56, 0.0  ;;  %v4737_v13 = vadd.f32 %v6371_v25, %v8732_v22 }
 0x46a   : > { %4802 = vst [vmem:[%s8743_s13 + $0x30] sm:$0xff] %v4770_v3  ;;  %v4771_v46 = vmax.f32 %v4739_v29, 0.0 }
 0x46b   : > { %4800 = vst [vmem:[%s8743_s13 + $0x20] sm:$0xff] %v4768_v61  ;;  %v4769_v6 = vmax.f32 %v4737_v13, 0.0  ;;  %v6198_v18 = vpop.f32.mrb[104].mxu1 }
 0x46c   : > { %4803 = vst [vmem:[%s8743_s13 + $0x38] sm:$0xff] %v4771_v46  ;;  %v6374_v2 = vadd.f32 %v8661_v12, %v6198_v18  ;;  %v4598_v28 = vpop.f32.mrb[105].mxu1 }
 0x46d   : > { %4801 = vst [vmem:[%s8743_s13 + $0x28] sm:$0xff] %v4769_v6  ;;  %v6377_v0 = vadd.f32 %v8649_v44, %v4598_v28  ;;  %v6199_v32 = vpop.f32.mrb[106].mxu1 }
 0x46e   : > { %v4742_v19 = vadd.f32 %v6374_v2, %v8732_v22  ;;  %v6380_v43 = vadd.f32 %v8667_v24, %v6199_v32  ;;  %v4601_v20 = vpop.f32.mrb[107].mxu1 }
 0x46f   : > { %v4740_v9 = vadd.f32 %v6377_v0, %v8732_v22  ;;  %v6383_v21 = vadd.f32 %v8655_v39, %v4601_v20 }
 0x470   : > { %v4774_v55 = vmax.f32 %v4742_v19, 0.0  ;;  %v4743_v12 = vadd.f32 %v6380_v43, %v8732_v22 }
 0x471   : > { %v4772_v38 = vmax.f32 %v4740_v9, 0.0  ;;  %v4741_v36 = vadd.f32 %v6383_v21, %v8732_v22 }
 0x472   : > { %4806 = vst [vmem:[%s8743_s13 + $0x50] sm:$0xff] %v4774_v55  ;;  %v4775_v44 = vmax.f32 %v4743_v12, 0.0 }
 0x473   : > { %4804 = vst [vmem:[%s8743_s13 + $0x40] sm:$0xff] %v4772_v38  ;;  %v4773_v4 = vmax.f32 %v4741_v36, 0.0  ;;  %v6202_v48 = vpop.f32.mrb[108].mxu1 }
 0x474   : > { %4807 = vst [vmem:[%s8743_s13 + $0x58] sm:$0xff] %v4775_v44  ;;  %v6386_v24 = vadd.f32 %v8676_v47, %v6202_v48  ;;  %v4614_v11 = vpop.f32.mrb[109].mxu1 }
 0x475   : > { %4805 = vst [vmem:[%s8743_s13 + $0x48] sm:$0xff] %v4773_v4  ;;  %v6389_v39 = vadd.f32 %v8670_v51, %v4614_v11  ;;  %v6203_v49 = vpop.f32.mrb[110].mxu1 }
 0x476   : > { %v4746_v37 = vadd.f32 %v6386_v24, %v8732_v22  ;;  %v6392_v60 = vadd.f32 %v8679_v58, %v6203_v49  ;;  %v4617_v42 = vpop.f32.mrb[111].mxu1 }
 0x477   : > { %v4744_v53 = vadd.f32 %v6389_v39, %v8732_v22  ;;  %v6395_v14 = vadd.f32 %v8673_v33, %v4617_v42 }
 0x478   : > { %v4778_v57 = vmax.f32 %v4746_v37, 0.0  ;;  %v4747_v47 = vadd.f32 %v6392_v60, %v8732_v22 }
 0x479   : > { %v4776_v50 = vmax.f32 %v4744_v53, 0.0  ;;  %v4745_v8 = vadd.f32 %v6395_v14, %v8732_v22 }
 0x47a   : > { %4810 = vst [vmem:[%s8743_s13 + $0x70] sm:$0xff] %v4778_v57  ;;  %v4779_v51 = vmax.f32 %v4747_v47, 0.0 }
 0x47b   : > { %4808 = vst [vmem:[%s8743_s13 + $0x60] sm:$0xff] %v4776_v50  ;;  %v4777_v1 = vmax.f32 %v4745_v8, 0.0  ;;  %v6206_v10 = vpop.f32.mrb[112].mxu1 }
 0x47c   : > { %4811 = vst [vmem:[%s8743_s13 + $0x78] sm:$0xff] %v4779_v51  ;;  %v6398_v58 = vadd.f32 %v8688_v16, %v6206_v10  ;;  %v4630_v26 = vpop.f32.mrb[113].mxu1 }
 0x47d   : > { %4809 = vst [vmem:[%s8743_s13 + $0x68] sm:$0xff] %v4777_v1  ;;  %v6401_v33 = vadd.f32 %v8682_v54, %v4630_v26  ;;  %v6207_v5 = vpop.f32.mrb[114].mxu1 }
 0x47e   : > { %v4750_v59 = vadd.f32 %v6398_v58, %v8732_v22  ;;  %v6404_v30 = vadd.f32 %v8691_v34, %v6207_v5  ;;  %v4633_v56 = vpop.f32.mrb[115].mxu1 }
 0x47f   : > { %v4748_v25 = vadd.f32 %v6401_v33, %v8732_v22  ;;  %v6407_v3 = vadd.f32 %v8685_v52, %v4633_v56 }
 0x480   : > { %v4782_v29 = vmax.f32 %v4750_v59, 0.0  ;;  %v4751_v16 = vadd.f32 %v6404_v30, %v8732_v22 }
 0x481   : > { %v4780_v61 = vmax.f32 %v4748_v25, 0.0  ;;  %v4749_v13 = vadd.f32 %v6407_v3, %v8732_v22 }
 0x482   : > { %4814 = vst [vmem:[%s8743_s13 + $0x90] sm:$0xff] %v4782_v29  ;;  %v4783_v54 = vmax.f32 %v4751_v16, 0.0 }
 0x483   : > { %4812 = vst [vmem:[%s8743_s13 + $0x80] sm:$0xff] %v4780_v61  ;;  %v4781_v46 = vmax.f32 %v4749_v13, 0.0  ;;  %v6210_v6 = vpop.f32.mrb[116].mxu1 }
 0x484   : > { %4815 = vst [vmem:[%s8743_s13 + $0x98] sm:$0xff] %v4783_v54  ;;  %v6410_v34 = vadd.f32 %v8700_v27, %v6210_v6  ;;  %v4646_v18 = vpop.f32.mrb[117].mxu1 }
 0x485   : > { %4813 = vst [vmem:[%s8743_s13 + $0x88] sm:$0xff] %v4781_v46  ;;  %v6413_v52 = vadd.f32 %v8694_v17, %v4646_v18  ;;  %v6211_v2 = vpop.f32.mrb[118].mxu1 }
 0x486   : > { %v4754_v28 = vadd.f32 %v6410_v34, %v8732_v22  ;;  %v6416_v0 = vadd.f32 %v8703_v63, %v6211_v2  ;;  %v4649_v32 = vpop.f32.mrb[119].mxu1 }
 0x487   : > { %v4752_v19 = vadd.f32 %v6413_v52, %v8732_v22  ;;  %v6419_v43 = vadd.f32 %v8697_v31, %v4649_v32 }
 0x488   : > { %v4786_v20 = vmax.f32 %v4754_v28, 0.0  ;;  %v4755_v27 = vadd.f32 %v6416_v0, %v8732_v22 }
 0x489   : > { %v4784_v9 = vmax.f32 %v4752_v19, 0.0  ;;  %v4753_v21 = vadd.f32 %v6419_v43, %v8732_v22 }
 0x48a   : > { %4818 = vst [vmem:[%s8743_s13 + $0xb0] sm:$0xff] %v4786_v20  ;;  %v4787_v17 = vmax.f32 %v4755_v27, 0.0 }
 0x48b   : > { %4816 = vst [vmem:[%s8743_s13 + $0xa0] sm:$0xff] %v4784_v9  ;;  %v4785_v55 = vmax.f32 %v4753_v21, 0.0  ;;  %v6214_v12 = vpop.f32.mrb[120].mxu1 }
 0x48c   : > { %4819 = vst [vmem:[%s8743_s13 + $0xb8] sm:$0xff] %v4787_v17  ;;  %v6422_v63 = vadd.f32 %v8712_v41, %v6214_v12  ;;  %v4662_v38 = vpop.f32.mrb[121].mxu1 }
 0x48d   : > { %4817 = vst [vmem:[%s8743_s13 + $0xa8] sm:$0xff] %v4785_v55  ;;  %v6425_v31 = vadd.f32 %v8706_v35, %v4662_v38  ;;  %v6215_v36 = vpop.f32.mrb[122].mxu1 }
 0x48e   : > { %v4758_v44 = vadd.f32 %v6422_v63, %v8732_v22  ;;  %v6428_v4 = vadd.f32 %v8715_v40, %v6215_v36  ;;  %v4665_v48 = vpop.f32.mrb[123].mxu1 }
 0x48f   : > { %v4756_v24 = vadd.f32 %v6425_v31, %v8732_v22  ;;  %v6431_v11 = vadd.f32 %v8709_v45, %v4665_v48 }
 0x490   : > { %v4790_v39 = vmax.f32 %v4758_v44, 0.0  ;;  %v4759_v41 = vadd.f32 %v6428_v4, %v8732_v22 }
 0x491   : > { %v4788_v49 = vmax.f32 %v4756_v24, 0.0  ;;  %v4757_v37 = vadd.f32 %v6431_v11, %v8732_v22 }
 0x492   : > { %4822 = vst [vmem:[%s8743_s13 + $0xd0] sm:$0xff] %v4790_v39  ;;  %v4791_v35 = vmax.f32 %v4759_v41, 0.0 }
 0x493   : > { %4820 = vst [vmem:[%s8743_s13 + $0xc0] sm:$0xff] %v4788_v49  ;;  %v4789_v60 = vmax.f32 %v4757_v37, 0.0  ;;  %v6218_v42 = vpop.f32.mrb[124].mxu1 }
 0x494   : > { %4823 = vst [vmem:[%s8743_s13 + $0xd8] sm:$0xff] %v4791_v35  ;;  %v6434_v40 = vadd.f32 %v8724_v15, %v6218_v42  ;;  %v4678_v53 = vpop.f32.mrb[125].mxu1 }
 0x495   : > { %4821 = vst [vmem:[%s8743_s13 + $0xc8] sm:$0xff] %v4789_v60  ;;  %v6437_v45 = vadd.f32 %v8718_v23, %v4678_v53  ;;  %v6219_v14 = vpop.f32.mrb[126].mxu1 }
 0x496   : > { %v4762_v57 = vadd.f32 %v6434_v40, %v8732_v22  ;;  %v6440_v47 = vadd.f32 %v8727_v62, %v6219_v14  ;;  %v4681_v50 = vpop.f32.mrb[127].mxu1 }
 0x497   : > { %v4760_v8 = vadd.f32 %v6437_v45, %v8732_v22  ;;  %v6443_v51 = vadd.f32 %v8721_v7, %v4681_v50 }
 0x498   : > { %v4794_v15 = vmax.f32 %v4762_v57, 0.0  ;;  %v4763_v23 = vadd.f32 %v6440_v47, %v8732_v22 }
 0x499   : > { %v4792_v1 = vmax.f32 %v4760_v8, 0.0  ;;  %v4761_v10 = vadd.f32 %v6443_v51, %v8732_v22 }
 0x49a   : > { %4826 = vst [vmem:[%s8743_s13 + $0xf0] sm:$0xff] %v4794_v15  ;;  %v4795_v58 = vmax.f32 %v4763_v23, 0.0 }
 0x49b   : > { %4824 = vst [vmem:[%s8743_s13 + $0xe0] sm:$0xff] %v4792_v1  ;;  %v4793_v7 = vmax.f32 %v4761_v10, 0.0 }
 0x49c   : > { %4827 = vst [vmem:[%s8743_s13 + $0xf8] sm:$0xff] %v4795_v58 }
 0x49d   : > { %4825 = vst [vmem:[%s8743_s13 + $0xe8] sm:$0xff] %v4793_v7 }
 0x49e   : > { %6877 = shalt.err (!%p6874_p1)
}
 0x49f   : > { %s6878_s15 = scalar_lea.hbm %s8835_s6, 4096  ;;  %s6882_s28 = scalar_lea.hbm %s8889_s5, 8192 }
 0x4a0   : > { %p6879_p13 = scmp.ne.s32.totalorder %s8835_s6, %s6878_s15  ;;  %p6883_p4 = scmp.lt.u32.totalorder %s8835_s6, %s8889_s5 }
 0x4a1   : > { %p6884_p5 = scmp.lt.u32.totalorder %s6882_s28, %s6878_s15  ;;  %p6886_p11 = scmp.lt.u32.totalorder %s6878_s15, %s8835_s6 }
 0x4a2   : > { %p6880_p6 = pnand %p6879_p13, %p8973_p0 }
 0x4a3   : > { %p6885_p8 = por %p6884_p5, %p6883_p4 }
 0x4a4   : > { %p6881_p10 = pneg %p6880_p6 }
 0x4a5   : > { %p6887_p2 = por %p6886_p11, %p6885_p8 }
 0x4a7   : > { %p6888_p3 = pnand %p6887_p2, %p6881_p10 }
 0x4a9   : > { %6891 = shalt.err (!%p6888_p3)
}
 0x4aa   : > { %s6943_s30 = smov 128   ;;  %s6944_s17 = smov 8  }
 0x4ab   : > { %6550 = dma.vmem_to_hbm [thread:$0]  (%p8973_p0), %s8837_s11, 4096, %s8835_s6, %s4829_s22, %s6943_s30, %s6943_s30, %s6944_s17  }
 0x4ac PF: > { %s4857_s7 = sand.u32 1, %s6922_s18   ;;  %p8974_p7 = scmp.ne.s32.totalorder %s8905_s25, 0 }
 0x4ad   : > { %p8975_p9 = scmp.ge.s32.totalorder %s6934_s21, 2  ;;  %s4858_s8 = scalar_lea.sflag [#allocation6], %s4857_s7 }
 0x4af   : > { %p6564_p12 = pnand %p8975_p9, %p8974_p7 }
 0x4b1   : > { %6917 = dma.done.wait (!%p6564_p12), %s4858_s8, 4096  }
 0x4b2   : > { %6919 = vsyncadd (!%p6564_p12), %s4858_s8, 4294963200  ;;  %p19_p1 = scmp.ge.s32.totalorder %s7091_s29, 4   ;;  %s8976_s18 = smov %s6926_s19 }
 0x4b3   : > { %s8977_s19 = smov %s6930_s20  ;;  %s8978_s20 = smov %s7107_s27 }
 0x4b4   : > { %s8979_s21 = smov %s7091_s29  ;;  %21 = sbr.rel (!%p19_p1) target bundleno = 6 (0x6), region = 103 }
 0x4bb   :  { %4863 = vsyncpa [#allocation5], 1 }
 0x4bc   :  { %4865 = vsyncpa [#allocation5 + $0x1], 1 }
 0x4bd   :  { %4866 = vsyncpa [#allocation8], 1 }
 0x4be   :  { %4867 = vsyncpa [#allocation6], 1 }
 0x4bf   :  { %4869 = vsyncpa [#allocation6 + $0x1], 1 }

</bundles_post_ra>
